<compile_context>
chip_gen: v7x
topology: tpu7x:2x2x1
jax: 0.10.0
libtpu: 0.0.40
codegen_flags: <defaults>
</compile_context>

<pallas_src>
import functools

import jax
import jax.numpy as jnp
from jax.experimental import pallas as pl
from jax.experimental.pallas import tpu as pltpu

EPS = 1e-5
LANE = 128
PADL = 16   # sublane-aligned (bf16) column offset of the conv2 pad scratch

_VMEM_LIMIT = None


def _round_up(x, m):
    return (x + m - 1) // m * m


def _vmem_limit():
    """~75% of physical VMEM (leave headroom for double-buffering/scratch)."""
    global _VMEM_LIMIT
    if _VMEM_LIMIT is None:
        try:
            cap = pltpu.get_tpu_info().vmem_capacity_bytes
            _VMEM_LIMIT = max(int(cap) * 3 // 4, 32 * 1024 * 1024)
        except Exception:
            _VMEM_LIMIT = 48 * 1024 * 1024
    return _VMEM_LIMIT


def _pick_th(ho, wo):
    """Output-row strip height: a divisor of ho with a bounded strip area."""
    for th in (32, 16, 8):
        if th < ho and ho % th == 0 and th * wo <= 4096:
            return th
    for th in (8, 16, 32):
        if th < ho and ho % th == 0:
            return th
    return ho


# ----------------------------- Pallas kernels -----------------------------

def _conv1_kernel(xm_ref, xh0_ref, xh1_ref, w_ref, y_ref, sum_ref, ssq_ref,
                  stitch, slab, *, th, wo, stride):
    """3x3 strided conv on one (batch, row-strip): phase-decomposed padded
    input strip (+2 halo rows) -> bf16 im2col slab -> one deep-K MXU dot.
    Also emits per-strip channel sum / sum-of-squares for BN1 (f32 acc)."""
    s = stride
    cin = stitch.shape[-1]
    cout = w_ref.shape[-1]
    # Stitch main strip + halo rows once (full-width, aligned stores).
    stitch[:, :th] = xm_ref[0]
    stitch[:, th:th + 1] = xh0_ref[0]
    stitch[:, th + 1:th + 2] = xh1_ref[0]
    # Pack the 9 taps into a lane-aligned bf16 im2col slab.
    for t in range(9):
        dh, dw = t // 3, t % 3
        ph = (dh % s) * s + (dw % s)          # stride phase of this tap
        rb, cb = dh // s, dw // s             # row/col offset inside phase
        xt = stitch[ph, rb:rb + th, cb:cb + wo, :]
        slab[:, t * cin:(t + 1) * cin] = xt.reshape(th * wo, cin)
    # One K = 9*cin matmul per strip (f32 accumulate on the MXU).
    acc = jnp.dot(slab[...], w_ref[...], preferred_element_type=jnp.float32)
    y_ref[...] = acc.reshape(1, th, wo, cout).astype(y_ref.dtype)
    sum_ref[...] = jnp.sum(acc, axis=0).reshape(1, 1, cout)
    ssq_ref[...] = jnp.sum(acc * acc, axis=0).reshape(1, 1, cout)


def _bnrelu_conv2_kernel(y1m_ref, y1a_ref, y1b_ref, sc_ref, sh_ref, w_ref,
                         y2_ref, sum_ref, ssq_ref, pad_buf, slab, *, th, wo):
    """Fused BN1-apply + ReLU on a y1 row strip (+1-row halos), zero padding
    in a bf16 VMEM scratch, 3x3 stride-1 conv as one deep-K dot, plus BN2
    partial sums (from the f32 accumulator)."""
    cin = w_ref.shape[0] // 9
    cout = w_ref.shape[-1]
    r = pl.program_id(1)
    last = pl.num_programs(1) - 1
    sc = sc_ref[...].reshape(1, 1, cin)
    sh = sh_ref[...].reshape(1, 1, cin)

    def bn_relu(v):
        return jnp.maximum(v.astype(jnp.float32) * sc + sh, 0.0)

    a_main = bn_relu(y1m_ref[0])                                  # (th, wo, c)
    a_above = jnp.where(r == 0, 0.0, bn_relu(y1a_ref[0]))         # (1, wo, c)
    a_below = jnp.where(r == last, 0.0, bn_relu(y1b_ref[0]))      # (1, wo, c)

    # Activation strip lives at column offset PADL (sublane-aligned store for
    # bf16).  Zero columns at PADL-1 / PADL+wo supply the W zero padding; no
    # full-buffer zero fill.
    zcol = jnp.zeros((th + 2, 1, cin), jnp.bfloat16)
    pad_buf[:, PADL - 1:PADL, :] = zcol
    pad_buf[:, PADL + wo:PADL + wo + 1, :] = zcol
    pad_buf[0:1, PADL:PADL + wo, :] = a_above.astype(jnp.bfloat16)
    pad_buf[1:th + 1, PADL:PADL + wo, :] = a_main.astype(jnp.bfloat16)
    pad_buf[th + 1:th + 2, PADL:PADL + wo, :] = a_below.astype(jnp.bfloat16)

    for t in range(9):
        dh, dw = t // 3, t % 3
        xt = pad_buf[dh:dh + th, PADL - 1 + dw:PADL - 1 + dw + wo, :]
        slab[:, t * cin:(t + 1) * cin] = xt.reshape(th * wo, cin)
    acc = jnp.dot(slab[...], w_ref[...], preferred_element_type=jnp.float32)
    y2_ref[...] = acc.reshape(1, th, wo, cout).astype(y2_ref.dtype)
    sum_ref[...] = jnp.sum(acc, axis=0).reshape(1, 1, cout)
    ssq_ref[...] = jnp.sum(acc * acc, axis=0).reshape(1, 1, cout)


def _bn_residual_relu_kernel(*refs, th, wo, downsample):
    """Fused BN2-apply + residual (identity or strided 1x1 conv+bias) + ReLU
    on one (batch, row-strip)."""
    if downsample:
        y2_ref, sc_ref, sh_ref, xph_ref, wd_ref, bd_ref, o_ref = refs
    else:
        y2_ref, sc_ref, sh_ref, xid_ref, o_ref = refs
    cout = o_ref.shape[-1]
    out = (y2_ref[0].astype(jnp.float32).reshape(th * wo, cout)
           * sc_ref[...] + sh_ref[...])
    if downsample:
        cin = wd_ref.shape[0]
        # The DMA'd block is the single stride phase holding x[s*i, s*j];
        # its rows line up 1:1 with the output rows of this strip.
        xs = xph_ref[0, 0, :, :wo, :].reshape(th * wo, cin)
        res = jnp.dot(xs, wd_ref[...],
                      preferred_element_type=jnp.float32) + bd_ref[...]
    else:
        res = xid_ref[0].astype(jnp.float32).reshape(th * wo, cout)
    o_ref[...] = jnp.maximum(out + res, 0.0).reshape(1, th, wo, cout)


# --------------------------- pallas_call builders ---------------------------

def conv1_call(xph5, w1flat, *, n, th, nstrips, wo, stride):
    _, ss, hq, wq, cin = xph5.shape
    cout = w1flat.shape[-1]
    ho = th * nstrips
    kernel = functools.partial(_conv1_kernel, th=th, wo=wo, stride=stride)
    return pl.pallas_call(
        kernel,
        out_shape=(jax.ShapeDtypeStruct((n, ho, wo, cout), jnp.bfloat16),
                   jax.ShapeDtypeStruct((n * nstrips, 1, cout), jnp.float32),
                   jax.ShapeDtypeStruct((n * nstrips, 1, cout), jnp.float32)),
        grid=(n, nstrips),
        in_specs=[
            pl.BlockSpec((1, ss, th, wq, cin), lambda b, r: (b, 0, r, 0, 0)),
            pl.BlockSpec((1, ss, 1, wq, cin),
                         lambda b, r: (b, 0, jnp.minimum(r * th + th, hq - 1),
                                       0, 0)),
            pl.BlockSpec((1, ss, 1, wq, cin),
                         lambda b, r: (b, 0,
                                       jnp.minimum(r * th + th + 1, hq - 1),
                                       0, 0)),
            pl.BlockSpec((9 * cin, cout), lambda b, r: (0, 0)),
        ],
        out_specs=(
            pl.BlockSpec((1, th, wo, cout), lambda b, r: (b, r, 0, 0)),
            pl.BlockSpec((1, 1, cout), lambda b, r: (b * nstrips + r, 0, 0)),
            pl.BlockSpec((1, 1, cout), lambda b, r: (b * nstrips + r, 0, 0)),
        ),
        scratch_shapes=[pltpu.VMEM((ss, th + 2, wq, cin), jnp.bfloat16),
                        pltpu.VMEM((th * wo, 9 * cin), jnp.bfloat16)],
        compiler_params=pltpu.CompilerParams(
            dimension_semantics=("parallel", "parallel"),
            vmem_limit_bytes=_vmem_limit()),
    )(xph5, xph5, xph5, w1flat)


def conv2_call(y1, sc, sh, w2flat, *, n, th, nstrips, wo):
    cin = y1.shape[-1]
    cout = w2flat.shape[-1]
    ho = th * nstrips
    kernel = functools.partial(_bnrelu_conv2_kernel, th=th, wo=wo)
    return pl.pallas_call(
        kernel,
        out_shape=(jax.ShapeDtypeStruct((n, ho, wo, cout), jnp.bfloat16),
                   jax.ShapeDtypeStruct((n * nstrips, 1, cout), jnp.float32),
                   jax.ShapeDtypeStruct((n * nstrips, 1, cout), jnp.float32)),
        grid=(n, nstrips),
        in_specs=[
            pl.BlockSpec((1, th, wo, cin), lambda b, r: (b, r, 0, 0)),
            pl.BlockSpec((1, 1, wo, cin),
                         lambda b, r: (b, jnp.maximum(r * th - 1, 0), 0, 0)),
            pl.BlockSpec((1, 1, wo, cin),
                         lambda b, r: (b, jnp.minimum(r * th + th, ho - 1),
                                       0, 0)),
            pl.BlockSpec((1, cin), lambda b, r: (0, 0)),
            pl.BlockSpec((1, cin), lambda b, r: (0, 0)),
            pl.BlockSpec((9 * cin, cout), lambda b, r: (0, 0)),
        ],
        out_specs=(
            pl.BlockSpec((1, th, wo, cout), lambda b, r: (b, r, 0, 0)),
            pl.BlockSpec((1, 1, cout), lambda b, r: (b * nstrips + r, 0, 0)),
            pl.BlockSpec((1, 1, cout), lambda b, r: (b * nstrips + r, 0, 0)),
        ),
        scratch_shapes=[pltpu.VMEM((th + 2, PADL + wo + 8, cin), jnp.bfloat16),
                        pltpu.VMEM((th * wo, 9 * cin), jnp.bfloat16)],
        compiler_params=pltpu.CompilerParams(
            dimension_semantics=("parallel", "parallel"),
            vmem_limit_bytes=_vmem_limit()),
    )(y1, y1, y1, sc, sh, w2flat)


def bn_residual_relu_call(y2, sc, sh, res_in, wd, bd, *, n, th, nstrips, wo,
                          stride):
    cout = y2.shape[-1]
    ho = th * nstrips
    downsample = wd is not None
    kernel = functools.partial(_bn_residual_relu_kernel, th=th, wo=wo,
                               downsample=downsample)
    in_specs = [pl.BlockSpec((1, th, wo, cout), lambda b, r: (b, r, 0, 0)),
                pl.BlockSpec((1, cout), lambda b, r: (0, 0)),
                pl.BlockSpec((1, cout), lambda b, r: (0, 0))]
    args = [y2, sc, sh]
    if downsample:
        _, ss, hq, wq, cin = res_in.shape
        s = stride
        ph = (1 % s) * s + (1 % s)            # phase holding x[s*i, s*j]
        in_specs.append(pl.BlockSpec((1, 1, th, wq, cin),
                                     lambda b, r: (b, ph, r, 0, 0)))
        in_specs += [pl.BlockSpec((cin, cout), lambda b, r: (0, 0)),
                     pl.BlockSpec((1, cout), lambda b, r: (0, 0))]
        args += [res_in, wd, bd]
    else:
        cin = res_in.shape[-1]
        in_specs.append(pl.BlockSpec((1, th, wo, cin),
                                     lambda b, r: (b, r, 0, 0)))
        args.append(res_in)
    return pl.pallas_call(
        kernel,
        out_shape=jax.ShapeDtypeStruct((n, ho, wo, cout), jnp.float32),
        grid=(n, nstrips),
        in_specs=in_specs,
        out_specs=pl.BlockSpec((1, th, wo, cout), lambda b, r: (b, r, 0, 0)),
        compiler_params=pltpu.CompilerParams(
            dimension_semantics=("parallel", "parallel"),
            vmem_limit_bytes=_vmem_limit()),
    )(*args)


# ------------------------------ JAX glue ------------------------------

def _phase_decompose(xp, s):
    """xp: (N, Hp, Wp, C) padded input -> (N, s*s, Hq, Wq, C) where
    [:, a*s + b, q, j] holds xp[:, q*s + a, j*s + b]."""
    n, hp, wp, c = xp.shape
    hq = -(-hp // s)
    wq = -(-wp // s)
    xp = jnp.pad(xp, ((0, 0), (0, hq * s - hp), (0, wq * s - wp), (0, 0)))
    xph = xp.reshape(n, hq, s, wq, s, c).transpose(0, 2, 4, 1, 3, 5)
    return xph.reshape(n, s * s, hq, wq, c), hq, wq


def _prep_w3x3(w, cp_in, cp_out):
    co, ci, kh, kw = w.shape
    wm = jnp.transpose(w, (2, 3, 1, 0)).reshape(kh * kw, ci, co)
    wm = jnp.pad(wm, ((0, 0), (0, cp_in - ci), (0, cp_out - co)))
    return wm.reshape(kh * kw * cp_in, cp_out).astype(jnp.bfloat16)


def _prep_w1x1(w, cp_in, cp_out):
    co, ci = w.shape[0], w.shape[1]
    wm = jnp.transpose(w.reshape(co, ci), (1, 0))
    wm = jnp.pad(wm, ((0, cp_in - ci), (0, cp_out - co)))
    return wm.astype(jnp.bfloat16)


def _bn_scale_shift(sums, sumsqs, m_total, gamma, beta, cp):
    tot = jnp.sum(sums, axis=(0, 1))                      # (cp,)
    totsq = jnp.sum(sumsqs, axis=(0, 1))
    mean = tot / m_total
    var = jnp.maximum(totsq / m_total - mean * mean, 0.0)
    g = jnp.pad(gamma, (0, cp - gamma.shape[0]))
    b = jnp.pad(beta, (0, cp - beta.shape[0]))
    scale = g * jax.lax.rsqrt(var + EPS)
    shift = b - mean * scale
    return (scale.reshape(1, cp).astype(jnp.float32),
            shift.reshape(1, cp).astype(jnp.float32))


def resnet_block_forward(x_nchw, params, stride):
    n, c_in, h, w = x_nchw.shape
    c_out = params["conv1_w"].shape[0]
    s = int(stride)
    ho = (h - 1) // s + 1
    wo = (w - 1) // s + 1
    cp_in = _round_up(c_in, LANE)
    cp_out = _round_up(c_out, LANE)
    if s == 1 and c_in != c_out:
        raise ValueError("identity residual requires c_in == c_out")
    th = _pick_th(ho, wo)
    nstrips = ho // th

    # NCHW -> NHWC, lane-pad channels to 128, cast bf16 once, spatial pad,
    # then stride-phase decompose (for s == 1 this is just the padded input).
    x = jnp.transpose(x_nchw, (0, 2, 3, 1))
    x = jnp.pad(x, ((0, 0), (0, 0), (0, 0),
                    (0, cp_in - c_in))).astype(jnp.bfloat16)
    xp = jnp.pad(x, ((0, 0), (1, 1), (1, 1), (0, 0)))
    xph5, _, _ = _phase_decompose(xp, s)

    w1f = _prep_w3x3(params["conv1_w"], cp_in, cp_out)
    w2f = _prep_w3x3(params["conv2_w"], cp_out, cp_out)
    m_total = n * ho * wo

    # conv1 (+ fused BN1 partial sums); y1 stored bf16.
    y1, s1, q1 = conv1_call(xph5, w1f, n=n, th=th, nstrips=nstrips, wo=wo,
                            stride=s)
    sc1, sh1 = _bn_scale_shift(s1, q1, m_total,
                               params["bn1_gamma"], params["bn1_beta"], cp_out)

    # BN1-apply + ReLU fused into conv2 (+ BN2 partial sums); y2 stored bf16.
    y2, s2, q2 = conv2_call(y1, sc1, sh1, w2f, n=n, th=th, nstrips=nstrips,
                            wo=wo)
    sc2, sh2 = _bn_scale_shift(s2, q2, m_total,
                               params["bn2_gamma"], params["bn2_beta"], cp_out)

    # BN2-apply + residual (+ fused 1x1 strided downsample) + ReLU.
    if s > 1:
        wd = _prep_w1x1(params["down_w"], cp_in, cp_out)
        bd = jnp.pad(params["down_b"], (0, cp_out - c_out))
        bd = bd.reshape(1, cp_out).astype(jnp.float32)
        res_in = xph5
    else:
        wd = bd = None
        res_in = x
    out = bn_residual_relu_call(y2, sc2, sh2, res_in, wd, bd,
                                n=n, th=th, nstrips=nstrips, wo=wo, stride=s)

    out = out[..., :c_out]                       # drop padded channels
    return jnp.transpose(out, (0, 3, 1, 2))      # back to NCHW


# --------------------------- params / reference ---------------------------

def init_params(key, c_in, c_out, stride):
    ks = jax.random.split(key, 8)
    p = {
        "conv1_w": 0.1 * jax.random.normal(ks[0], (c_out, c_in, 3, 3), jnp.float32),
        "conv2_w": 0.1 * jax.random.normal(ks[1], (c_out, c_out, 3, 3), jnp.float32),
        "bn1_gamma": 1.0 + 0.1 * jax.random.normal(ks[2], (c_out,), jnp.float32),
        "bn1_beta": 0.1 * jax.random.normal(ks[3], (c_out,), jnp.float32),
        "bn2_gamma": 1.0 + 0.1 * jax.random.normal(ks[4], (c_out,), jnp.float32),
        "bn2_beta": 0.1 * jax.random.normal(ks[5], (c_out,), jnp.float32),
    }
    if stride > 1:
        p["down_w"] = 0.1 * jax.random.normal(ks[6], (c_out, c_in, 1, 1), jnp.float32)
        p["down_b"] = 0.1 * jax.random.normal(ks[7], (c_out,), jnp.float32)
    return p


def reference_forward(x, params, stride):
    dn = ("NCHW", "OIHW", "NCHW")
    conv = functools.partial(jax.lax.conv_general_dilated,
                             dimension_numbers=dn,
                             precision=jax.lax.Precision.HIGHEST)

    def bn(y, gamma, beta):
        mean = jnp.mean(y, axis=(0, 2, 3), keepdims=True)
        var = jnp.mean((y - mean) ** 2, axis=(0, 2, 3), keepdims=True)
        return ((y - mean) * jax.lax.rsqrt(var + EPS)
                * gamma[None, :, None, None] + beta[None, :, None, None])

    out = conv(x, params["conv1_w"], (stride, stride), ((1, 1), (1, 1)))
    out = jax.nn.relu(bn(out, params["bn1_gamma"], params["bn1_beta"]))
    out = conv(out, params["conv2_w"], (1, 1), ((1, 1), (1, 1)))
    out = bn(out, params["bn2_gamma"], params["bn2_beta"])
    if stride > 1:
        res = conv(x, params["down_w"], (stride, stride), ((0, 0), (0, 0)))
        res = res + params["down_b"][None, :, None, None]
    else:
        res = x
    return jax.nn.relu(out + res)


if __name__ == "__main__":
    fwd = jax.jit(resnet_block_forward, static_argnames=("stride",))
    key = jax.random.PRNGKey(0)
    keys = jax.random.split(key, 6)

    # bf16 inputs / intermediates on the MXU path (f32 accumulate).
    TOL = 2.5e-2

    def check(name, x, params, stride):
        out = jax.block_until_ready(fwd(x, params, stride=stride))
        ref = reference_forward(x, params, stride)
        if not jnp.allclose(out, ref, rtol=TOL, atol=TOL):
            raise AssertionError(
                f"{name} mismatch, max abs err "
                f"{float(jnp.max(jnp.abs(out - ref)))}")

    # Case 1: stride=2 (downsample branch), single strip.
    x1 = jax.random.normal(keys[0], (2, 4, 16, 16), jnp.float32)
    p1 = init_params(keys[1], 4, 8, 2)
    check("stride=2", x1, p1, 2)

    # Case 2: stride=1 (identity residual), 2 row strips -> halo path.
    x2 = jax.random.normal(keys[2], (2, 8, 16, 16), jnp.float32)
    p2 = init_params(keys[3], 8, 8, 1)
    check("stride=1", x2, p2, 1)

    # Case 3: stride=2 with 2 row strips -> strided-conv halo path.
    x3 = jax.random.normal(keys[4], (2, 4, 32, 32), jnp.float32)
    p3 = init_params(keys[5], 4, 8, 2)
    check("stride=2 strips", x3, p3, 2)

    print("KERNEL_OK")
</pallas_src>

<mosaic_0001>
module attributes {stable_mosaic.version = 11 : i64} {
  func.func @_conv1_kernel(%arg0: i32, %arg1: i32, %arg2: memref<1x4x8x9x128xbf16, #tpu.memory_space<vmem>>, %arg3: memref<1x4x1x9x128xbf16, #tpu.memory_space<vmem>>, %arg4: memref<1x4x1x9x128xbf16, #tpu.memory_space<vmem>>, %arg5: memref<1152x128xbf16, #tpu.memory_space<vmem>>, %arg6: memref<1x8x8x128xbf16, #tpu.memory_space<vmem>>, %arg7: memref<1x1x128xf32, #tpu.memory_space<vmem>>, %arg8: memref<1x1x128xf32, #tpu.memory_space<vmem>>, %arg9: memref<4x10x9x128xbf16, #tpu.memory_space<vmem>>, %arg10: memref<64x1152xbf16, #tpu.memory_space<vmem>>) attributes {dimension_semantics = [#tpu.dimension_semantics<parallel>, #tpu.dimension_semantics<parallel>], iteration_bounds = array<i64: 2, 1>, scalar_prefetch = 0 : i64, scratch_operands = 2 : i64, tpu.core_type = #tpu.core_type<tc>, window_params = [{transform_indices = @transform_0, window_bounds = array<i64: 1, 4, 8, 9, 128>}, {transform_indices = @transform_1, window_bounds = array<i64: 1, 4, 1, 9, 128>}, {transform_indices = @transform_2, window_bounds = array<i64: 1, 4, 1, 9, 128>}, {pipeline_mode = #tpu.pipeline_mode<synchronous>, transform_indices = @transform_3, window_bounds = array<i64: 1152, 128>}, {transform_indices = @transform_4, window_bounds = array<i64: 1, 8, 8, 128>}, {transform_indices = @transform_5, window_bounds = array<i64: 1, 1, 128>}, {transform_indices = @transform_6, window_bounds = array<i64: 1, 1, 128>}]} {
    %c0 = arith.constant 0 : index
    %c0_0 = arith.constant 0 : index
    %c0_1 = arith.constant 0 : index
    %c0_2 = arith.constant 0 : index
    %c0_3 = arith.constant 0 : index
    %0 = vector.load %arg2[%c0, %c0_0, %c0_1, %c0_2, %c0_3] : memref<1x4x8x9x128xbf16, #tpu.memory_space<vmem>>, vector<1x4x8x9x128xbf16>
    %1 = vector.shape_cast %0 : vector<1x4x8x9x128xbf16> to vector<4x8x9x128xbf16>
    %c0_4 = arith.constant 0 : index
    %c0_5 = arith.constant 0 : index
    %c0_6 = arith.constant 0 : index
    %c0_7 = arith.constant 0 : index
    %2 = vector.load %arg9[%c0_4, %c0_5, %c0_6, %c0_7] : memref<4x10x9x128xbf16, #tpu.memory_space<vmem>>, vector<4x8x9x128xbf16>
    tpu.vector_store %arg9[%c0_4, %c0_5, %c0_6, %c0_7], %1 {strides = array<i32>} : memref<4x10x9x128xbf16, #tpu.memory_space<vmem>>, vector<4x8x9x128xbf16>,
    %c0_8 = arith.constant 0 : index
    %c0_9 = arith.constant 0 : index
    %c0_10 = arith.constant 0 : index
    %c0_11 = arith.constant 0 : index
    %c0_12 = arith.constant 0 : index
    %3 = vector.load %arg3[%c0_8, %c0_9, %c0_10, %c0_11, %c0_12] : memref<1x4x1x9x128xbf16, #tpu.memory_space<vmem>>, vector<1x4x1x9x128xbf16>
    %4 = vector.shape_cast %3 : vector<1x4x1x9x128xbf16> to vector<4x1x9x128xbf16>
    %c0_13 = arith.constant 0 : index
    %c8 = arith.constant 8 : index
    %c0_14 = arith.constant 0 : index
    %c0_15 = arith.constant 0 : index
    %5 = vector.load %arg9[%c0_13, %c8, %c0_14, %c0_15] : memref<4x10x9x128xbf16, #tpu.memory_space<vmem>>, vector<4x1x9x128xbf16>
    tpu.vector_store %arg9[%c0_13, %c8, %c0_14, %c0_15], %4 {strides = array<i32>} : memref<4x10x9x128xbf16, #tpu.memory_space<vmem>>, vector<4x1x9x128xbf16>,
    %c0_16 = arith.constant 0 : index
    %c0_17 = arith.constant 0 : index
    %c0_18 = arith.constant 0 : index
    %c0_19 = arith.constant 0 : index
    %c0_20 = arith.constant 0 : index
    %6 = vector.load %arg4[%c0_16, %c0_17, %c0_18, %c0_19, %c0_20] : memref<1x4x1x9x128xbf16, #tpu.memory_space<vmem>>, vector<1x4x1x9x128xbf16>
    %7 = vector.shape_cast %6 : vector<1x4x1x9x128xbf16> to vector<4x1x9x128xbf16>
    %c0_21 = arith.constant 0 : index
    %c9 = arith.constant 9 : index
    %c0_22 = arith.constant 0 : index
    %c0_23 = arith.constant 0 : index
    %8 = vector.load %arg9[%c0_21, %c9, %c0_22, %c0_23] : memref<4x10x9x128xbf16, #tpu.memory_space<vmem>>, vector<4x1x9x128xbf16>
    tpu.vector_store %arg9[%c0_21, %c9, %c0_22, %c0_23], %7 {strides = array<i32>} : memref<4x10x9x128xbf16, #tpu.memory_space<vmem>>, vector<4x1x9x128xbf16>,
    %c0_24 = arith.constant 0 : index
    %c0_25 = arith.constant 0 : index
    %c0_26 = arith.constant 0 : index
    %c0_27 = arith.constant 0 : index
    %9 = vector.load %arg9[%c0_24, %c0_25, %c0_26, %c0_27] : memref<4x10x9x128xbf16, #tpu.memory_space<vmem>>, vector<1x8x8x128xbf16>
    %10 = vector.shape_cast %9 : vector<1x8x8x128xbf16> to vector<8x8x128xbf16>
    %11 = vector.shape_cast %10 : vector<8x8x128xbf16> to vector<64x128xbf16>
    %c0_28 = arith.constant 0 : index
    %c0_29 = arith.constant 0 : index
    %12 = vector.load %arg10[%c0_28, %c0_29] : memref<64x1152xbf16, #tpu.memory_space<vmem>>, vector<64x128xbf16>
    tpu.vector_store %arg10[%c0_28, %c0_29], %11 {strides = array<i32>} : memref<64x1152xbf16, #tpu.memory_space<vmem>>, vector<64x128xbf16>,
    %c1 = arith.constant 1 : index
    %c0_30 = arith.constant 0 : index
    %c0_31 = arith.constant 0 : index
    %c0_32 = arith.constant 0 : index
    %13 = vector.load %arg9[%c1, %c0_30, %c0_31, %c0_32] : memref<4x10x9x128xbf16, #tpu.memory_space<vmem>>, vector<1x8x8x128xbf16>
    %14 = vector.shape_cast %13 : vector<1x8x8x128xbf16> to vector<8x8x128xbf16>
    %15 = vector.shape_cast %14 : vector<8x8x128xbf16> to vector<64x128xbf16>
    %c0_33 = arith.constant 0 : index
    %c128 = arith.constant 128 : index
    %16 = vector.load %arg10[%c0_33, %c128] : memref<64x1152xbf16, #tpu.memory_space<vmem>>, vector<64x128xbf16>
    tpu.vector_store %arg10[%c0_33, %c128], %15 {strides = array<i32>} : memref<64x1152xbf16, #tpu.memory_space<vmem>>, vector<64x128xbf16>,
    %c0_34 = arith.constant 0 : index
    %c0_35 = arith.constant 0 : index
    %c1_36 = arith.constant 1 : index
    %c0_37 = arith.constant 0 : index
    %17 = vector.load %arg9[%c0_34, %c0_35, %c1_36, %c0_37] : memref<4x10x9x128xbf16, #tpu.memory_space<vmem>>, vector<1x8x8x128xbf16>
    %18 = vector.shape_cast %17 : vector<1x8x8x128xbf16> to vector<8x8x128xbf16>
    %19 = vector.shape_cast %18 : vector<8x8x128xbf16> to vector<64x128xbf16>
    %c0_38 = arith.constant 0 : index
    %c256 = arith.constant 256 : index
    %20 = vector.load %arg10[%c0_38, %c256] : memref<64x1152xbf16, #tpu.memory_space<vmem>>, vector<64x128xbf16>
    tpu.vector_store %arg10[%c0_38, %c256], %19 {strides = array<i32>} : memref<64x1152xbf16, #tpu.memory_space<vmem>>, vector<64x128xbf16>,
    %c2 = arith.constant 2 : index
    %c0_39 = arith.constant 0 : index
    %c0_40 = arith.constant 0 : index
    %c0_41 = arith.constant 0 : index
    %21 = vector.load %arg9[%c2, %c0_39, %c0_40, %c0_41] : memref<4x10x9x128xbf16, #tpu.memory_space<vmem>>, vector<1x8x8x128xbf16>
    %22 = vector.shape_cast %21 : vector<1x8x8x128xbf16> to vector<8x8x128xbf16>
    %23 = vector.shape_cast %22 : vector<8x8x128xbf16> to vector<64x128xbf16>
    %c0_42 = arith.constant 0 : index
    %c384 = arith.constant 384 : index
    %24 = vector.load %arg10[%c0_42, %c384] : memref<64x1152xbf16, #tpu.memory_space<vmem>>, vector<64x128xbf16>
    tpu.vector_store %arg10[%c0_42, %c384], %23 {strides = array<i32>} : memref<64x1152xbf16, #tpu.memory_space<vmem>>, vector<64x128xbf16>,
    %c3 = arith.constant 3 : index
    %c0_43 = arith.constant 0 : index
    %c0_44 = arith.constant 0 : index
    %c0_45 = arith.constant 0 : index
    %25 = vector.load %arg9[%c3, %c0_43, %c0_44, %c0_45] : memref<4x10x9x128xbf16, #tpu.memory_space<vmem>>, vector<1x8x8x128xbf16>
    %26 = vector.shape_cast %25 : vector<1x8x8x128xbf16> to vector<8x8x128xbf16>
    %27 = vector.shape_cast %26 : vector<8x8x128xbf16> to vector<64x128xbf16>
    %c0_46 = arith.constant 0 : index
    %c512 = arith.constant 512 : index
    %28 = vector.load %arg10[%c0_46, %c512] : memref<64x1152xbf16, #tpu.memory_space<vmem>>, vector<64x128xbf16>
    tpu.vector_store %arg10[%c0_46, %c512], %27 {strides = array<i32>} : memref<64x1152xbf16, #tpu.memory_space<vmem>>, vector<64x128xbf16>,
    %c2_47 = arith.constant 2 : index
    %c0_48 = arith.constant 0 : index
    %c1_49 = arith.constant 1 : index
    %c0_50 = arith.constant 0 : index
    %29 = vector.load %arg9[%c2_47, %c0_48, %c1_49, %c0_50] : memref<4x10x9x128xbf16, #tpu.memory_space<vmem>>, vector<1x8x8x128xbf16>
    %30 = vector.shape_cast %29 : vector<1x8x8x128xbf16> to vector<8x8x128xbf16>
    %31 = vector.shape_cast %30 : vector<8x8x128xbf16> to vector<64x128xbf16>
    %c0_51 = arith.constant 0 : index
    %c640 = arith.constant 640 : index
    %32 = vector.load %arg10[%c0_51, %c640] : memref<64x1152xbf16, #tpu.memory_space<vmem>>, vector<64x128xbf16>
    tpu.vector_store %arg10[%c0_51, %c640], %31 {strides = array<i32>} : memref<64x1152xbf16, #tpu.memory_space<vmem>>, vector<64x128xbf16>,
    %c0_52 = arith.constant 0 : index
    %c1_53 = arith.constant 1 : index
    %c0_54 = arith.constant 0 : index
    %c0_55 = arith.constant 0 : index
    %33 = vector.load %arg9[%c0_52, %c1_53, %c0_54, %c0_55] : memref<4x10x9x128xbf16, #tpu.memory_space<vmem>>, vector<1x8x8x128xbf16>
    %34 = vector.shape_cast %33 : vector<1x8x8x128xbf16> to vector<8x8x128xbf16>
    %35 = vector.shape_cast %34 : vector<8x8x128xbf16> to vector<64x128xbf16>
    %c0_56 = arith.constant 0 : index
    %c768 = arith.constant 768 : index
    %36 = vector.load %arg10[%c0_56, %c768] : memref<64x1152xbf16, #tpu.memory_space<vmem>>, vector<64x128xbf16>
    tpu.vector_store %arg10[%c0_56, %c768], %35 {strides = array<i32>} : memref<64x1152xbf16, #tpu.memory_space<vmem>>, vector<64x128xbf16>,
    %c1_57 = arith.constant 1 : index
    %c1_58 = arith.constant 1 : index
    %c0_59 = arith.constant 0 : index
    %c0_60 = arith.constant 0 : index
    %37 = vector.load %arg9[%c1_57, %c1_58, %c0_59, %c0_60] : memref<4x10x9x128xbf16, #tpu.memory_space<vmem>>, vector<1x8x8x128xbf16>
    %38 = vector.shape_cast %37 : vector<1x8x8x128xbf16> to vector<8x8x128xbf16>
    %39 = vector.shape_cast %38 : vector<8x8x128xbf16> to vector<64x128xbf16>
    %c0_61 = arith.constant 0 : index
    %c896 = arith.constant 896 : index
    %40 = vector.load %arg10[%c0_61, %c896] : memref<64x1152xbf16, #tpu.memory_space<vmem>>, vector<64x128xbf16>
    tpu.vector_store %arg10[%c0_61, %c896], %39 {strides = array<i32>} : memref<64x1152xbf16, #tpu.memory_space<vmem>>, vector<64x128xbf16>,
    %c0_62 = arith.constant 0 : index
    %c1_63 = arith.constant 1 : index
    %c1_64 = arith.constant 1 : index
    %c0_65 = arith.constant 0 : index
    %41 = vector.load %arg9[%c0_62, %c1_63, %c1_64, %c0_65] : memref<4x10x9x128xbf16, #tpu.memory_space<vmem>>, vector<1x8x8x128xbf16>
    %42 = vector.shape_cast %41 : vector<1x8x8x128xbf16> to vector<8x8x128xbf16>
    %43 = vector.shape_cast %42 : vector<8x8x128xbf16> to vector<64x128xbf16>
    %c0_66 = arith.constant 0 : index
    %c1024 = arith.constant 1024 : index
    %44 = vector.load %arg10[%c0_66, %c1024] : memref<64x1152xbf16, #tpu.memory_space<vmem>>, vector<64x128xbf16>
    tpu.vector_store %arg10[%c0_66, %c1024], %43 {strides = array<i32>} : memref<64x1152xbf16, #tpu.memory_space<vmem>>, vector<64x128xbf16>,
    %c0_67 = arith.constant 0 : index
    %c0_68 = arith.constant 0 : index
    %45 = vector.load %arg10[%c0_67, %c0_68] : memref<64x1152xbf16, #tpu.memory_space<vmem>>, vector<64x1152xbf16>
    %c0_69 = arith.constant 0 : index
    %c0_70 = arith.constant 0 : index
    %46 = vector.load %arg5[%c0_69, %c0_70] : memref<1152x128xbf16, #tpu.memory_space<vmem>>, vector<1152x128xbf16>
    %cst = arith.constant dense<0.000000e+00> : vector<64x128xf32>
    %47 = tpu.matmul %45, %46, %cst {dimension_numbers = #tpu.dot_dimension_numbers<[1], [0], [0], [1], [0, 0, 1, 1], [], []>} : vector<64x1152xbf16>, vector<1152x128xbf16>, vector<64x128xf32> -> vector<64x128xf32>
    %48 = vector.shape_cast %47 : vector<64x128xf32> to vector<1x8x8x128xf32>
    %49 = arith.truncf %48 : vector<1x8x8x128xf32> to vector<1x8x8x128xbf16>
    %c0_71 = arith.constant 0 : index
    %c0_72 = arith.constant 0 : index
    %c0_73 = arith.constant 0 : index
    %c0_74 = arith.constant 0 : index
    %50 = vector.load %arg6[%c0_71, %c0_72, %c0_73, %c0_74] : memref<1x8x8x128xbf16, #tpu.memory_space<vmem>>, vector<1x8x8x128xbf16>
    tpu.vector_store %arg6[%c0_71, %c0_72, %c0_73, %c0_74], %49 {strides = array<i32>} : memref<1x8x8x128xbf16, #tpu.memory_space<vmem>>, vector<1x8x8x128xbf16>,
    %cst_75 = arith.constant dense<0.000000e+00> : vector<128xf32>
    %51 = vector.multi_reduction <add>, %47, %cst_75 [0] : vector<64x128xf32> to vector<128xf32>
    %52 = vector.shape_cast %51 : vector<128xf32> to vector<1x1x128xf32>
    %c0_76 = arith.constant 0 : index
    %c0_77 = arith.constant 0 : index
    %c0_78 = arith.constant 0 : index
    %53 = vector.load %arg7[%c0_76, %c0_77, %c0_78] : memref<1x1x128xf32, #tpu.memory_space<vmem>>, vector<1x1x128xf32>
    tpu.vector_store %arg7[%c0_76, %c0_77, %c0_78], %52 {strides = array<i32>} : memref<1x1x128xf32, #tpu.memory_space<vmem>>, vector<1x1x128xf32>,
    %54 = arith.mulf %47, %47 : vector<64x128xf32>
    %cst_79 = arith.constant dense<0.000000e+00> : vector<128xf32>
    %55 = vector.multi_reduction <add>, %54, %cst_79 [0] : vector<64x128xf32> to vector<128xf32>
    %56 = vector.shape_cast %55 : vector<128xf32> to vector<1x1x128xf32>
    %c0_80 = arith.constant 0 : index
    %c0_81 = arith.constant 0 : index
    %c0_82 = arith.constant 0 : index
    %57 = vector.load %arg8[%c0_80, %c0_81, %c0_82] : memref<1x1x128xf32, #tpu.memory_space<vmem>>, vector<1x1x128xf32>
    tpu.vector_store %arg8[%c0_80, %c0_81, %c0_82], %56 {strides = array<i32>} : memref<1x1x128xf32, #tpu.memory_space<vmem>>, vector<1x1x128xf32>,
    return
  }
  func.func @transform_0(%arg0: i32, %arg1: i32) -> (i32, i32, i32, i32, i32) {
    %c0_i32 = arith.constant 0 : i32
    %c0_i32_0 = arith.constant 0 : i32
    %c0_i32_1 = arith.constant 0 : i32
    %c0_i32_2 = arith.constant 0 : i32
    return %arg0, %c0_i32, %arg1, %c0_i32_0, %c0_i32_1 : i32, i32, i32, i32, i32
  }
  func.func @transform_1(%arg0: i32, %arg1: i32) -> (i32, i32, i32, i32, i32) {
    %c8_i32 = arith.constant 8 : i32
    %0 = arith.muli %arg1, %c8_i32 : i32
    %c8_i32_0 = arith.constant 8 : i32
    %1 = arith.addi %0, %c8_i32_0 : i32
    %c8_i32_1 = arith.constant 8 : i32
    %2 = arith.minsi %1, %c8_i32_1 : i32
    %c0_i32 = arith.constant 0 : i32
    %c0_i32_2 = arith.constant 0 : i32
    %c0_i32_3 = arith.constant 0 : i32
    %c0_i32_4 = arith.constant 0 : i32
    return %arg0, %c0_i32, %2, %c0_i32_2, %c0_i32_3 : i32, i32, i32, i32, i32
  }
  func.func @transform_2(%arg0: i32, %arg1: i32) -> (i32, i32, i32, i32, i32) {
    %c8_i32 = arith.constant 8 : i32
    %0 = arith.muli %arg1, %c8_i32 : i32
    %c8_i32_0 = arith.constant 8 : i32
    %1 = arith.addi %0, %c8_i32_0 : i32
    %c1_i32 = arith.constant 1 : i32
    %2 = arith.addi %1, %c1_i32 : i32
    %c8_i32_1 = arith.constant 8 : i32
    %3 = arith.minsi %2, %c8_i32_1 : i32
    %c0_i32 = arith.constant 0 : i32
    %c0_i32_2 = arith.constant 0 : i32
    %c0_i32_3 = arith.constant 0 : i32
    %c0_i32_4 = arith.constant 0 : i32
    return %arg0, %c0_i32, %3, %c0_i32_2, %c0_i32_3 : i32, i32, i32, i32, i32
  }
  func.func @transform_3(%arg0: i32, %arg1: i32) -> (i32, i32) {
    %c0_i32 = arith.constant 0 : i32
    %c0_i32_0 = arith.constant 0 : i32
    %c0_i32_1 = arith.constant 0 : i32
    return %c0_i32, %c0_i32_0 : i32, i32
  }
  func.func @transform_4(%arg0: i32, %arg1: i32) -> (i32, i32, i32, i32) {
    %c0_i32 = arith.constant 0 : i32
    %c0_i32_0 = arith.constant 0 : i32
    %c0_i32_1 = arith.constant 0 : i32
    return %arg0, %arg1, %c0_i32, %c0_i32_0 : i32, i32, i32, i32
  }
  func.func @transform_5(%arg0: i32, %arg1: i32) -> (i32, i32, i32) {
    %c1_i32 = arith.constant 1 : i32
    %0 = arith.muli %arg0, %c1_i32 : i32
    %1 = arith.addi %0, %arg1 : i32
    %c0_i32 = arith.constant 0 : i32
    %c0_i32_0 = arith.constant 0 : i32
    %c0_i32_1 = arith.constant 0 : i32
    return %1, %c0_i32, %c0_i32_0 : i32, i32, i32
  }
  func.func @transform_6(%arg0: i32, %arg1: i32) -> (i32, i32, i32) {
    %c1_i32 = arith.constant 1 : i32
    %0 = arith.muli %arg0, %c1_i32 : i32
    %1 = arith.addi %0, %arg1 : i32
    %c0_i32 = arith.constant 0 : i32
    %c0_i32_0 = arith.constant 0 : i32
    %c0_i32_1 = arith.constant 0 : i32
    return %1, %c0_i32, %c0_i32_0 : i32, i32, i32
  }
}

module attributes {stable_mosaic.version = 11 : i64} {
  func.func @_bnrelu_conv2_kernel(%arg0: i32, %arg1: i32, %arg2: memref<1x8x8x128xbf16, #tpu.memory_space<vmem>>, %arg3: memref<1x1x8x128xbf16, #tpu.memory_space<vmem>>, %arg4: memref<1x1x8x128xbf16, #tpu.memory_space<vmem>>, %arg5: memref<1x128xf32, #tpu.memory_space<vmem>>, %arg6: memref<1x128xf32, #tpu.memory_space<vmem>>, %arg7: memref<1152x128xbf16, #tpu.memory_space<vmem>>, %arg8: memref<1x8x8x128xbf16, #tpu.memory_space<vmem>>, %arg9: memref<1x1x128xf32, #tpu.memory_space<vmem>>, %arg10: memref<1x1x128xf32, #tpu.memory_space<vmem>>, %arg11: memref<10x32x128xbf16, #tpu.memory_space<vmem>>, %arg12: memref<64x1152xbf16, #tpu.memory_space<vmem>>) attributes {dimension_semantics = [#tpu.dimension_semantics<parallel>, #tpu.dimension_semantics<parallel>], iteration_bounds = array<i64: 2, 1>, scalar_prefetch = 0 : i64, scratch_operands = 2 : i64, tpu.core_type = #tpu.core_type<tc>, window_params = [{transform_indices = @transform_0, window_bounds = array<i64: 1, 8, 8, 128>}, {transform_indices = @transform_1, window_bounds = array<i64: 1, 1, 8, 128>}, {transform_indices = @transform_2, window_bounds = array<i64: 1, 1, 8, 128>}, {pipeline_mode = #tpu.pipeline_mode<synchronous>, transform_indices = @transform_3, window_bounds = array<i64: 1, 128>}, {pipeline_mode = #tpu.pipeline_mode<synchronous>, transform_indices = @transform_4, window_bounds = array<i64: 1, 128>}, {pipeline_mode = #tpu.pipeline_mode<synchronous>, transform_indices = @transform_5, window_bounds = array<i64: 1152, 128>}, {transform_indices = @transform_6, window_bounds = array<i64: 1, 8, 8, 128>}, {transform_indices = @transform_7, window_bounds = array<i64: 1, 1, 128>}, {transform_indices = @transform_8, window_bounds = array<i64: 1, 1, 128>}]} {
    %c0 = arith.constant 0 : index
    %c0_0 = arith.constant 0 : index
    %0 = vector.load %arg5[%c0, %c0_0] : memref<1x128xf32, #tpu.memory_space<vmem>>, vector<1x128xf32>
    %1 = vector.shape_cast %0 : vector<1x128xf32> to vector<1x1x128xf32>
    %c0_1 = arith.constant 0 : index
    %c0_2 = arith.constant 0 : index
    %2 = vector.load %arg6[%c0_1, %c0_2] : memref<1x128xf32, #tpu.memory_space<vmem>>, vector<1x128xf32>
    %3 = vector.shape_cast %2 : vector<1x128xf32> to vector<1x1x128xf32>
    %c0_3 = arith.constant 0 : index
    %c0_4 = arith.constant 0 : index
    %c0_5 = arith.constant 0 : index
    %c0_6 = arith.constant 0 : index
    %4 = vector.load %arg2[%c0_3, %c0_4, %c0_5, %c0_6] : memref<1x8x8x128xbf16, #tpu.memory_space<vmem>>, vector<1x8x8x128xbf16>
    %5 = vector.shape_cast %4 : vector<1x8x8x128xbf16> to vector<8x8x128xbf16>
    %6 = arith.extf %5 : vector<8x8x128xbf16> to vector<8x8x128xf32>
    %7 = vector.broadcast %1 : vector<1x1x128xf32> to vector<8x8x128xf32>
    %8 = arith.mulf %6, %7 : vector<8x8x128xf32>
    %9 = vector.broadcast %3 : vector<1x1x128xf32> to vector<8x8x128xf32>
    %10 = arith.addf %8, %9 : vector<8x8x128xf32>
    %cst = arith.constant 0.000000e+00 : f32
    %11 = vector.broadcast %cst : f32 to vector<8x8x128xf32>
    %12 = arith.maximumf %10, %11 : vector<8x8x128xf32>
    %c0_i32 = arith.constant 0 : i32
    %13 = arith.cmpi eq, %arg1, %c0_i32 : i32
    %c0_7 = arith.constant 0 : index
    %c0_8 = arith.constant 0 : index
    %c0_9 = arith.constant 0 : index
    %c0_10 = arith.constant 0 : index
    %14 = vector.load %arg3[%c0_7, %c0_8, %c0_9, %c0_10] : memref<1x1x8x128xbf16, #tpu.memory_space<vmem>>, vector<1x1x8x128xbf16>
    %15 = vector.shape_cast %14 : vector<1x1x8x128xbf16> to vector<1x8x128xbf16>
    %16 = arith.extf %15 : vector<1x8x128xbf16> to vector<1x8x128xf32>
    %17 = vector.broadcast %1 : vector<1x1x128xf32> to vector<1x8x128xf32>
    %18 = arith.mulf %16, %17 : vector<1x8x128xf32>
    %19 = vector.broadcast %3 : vector<1x1x128xf32> to vector<1x8x128xf32>
    %20 = arith.addf %18, %19 : vector<1x8x128xf32>
    %cst_11 = arith.constant 0.000000e+00 : f32
    %21 = vector.broadcast %cst_11 : f32 to vector<1x8x128xf32>
    %22 = arith.maximumf %20, %21 : vector<1x8x128xf32>
    %cst_12 = arith.constant 0.000000e+00 : f32
    %23 = vector.broadcast %cst_12 : f32 to vector<1x8x128xf32>
    %24 = arith.select %13, %23, %22 : vector<1x8x128xf32>
    %c0_i32_13 = arith.constant 0 : i32
    %25 = arith.cmpi eq, %arg1, %c0_i32_13 : i32
    %c0_14 = arith.constant 0 : index
    %c0_15 = arith.constant 0 : index
    %c0_16 = arith.constant 0 : index
    %c0_17 = arith.constant 0 : index
    %26 = vector.load %arg4[%c0_14, %c0_15, %c0_16, %c0_17] : memref<1x1x8x128xbf16, #tpu.memory_space<vmem>>, vector<1x1x8x128xbf16>
    %27 = vector.shape_cast %26 : vector<1x1x8x128xbf16> to vector<1x8x128xbf16>
    %28 = arith.extf %27 : vector<1x8x128xbf16> to vector<1x8x128xf32>
    %29 = vector.broadcast %1 : vector<1x1x128xf32> to vector<1x8x128xf32>
    %30 = arith.mulf %28, %29 : vector<1x8x128xf32>
    %31 = vector.broadcast %3 : vector<1x1x128xf32> to vector<1x8x128xf32>
    %32 = arith.addf %30, %31 : vector<1x8x128xf32>
    %cst_18 = arith.constant 0.000000e+00 : f32
    %33 = vector.broadcast %cst_18 : f32 to vector<1x8x128xf32>
    %34 = arith.maximumf %32, %33 : vector<1x8x128xf32>
    %cst_19 = arith.constant 0.000000e+00 : f32
    %35 = vector.broadcast %cst_19 : f32 to vector<1x8x128xf32>
    %36 = arith.select %25, %35, %34 : vector<1x8x128xf32>
    %cst_20 = arith.constant 0.000000e+00 : bf16
    %37 = vector.broadcast %cst_20 : bf16 to vector<10x1x128xbf16>
    %c0_21 = arith.constant 0 : index
    %c15 = arith.constant 15 : index
    %c0_22 = arith.constant 0 : index
    %38 = vector.load %arg11[%c0_21, %c15, %c0_22] : memref<10x32x128xbf16, #tpu.memory_space<vmem>>, vector<10x1x128xbf16>
    tpu.vector_store %arg11[%c0_21, %c15, %c0_22], %37 {strides = array<i32>} : memref<10x32x128xbf16, #tpu.memory_space<vmem>>, vector<10x1x128xbf16>,
    %c0_23 = arith.constant 0 : index
    %c24 = arith.constant 24 : index
    %c0_24 = arith.constant 0 : index
    %39 = vector.load %arg11[%c0_23, %c24, %c0_24] : memref<10x32x128xbf16, #tpu.memory_space<vmem>>, vector<10x1x128xbf16>
    tpu.vector_store %arg11[%c0_23, %c24, %c0_24], %37 {strides = array<i32>} : memref<10x32x128xbf16, #tpu.memory_space<vmem>>, vector<10x1x128xbf16>,
    %40 = arith.truncf %24 : vector<1x8x128xf32> to vector<1x8x128xbf16>
    %c0_25 = arith.constant 0 : index
    %c16 = arith.constant 16 : index
    %c0_26 = arith.constant 0 : index
    %41 = vector.load %arg11[%c0_25, %c16, %c0_26] : memref<10x32x128xbf16, #tpu.memory_space<vmem>>, vector<1x8x128xbf16>
    tpu.vector_store %arg11[%c0_25, %c16, %c0_26], %40 {strides = array<i32>} : memref<10x32x128xbf16, #tpu.memory_space<vmem>>, vector<1x8x128xbf16>,
    %42 = arith.truncf %12 : vector<8x8x128xf32> to vector<8x8x128xbf16>
    %c1 = arith.constant 1 : index
    %c16_27 = arith.constant 16 : index
    %c0_28 = arith.constant 0 : index
    %43 = vector.load %arg11[%c1, %c16_27, %c0_28] : memref<10x32x128xbf16, #tpu.memory_space<vmem>>, vector<8x8x128xbf16>
    tpu.vector_store %arg11[%c1, %c16_27, %c0_28], %42 {strides = array<i32>} : memref<10x32x128xbf16, #tpu.memory_space<vmem>>, vector<8x8x128xbf16>,
    %44 = arith.truncf %36 : vector<1x8x128xf32> to vector<1x8x128xbf16>
    %c9 = arith.constant 9 : index
    %c16_29 = arith.constant 16 : index
    %c0_30 = arith.constant 0 : index
    %45 = vector.load %arg11[%c9, %c16_29, %c0_30] : memref<10x32x128xbf16, #tpu.memory_space<vmem>>, vector<1x8x128xbf16>
    tpu.vector_store %arg11[%c9, %c16_29, %c0_30], %44 {strides = array<i32>} : memref<10x32x128xbf16, #tpu.memory_space<vmem>>, vector<1x8x128xbf16>,
    %c0_31 = arith.constant 0 : index
    %c15_32 = arith.constant 15 : index
    %c0_33 = arith.constant 0 : index
    %46 = vector.load %arg11[%c0_31, %c15_32, %c0_33] : memref<10x32x128xbf16, #tpu.memory_space<vmem>>, vector<8x8x128xbf16>
    %47 = vector.shape_cast %46 : vector<8x8x128xbf16> to vector<64x128xbf16>
    %c0_34 = arith.constant 0 : index
    %c0_35 = arith.constant 0 : index
    %48 = vector.load %arg12[%c0_34, %c0_35] : memref<64x1152xbf16, #tpu.memory_space<vmem>>, vector<64x128xbf16>
    tpu.vector_store %arg12[%c0_34, %c0_35], %47 {strides = array<i32>} : memref<64x1152xbf16, #tpu.memory_space<vmem>>, vector<64x128xbf16>,
    %c0_36 = arith.constant 0 : index
    %c16_37 = arith.constant 16 : index
    %c0_38 = arith.constant 0 : index
    %49 = vector.load %arg11[%c0_36, %c16_37, %c0_38] : memref<10x32x128xbf16, #tpu.memory_space<vmem>>, vector<8x8x128xbf16>
    %50 = vector.shape_cast %49 : vector<8x8x128xbf16> to vector<64x128xbf16>
    %c0_39 = arith.constant 0 : index
    %c128 = arith.constant 128 : index
    %51 = vector.load %arg12[%c0_39, %c128] : memref<64x1152xbf16, #tpu.memory_space<vmem>>, vector<64x128xbf16>
    tpu.vector_store %arg12[%c0_39, %c128], %50 {strides = array<i32>} : memref<64x1152xbf16, #tpu.memory_space<vmem>>, vector<64x128xbf16>,
    %c0_40 = arith.constant 0 : index
    %c17 = arith.constant 17 : index
    %c0_41 = arith.constant 0 : index
    %52 = vector.load %arg11[%c0_40, %c17, %c0_41] : memref<10x32x128xbf16, #tpu.memory_space<vmem>>, vector<8x8x128xbf16>
    %53 = vector.shape_cast %52 : vector<8x8x128xbf16> to vector<64x128xbf16>
    %c0_42 = arith.constant 0 : index
    %c256 = arith.constant 256 : index
    %54 = vector.load %arg12[%c0_42, %c256] : memref<64x1152xbf16, #tpu.memory_space<vmem>>, vector<64x128xbf16>
    tpu.vector_store %arg12[%c0_42, %c256], %53 {strides = array<i32>} : memref<64x1152xbf16, #tpu.memory_space<vmem>>, vector<64x128xbf16>,
    %c1_43 = arith.constant 1 : index
    %c15_44 = arith.constant 15 : index
    %c0_45 = arith.constant 0 : index
    %55 = vector.load %arg11[%c1_43, %c15_44, %c0_45] : memref<10x32x128xbf16, #tpu.memory_space<vmem>>, vector<8x8x128xbf16>
    %56 = vector.shape_cast %55 : vector<8x8x128xbf16> to vector<64x128xbf16>
    %c0_46 = arith.constant 0 : index
    %c384 = arith.constant 384 : index
    %57 = vector.load %arg12[%c0_46, %c384] : memref<64x1152xbf16, #tpu.memory_space<vmem>>, vector<64x128xbf16>
    tpu.vector_store %arg12[%c0_46, %c384], %56 {strides = array<i32>} : memref<64x1152xbf16, #tpu.memory_space<vmem>>, vector<64x128xbf16>,
    %c1_47 = arith.constant 1 : index
    %c16_48 = arith.constant 16 : index
    %c0_49 = arith.constant 0 : index
    %58 = vector.load %arg11[%c1_47, %c16_48, %c0_49] : memref<10x32x128xbf16, #tpu.memory_space<vmem>>, vector<8x8x128xbf16>
    %59 = vector.shape_cast %58 : vector<8x8x128xbf16> to vector<64x128xbf16>
    %c0_50 = arith.constant 0 : index
    %c512 = arith.constant 512 : index
    %60 = vector.load %arg12[%c0_50, %c512] : memref<64x1152xbf16, #tpu.memory_space<vmem>>, vector<64x128xbf16>
    tpu.vector_store %arg12[%c0_50, %c512], %59 {strides = array<i32>} : memref<64x1152xbf16, #tpu.memory_space<vmem>>, vector<64x128xbf16>,
    %c1_51 = arith.constant 1 : index
    %c17_52 = arith.constant 17 : index
    %c0_53 = arith.constant 0 : index
    %61 = vector.load %arg11[%c1_51, %c17_52, %c0_53] : memref<10x32x128xbf16, #tpu.memory_space<vmem>>, vector<8x8x128xbf16>
    %62 = vector.shape_cast %61 : vector<8x8x128xbf16> to vector<64x128xbf16>
    %c0_54 = arith.constant 0 : index
    %c640 = arith.constant 640 : index
    %63 = vector.load %arg12[%c0_54, %c640] : memref<64x1152xbf16, #tpu.memory_space<vmem>>, vector<64x128xbf16>
    tpu.vector_store %arg12[%c0_54, %c640], %62 {strides = array<i32>} : memref<64x1152xbf16, #tpu.memory_space<vmem>>, vector<64x128xbf16>,
    %c2 = arith.constant 2 : index
    %c15_55 = arith.constant 15 : index
    %c0_56 = arith.constant 0 : index
    %64 = vector.load %arg11[%c2, %c15_55, %c0_56] : memref<10x32x128xbf16, #tpu.memory_space<vmem>>, vector<8x8x128xbf16>
    %65 = vector.shape_cast %64 : vector<8x8x128xbf16> to vector<64x128xbf16>
    %c0_57 = arith.constant 0 : index
    %c768 = arith.constant 768 : index
    %66 = vector.load %arg12[%c0_57, %c768] : memref<64x1152xbf16, #tpu.memory_space<vmem>>, vector<64x128xbf16>
    tpu.vector_store %arg12[%c0_57, %c768], %65 {strides = array<i32>} : memref<64x1152xbf16, #tpu.memory_space<vmem>>, vector<64x128xbf16>,
    %c2_58 = arith.constant 2 : index
    %c16_59 = arith.constant 16 : index
    %c0_60 = arith.constant 0 : index
    %67 = vector.load %arg11[%c2_58, %c16_59, %c0_60] : memref<10x32x128xbf16, #tpu.memory_space<vmem>>, vector<8x8x128xbf16>
    %68 = vector.shape_cast %67 : vector<8x8x128xbf16> to vector<64x128xbf16>
    %c0_61 = arith.constant 0 : index
    %c896 = arith.constant 896 : index
    %69 = vector.load %arg12[%c0_61, %c896] : memref<64x1152xbf16, #tpu.memory_space<vmem>>, vector<64x128xbf16>
    tpu.vector_store %arg12[%c0_61, %c896], %68 {strides = array<i32>} : memref<64x1152xbf16, #tpu.memory_space<vmem>>, vector<64x128xbf16>,
    %c2_62 = arith.constant 2 : index
    %c17_63 = arith.constant 17 : index
    %c0_64 = arith.constant 0 : index
    %70 = vector.load %arg11[%c2_62, %c17_63, %c0_64] : memref<10x32x128xbf16, #tpu.memory_space<vmem>>, vector<8x8x128xbf16>
    %71 = vector.shape_cast %70 : vector<8x8x128xbf16> to vector<64x128xbf16>
    %c0_65 = arith.constant 0 : index
    %c1024 = arith.constant 1024 : index
    %72 = vector.load %arg12[%c0_65, %c1024] : memref<64x1152xbf16, #tpu.memory_space<vmem>>, vector<64x128xbf16>
    tpu.vector_store %arg12[%c0_65, %c1024], %71 {strides = array<i32>} : memref<64x1152xbf16, #tpu.memory_space<vmem>>, vector<64x128xbf16>,
    %c0_66 = arith.constant 0 : index
    %c0_67 = arith.constant 0 : index
    %73 = vector.load %arg12[%c0_66, %c0_67] : memref<64x1152xbf16, #tpu.memory_space<vmem>>, vector<64x1152xbf16>
    %c0_68 = arith.constant 0 : index
    %c0_69 = arith.constant 0 : index
    %74 = vector.load %arg7[%c0_68, %c0_69] : memref<1152x128xbf16, #tpu.memory_space<vmem>>, vector<1152x128xbf16>
    %cst_70 = arith.constant dense<0.000000e+00> : vector<64x128xf32>
    %75 = tpu.matmul %73, %74, %cst_70 {dimension_numbers = #tpu.dot_dimension_numbers<[1], [0], [0], [1], [0, 0, 1, 1], [], []>} : vector<64x1152xbf16>, vector<1152x128xbf16>, vector<64x128xf32> -> vector<64x128xf32>
    %76 = vector.shape_cast %75 : vector<64x128xf32> to vector<1x8x8x128xf32>
    %77 = arith.truncf %76 : vector<1x8x8x128xf32> to vector<1x8x8x128xbf16>
    %c0_71 = arith.constant 0 : index
    %c0_72 = arith.constant 0 : index
    %c0_73 = arith.constant 0 : index
    %c0_74 = arith.constant 0 : index
    %78 = vector.load %arg8[%c0_71, %c0_72, %c0_73, %c0_74] : memref<1x8x8x128xbf16, #tpu.memory_space<vmem>>, vector<1x8x8x128xbf16>
    tpu.vector_store %arg8[%c0_71, %c0_72, %c0_73, %c0_74], %77 {strides = array<i32>} : memref<1x8x8x128xbf16, #tpu.memory_space<vmem>>, vector<1x8x8x128xbf16>,
    %cst_75 = arith.constant dense<0.000000e+00> : vector<128xf32>
    %79 = vector.multi_reduction <add>, %75, %cst_75 [0] : vector<64x128xf32> to vector<128xf32>
    %80 = vector.shape_cast %79 : vector<128xf32> to vector<1x1x128xf32>
    %c0_76 = arith.constant 0 : index
    %c0_77 = arith.constant 0 : index
    %c0_78 = arith.constant 0 : index
    %81 = vector.load %arg9[%c0_76, %c0_77, %c0_78] : memref<1x1x128xf32, #tpu.memory_space<vmem>>, vector<1x1x128xf32>
    tpu.vector_store %arg9[%c0_76, %c0_77, %c0_78], %80 {strides = array<i32>} : memref<1x1x128xf32, #tpu.memory_space<vmem>>, vector<1x1x128xf32>,
    %82 = arith.mulf %75, %75 : vector<64x128xf32>
    %cst_79 = arith.constant dense<0.000000e+00> : vector<128xf32>
    %83 = vector.multi_reduction <add>, %82, %cst_79 [0] : vector<64x128xf32> to vector<128xf32>
    %84 = vector.shape_cast %83 : vector<128xf32> to vector<1x1x128xf32>
    %c0_80 = arith.constant 0 : index
    %c0_81 = arith.constant 0 : index
    %c0_82 = arith.constant 0 : index
    %85 = vector.load %arg10[%c0_80, %c0_81, %c0_82] : memref<1x1x128xf32, #tpu.memory_space<vmem>>, vector<1x1x128xf32>
    tpu.vector_store %arg10[%c0_80, %c0_81, %c0_82], %84 {strides = array<i32>} : memref<1x1x128xf32, #tpu.memory_space<vmem>>, vector<1x1x128xf32>,
    return
  }
  func.func @transform_0(%arg0: i32, %arg1: i32) -> (i32, i32, i32, i32) {
    %c0_i32 = arith.constant 0 : i32
    %c0_i32_0 = arith.constant 0 : i32
    %c0_i32_1 = arith.constant 0 : i32
    return %arg0, %arg1, %c0_i32, %c0_i32_0 : i32, i32, i32, i32
  }
  func.func @transform_1(%arg0: i32, %arg1: i32) -> (i32, i32, i32, i32) {
    %c8_i32 = arith.constant 8 : i32
    %0 = arith.muli %arg1, %c8_i32 : i32
    %c1_i32 = arith.constant 1 : i32
    %1 = arith.subi %0, %c1_i32 : i32
    %c0_i32 = arith.constant 0 : i32
    %2 = arith.maxsi %1, %c0_i32 : i32
    %c0_i32_0 = arith.constant 0 : i32
    %c0_i32_1 = arith.constant 0 : i32
    %c0_i32_2 = arith.constant 0 : i32
    return %arg0, %2, %c0_i32_0, %c0_i32_1 : i32, i32, i32, i32
  }
  func.func @transform_2(%arg0: i32, %arg1: i32) -> (i32, i32, i32, i32) {
    %c8_i32 = arith.constant 8 : i32
    %0 = arith.muli %arg1, %c8_i32 : i32
    %c8_i32_0 = arith.constant 8 : i32
    %1 = arith.addi %0, %c8_i32_0 : i32
    %c7_i32 = arith.constant 7 : i32
    %2 = arith.minsi %1, %c7_i32 : i32
    %c0_i32 = arith.constant 0 : i32
    %c0_i32_1 = arith.constant 0 : i32
    %c0_i32_2 = arith.constant 0 : i32
    return %arg0, %2, %c0_i32, %c0_i32_1 : i32, i32, i32, i32
  }
  func.func @transform_3(%arg0: i32, %arg1: i32) -> (i32, i32) {
    %c0_i32 = arith.constant 0 : i32
    %c0_i32_0 = arith.constant 0 : i32
    %c0_i32_1 = arith.constant 0 : i32
    return %c0_i32, %c0_i32_0 : i32, i32
  }
  func.func @transform_4(%arg0: i32, %arg1: i32) -> (i32, i32) {
    %c0_i32 = arith.constant 0 : i32
    %c0_i32_0 = arith.constant 0 : i32
    %c0_i32_1 = arith.constant 0 : i32
    return %c0_i32, %c0_i32_0 : i32, i32
  }
  func.func @transform_5(%arg0: i32, %arg1: i32) -> (i32, i32) {
    %c0_i32 = arith.constant 0 : i32
    %c0_i32_0 = arith.constant 0 : i32
    %c0_i32_1 = arith.constant 0 : i32
    return %c0_i32, %c0_i32_0 : i32, i32
  }
  func.func @transform_6(%arg0: i32, %arg1: i32) -> (i32, i32, i32, i32) {
    %c0_i32 = arith.constant 0 : i32
    %c0_i32_0 = arith.constant 0 : i32
    %c0_i32_1 = arith.constant 0 : i32
    return %arg0, %arg1, %c0_i32, %c0_i32_0 : i32, i32, i32, i32
  }
  func.func @transform_7(%arg0: i32, %arg1: i32) -> (i32, i32, i32) {
    %c1_i32 = arith.constant 1 : i32
    %0 = arith.muli %arg0, %c1_i32 : i32
    %1 = arith.addi %0, %arg1 : i32
    %c0_i32 = arith.constant 0 : i32
    %c0_i32_0 = arith.constant 0 : i32
    %c0_i32_1 = arith.constant 0 : i32
    return %1, %c0_i32, %c0_i32_0 : i32, i32, i32
  }
  func.func @transform_8(%arg0: i32, %arg1: i32) -> (i32, i32, i32) {
    %c1_i32 = arith.constant 1 : i32
    %0 = arith.muli %arg0, %c1_i32 : i32
    %1 = arith.addi %0, %arg1 : i32
    %c0_i32 = arith.constant 0 : i32
    %c0_i32_0 = arith.constant 0 : i32
    %c0_i32_1 = arith.constant 0 : i32
    return %1, %c0_i32, %c0_i32_0 : i32, i32, i32
  }
}

module attributes {stable_mosaic.version = 11 : i64} {
  func.func @_bn_residual_relu_kernel(%arg0: i32, %arg1: i32, %arg2: memref<1x8x8x128xbf16, #tpu.memory_space<vmem>>, %arg3: memref<1x128xf32, #tpu.memory_space<vmem>>, %arg4: memref<1x128xf32, #tpu.memory_space<vmem>>, %arg5: memref<1x1x8x9x128xbf16, #tpu.memory_space<vmem>>, %arg6: memref<128x128xbf16, #tpu.memory_space<vmem>>, %arg7: memref<1x128xf32, #tpu.memory_space<vmem>>, %arg8: memref<1x8x8x128xf32, #tpu.memory_space<vmem>>) attributes {dimension_semantics = [#tpu.dimension_semantics<parallel>, #tpu.dimension_semantics<parallel>], iteration_bounds = array<i64: 2, 1>, scalar_prefetch = 0 : i64, scratch_operands = 0 : i64, tpu.core_type = #tpu.core_type<tc>, window_params = [{transform_indices = @transform_0, window_bounds = array<i64: 1, 8, 8, 128>}, {pipeline_mode = #tpu.pipeline_mode<synchronous>, transform_indices = @transform_1, window_bounds = array<i64: 1, 128>}, {pipeline_mode = #tpu.pipeline_mode<synchronous>, transform_indices = @transform_2, window_bounds = array<i64: 1, 128>}, {transform_indices = @transform_3, window_bounds = array<i64: 1, 1, 8, 9, 128>}, {pipeline_mode = #tpu.pipeline_mode<synchronous>, transform_indices = @transform_4, window_bounds = array<i64: 128, 128>}, {pipeline_mode = #tpu.pipeline_mode<synchronous>, transform_indices = @transform_5, window_bounds = array<i64: 1, 128>}, {transform_indices = @transform_6, window_bounds = array<i64: 1, 8, 8, 128>}]} {
    %c0 = arith.constant 0 : index
    %c0_0 = arith.constant 0 : index
    %c0_1 = arith.constant 0 : index
    %c0_2 = arith.constant 0 : index
    %0 = vector.load %arg2[%c0, %c0_0, %c0_1, %c0_2] : memref<1x8x8x128xbf16, #tpu.memory_space<vmem>>, vector<1x8x8x128xbf16>
    %1 = vector.shape_cast %0 : vector<1x8x8x128xbf16> to vector<8x8x128xbf16>
    %2 = arith.extf %1 : vector<8x8x128xbf16> to vector<8x8x128xf32>
    %3 = vector.shape_cast %2 : vector<8x8x128xf32> to vector<64x128xf32>
    %c0_3 = arith.constant 0 : index
    %c0_4 = arith.constant 0 : index
    %4 = vector.load %arg3[%c0_3, %c0_4] : memref<1x128xf32, #tpu.memory_space<vmem>>, vector<1x128xf32>
    %5 = vector.broadcast %4 : vector<1x128xf32> to vector<64x128xf32>
    %6 = arith.mulf %3, %5 : vector<64x128xf32>
    %c0_5 = arith.constant 0 : index
    %c0_6 = arith.constant 0 : index
    %7 = vector.load %arg4[%c0_5, %c0_6] : memref<1x128xf32, #tpu.memory_space<vmem>>, vector<1x128xf32>
    %8 = vector.broadcast %7 : vector<1x128xf32> to vector<64x128xf32>
    %9 = arith.addf %6, %8 : vector<64x128xf32>
    %c0_7 = arith.constant 0 : index
    %c0_8 = arith.constant 0 : index
    %c0_9 = arith.constant 0 : index
    %c0_10 = arith.constant 0 : index
    %c0_11 = arith.constant 0 : index
    %10 = vector.load %arg5[%c0_7, %c0_8, %c0_9, %c0_10, %c0_11] : memref<1x1x8x9x128xbf16, #tpu.memory_space<vmem>>, vector<1x1x8x8x128xbf16>
    %11 = vector.shape_cast %10 : vector<1x1x8x8x128xbf16> to vector<8x8x128xbf16>
    %12 = vector.shape_cast %11 : vector<8x8x128xbf16> to vector<64x128xbf16>
    %c0_12 = arith.constant 0 : index
    %c0_13 = arith.constant 0 : index
    %13 = vector.load %arg6[%c0_12, %c0_13] : memref<128x128xbf16, #tpu.memory_space<vmem>>, vector<128x128xbf16>
    %cst = arith.constant dense<0.000000e+00> : vector<64x128xf32>
    %14 = tpu.matmul %12, %13, %cst {dimension_numbers = #tpu.dot_dimension_numbers<[1], [0], [0], [1], [0, 0, 1, 1], [], []>} : vector<64x128xbf16>, vector<128x128xbf16>, vector<64x128xf32> -> vector<64x128xf32>
    %c0_14 = arith.constant 0 : index
    %c0_15 = arith.constant 0 : index
    %15 = vector.load %arg7[%c0_14, %c0_15] : memref<1x128xf32, #tpu.memory_space<vmem>>, vector<1x128xf32>
    %16 = vector.broadcast %15 : vector<1x128xf32> to vector<64x128xf32>
    %17 = arith.addf %14, %16 : vector<64x128xf32>
    %18 = arith.addf %9, %17 : vector<64x128xf32>
    %cst_16 = arith.constant 0.000000e+00 : f32
    %19 = vector.broadcast %cst_16 : f32 to vector<64x128xf32>
    %20 = arith.maximumf %18, %19 : vector<64x128xf32>
    %21 = vector.shape_cast %20 : vector<64x128xf32> to vector<1x8x8x128xf32>
    %c0_17 = arith.constant 0 : index
    %c0_18 = arith.constant 0 : index
    %c0_19 = arith.constant 0 : index
    %c0_20 = arith.constant 0 : index
    %22 = vector.load %arg8[%c0_17, %c0_18, %c0_19, %c0_20] : memref<1x8x8x128xf32, #tpu.memory_space<vmem>>, vector<1x8x8x128xf32>
    tpu.vector_store %arg8[%c0_17, %c0_18, %c0_19, %c0_20], %21 {strides = array<i32>} : memref<1x8x8x128xf32, #tpu.memory_space<vmem>>, vector<1x8x8x128xf32>,
    return
  }
  func.func @transform_0(%arg0: i32, %arg1: i32) -> (i32, i32, i32, i32) {
    %c0_i32 = arith.constant 0 : i32
    %c0_i32_0 = arith.constant 0 : i32
    %c0_i32_1 = arith.constant 0 : i32
    return %arg0, %arg1, %c0_i32, %c0_i32_0 : i32, i32, i32, i32
  }
  func.func @transform_1(%arg0: i32, %arg1: i32) -> (i32, i32) {
    %c0_i32 = arith.constant 0 : i32
    %c0_i32_0 = arith.constant 0 : i32
    %c0_i32_1 = arith.constant 0 : i32
    return %c0_i32, %c0_i32_0 : i32, i32
  }
  func.func @transform_2(%arg0: i32, %arg1: i32) -> (i32, i32) {
    %c0_i32 = arith.constant 0 : i32
    %c0_i32_0 = arith.constant 0 : i32
    %c0_i32_1 = arith.constant 0 : i32
    return %c0_i32, %c0_i32_0 : i32, i32
  }
  func.func @transform_3(%arg0: i32, %arg1: i32) -> (i32, i32, i32, i32, i32) {
    %c3_i32 = arith.constant 3 : i32
    %c0_i32 = arith.constant 0 : i32
    %c0_i32_0 = arith.constant 0 : i32
    %c0_i32_1 = arith.constant 0 : i32
    return %arg0, %c3_i32, %arg1, %c0_i32, %c0_i32_0 : i32, i32, i32, i32, i32
  }
  func.func @transform_4(%arg0: i32, %arg1: i32) -> (i32, i32) {
    %c0_i32 = arith.constant 0 : i32
    %c0_i32_0 = arith.constant 0 : i32
    %c0_i32_1 = arith.constant 0 : i32
    return %c0_i32, %c0_i32_0 : i32, i32
  }
  func.func @transform_5(%arg0: i32, %arg1: i32) -> (i32, i32) {
    %c0_i32 = arith.constant 0 : i32
    %c0_i32_0 = arith.constant 0 : i32
    %c0_i32_1 = arith.constant 0 : i32
    return %c0_i32, %c0_i32_0 : i32, i32
  }
  func.func @transform_6(%arg0: i32, %arg1: i32) -> (i32, i32, i32, i32) {
    %c0_i32 = arith.constant 0 : i32
    %c0_i32_0 = arith.constant 0 : i32
    %c0_i32_1 = arith.constant 0 : i32
    return %arg0, %arg1, %c0_i32, %c0_i32_0 : i32, i32, i32, i32
  }
}

</mosaic_0001>

<bundles_post_ra>
// kernel: resnet_block_forward.5
= control target key start
LH: loop header
LB: loop body
LE: loop exit
PB: predicated region body
PF: predicated region fallthrough
CT: control target
= control target key end

     0   :  { %s911_s21 = smov 0   ;;  %s913_s22 = smov 0   ;;  %s991_s0 = inlined_call_operand.vmem [shape: bf16[2,8,8,128], index: 0, kind: input, shape index: {}]   ;;  %s992_s1 = inlined_call_operand.vmem [shape: f32[1,128], index: 1, kind: input, shape index: {}]   ;;  %s993_s2 = inlined_call_operand.vmem [shape: f32[1,128], index: 2, kind: input, shape index: {}]   ;;  %s994_s3 = inlined_call_operand.vmem [shape: bf16[2,4,9,9,128], index: 3, kind: input, shape index: {}]   ;;  %s995_s4 = inlined_call_operand.vmem [shape: bf16[128,128], index: 4, kind: input, shape index: {}]   ;;  %s996_s5 = inlined_call_operand.vmem [shape: f32[1,128], index: 5, kind: input, shape index: {}]   ;;  %s997_s6 = inlined_call_operand.vmem [shape: f32[2,8,8,128], index: 6, kind: output, shape index: {}]  }
   0x1   :  { %s915_s23 = smov 0  }
   0x2 LB: > { %s28_s24 = sadd.s32 1, %s870_s22  ;;  %p712_p0 = scmp.ge.s32.totalorder %s874_s23, 1  ;;  %s874_s23 = sphi %s915_s23, %s16_s23   ;;  %s870_s22 = sphi %s913_s22, %s999_s22   ;;  %s866_s21 = sphi %s911_s21, %s998_s21  }
   0x3   : > { %p30_p1 = scmp.ge.s32.totalorder %s28_s24, 2  ;;  %p262_p2 = scmp.lt.s32.totalorder %s874_s23, 3 }
   0x5   : > { %s1001_s24 = smov (%p30_p1, %s28_s24), 0  ;;  %p263_p3 = pnand %p712_p0, %p262_p2 }
   0x6   : > { %v840_v0 = vld [vmem:[%s995_s4] sm:$0xff] (!%p263_p3)   ;;  %p317_p4 = scmp.lt.s32.totalorder (!%p263_p3), %s866_s21, 1  ;;  %v841_v1 = vld [vmem:[%s995_s4 + $0x8] sm:$0xff] (!%p263_p3)   ;;  %v842_v2 = vld [vmem:[%s995_s4 + $0x10] sm:$0xff] (!%p263_p3)  }
   0x7   : > { %266 = sbr.rel (%p263_p3) target bundleno = 262 (0x106), region = 44  ;;  %776 = vmatprep.subr.bf16.mxu0 (!%p263_p3), %v840_v0  ;;  %800 = vmatprep.subr.bf16.mxu1 (!%p263_p3), %v840_v0  ;;  %v843_v3 = vld [vmem:[%s995_s4 + $0x18] sm:$0xff] (!%p263_p3)   ;;  %v844_v6 = vld [vmem:[%s995_s4 + $0x20] sm:$0xff] (!%p263_p3)   ;;  %v845_v7 = vld [vmem:[%s995_s4 + $0x28] sm:$0xff] (!%p263_p3)  }
   0x8   : > { %777 = vmatpush3.bf16.msra.mxu0 (!%p263_p3), %v840_v0  ;;  %808 = vmatpush3.bf16.msra.mxu1 (!%p263_p3), %v840_v0  ;;  %v846_v8 = vld [vmem:[%s995_s4 + $0x30] sm:$0xff] (!%p263_p3)   ;;  %v847_v9 = vld [vmem:[%s995_s4 + $0x38] sm:$0xff] (!%p263_p3)   ;;  %v718_v18 = vld [vmem:[%s992_s1] ss:$0 sm:$0xff] (!%p263_p3) }
   0x9   : > { %778 = vmatprep.subr.bf16.mxu0 (!%p263_p3), %v841_v1  ;;  %801 = vmatprep.subr.bf16.mxu1 (!%p263_p3), %v841_v1  ;;  %v719_v27 = vld [vmem:[%s993_s2] ss:$0 sm:$0xff] (!%p263_p3) }
   0xa   : > { %v728_v32 = vld [vmem:[%s996_s5] ss:$0 sm:$0xff] (!%p263_p3) }
   0xc   : > { %779 = vmatpush3.bf16.msra.mxu0 (!%p263_p3), %v841_v1  ;;  %809 = vmatpush3.bf16.msra.mxu1 (!%p263_p3), %v841_v1 }
   0xd   : > { %780 = vmatprep.subr.bf16.mxu0 (!%p263_p3), %v842_v2  ;;  %802 = vmatprep.subr.bf16.mxu1 (!%p263_p3), %v842_v2 }
   0xe   : > { %s1003_s21 = smov (!%p317_p4, %s866_s21), 1 }
   0xf   : > { %s715_s7 = smul.u32 288, %s1003_s21  ;;  %s743_s25 = sshll.u32 %s1003_s21, 5 }
  0x10   : > { %781 = vmatpush3.bf16.msra.mxu0 %v842_v2  ;;  %810 = vmatpush3.bf16.msra.mxu1 %v842_v2  ;;  %s324_s28 = scalar_lea.vmem %s991_s0, %s743_s25  ;;  %s744_s11 = sshll.u32 %s1003_s21, 6 }
  0x11   : > { %s944_s10 = scalar_lea.vmem %s994_s3, %s715_s7  ;;  %782 = vmatprep.subr.bf16.mxu0 %v843_v3  ;;  %803 = vmatprep.subr.bf16.mxu1 %v843_v3  ;;  %v761_v12 = vld [vmem:[%s324_s28 + $0x8] sm:$0xff]   ;;  %v763_v13 = vld [vmem:[%s324_s28 + $0x18] sm:$0xff]   ;;  %v746_v14 = vld [vmem:[%s324_s28] sm:$0xff]   ;;  %s356_s13 = scalar_lea.vmem %s997_s6, %s744_s11 }
  0x12   : > { %v848_v4 = vld [vmem:[%s944_s10 + $0xd8] ss:$8 sps:$4 sm:$0xff]   ;;  %v850_v10 = vld [vmem:[%s944_s10 + $0xe8] ss:$8 sps:$4 sm:$0xff]   ;;  %v751_v16 = vunpack.c.l.bf16 %v761_v12  ;;  %v759_v17 = vunpack.c.l.bf16 %v763_v13  ;;  %v747_v19 = vunpack.c.l.bf16 %v746_v14  ;;  %v752_v21 = vunpack.c.h.bf16 %v761_v12 }
  0x13   : > { %v849_v5 = vld [vmem:[%s944_s10 + $0xf8] ss:$8 sps:$4 sm:$0xff]   ;;  %792 = vmatprep.mubr.bf16.mxu0 %v848_v4  ;;  %v851_v11 = vld [vmem:[%s944_s10 + $0x108] ss:$8 sps:$4 sm:$0xff]   ;;  %v760_v22 = vunpack.c.h.bf16 %v763_v13  ;;  %v748_v23 = vunpack.c.h.bf16 %v746_v14 }
  0x14   : > { %796 = vmatprep.mubr.bf16.mxu1 %v849_v5  ;;  %783 = vmatpush3.bf16.msra.mxu0 %v843_v3  ;;  %v762_v15 = vld [vmem:[%s324_s28 + $0x10] sm:$0xff]   ;;  %v384_v25 = vmul.f32 %v751_v16, %v718_v18  ;;  %v388_v26 = vmul.f32 %v759_v17, %v718_v18  ;;  %v382_v28 = vmul.f32 %v747_v19, %v718_v18 }
  0x15   : > { %811 = vmatpush3.bf16.msra.mxu1 %v843_v3  ;;  %784 = vmatprep.subr.bf16.mxu0 %v844_v6  ;;  %v755_v20 = vunpack.c.l.bf16 %v762_v15  ;;  %v756_v24 = vunpack.c.h.bf16 %v762_v15  ;;  %v385_v30 = vmul.f32 %v752_v21, %v718_v18  ;;  %v389_v31 = vmul.f32 %v760_v22, %v718_v18 }
  0x16   : > { %804 = vmatprep.subr.bf16.mxu1 %v844_v6  ;;  %v383_v33 = vmul.f32 %v748_v23, %v718_v18  ;;  %v399_v35 = vadd.f32 %v719_v27, %v384_v25  ;;  %v403_v36 = vadd.f32 %v719_v27, %v388_v26  ;;  %v397_v39 = vadd.f32 %v719_v27, %v382_v28 }
  0x17   : > { %v386_v29 = vmul.f32 %v755_v20, %v718_v18  ;;  %v387_v34 = vmul.f32 %v756_v24, %v718_v18  ;;  %v400_v45 = vadd.f32 %v719_v27, %v385_v30  ;;  %v404_v46 = vadd.f32 %v719_v27, %v389_v31 }
  0x18   : > { %785 = vmatpush3.bf16.msra.mxu0 %v844_v6  ;;  %v398_v51 = vadd.f32 %v719_v27, %v383_v33 }
  0x19   : > { %812 = vmatpush3.bf16.msra.mxu1 %v844_v6  ;;  %786 = vmatprep.subr.bf16.mxu0 %v845_v7  ;;  %v401_v40 = vadd.f32 %v719_v27, %v386_v29  ;;  %v402_v52 = vadd.f32 %v719_v27, %v387_v34 }
  0x1a   : > { %805 = vmatprep.subr.bf16.mxu1 %v845_v7 }
  0x1c   : > { %787 = vmatpush3.bf16.msra.mxu0 %v845_v7 }
  0x1d   : > { %813 = vmatpush3.bf16.msra.mxu1 %v845_v7  ;;  %788 = vmatprep.subr.bf16.mxu0 %v846_v8 }
  0x1e   : > { %806 = vmatprep.subr.bf16.mxu1 %v846_v8 }
  0x20   : > { %789 = vmatpush3.bf16.msra.mxu0 %v846_v8 }
  0x21   : > { %814 = vmatpush3.bf16.msra.mxu1 %v846_v8  ;;  %790 = vmatprep.subr.bf16.mxu0 %v847_v9 }
  0x22   : > { %807 = vmatprep.subr.bf16.mxu1 %v847_v9 }
  0x24   : > { %791 = vmatpush3.bf16.msra.mxu0 %v847_v9 }
  0x25   : > { %815 = vmatpush3.bf16.msra.mxu1 %v847_v9 }
  0x27   : > { %793 = vmatmul.mubr.bf16.vlgmr.msra.gmra.mrb[0].mxu0 %v850_v10 }
  0x28   : > { %797 = vmatmul.mubr.bf16.vlgmr.msra.gmra.mrb[0].mxu1 %v851_v11 }
  0xfa   : > { %v794_v37 = vpop.f32.mrb[0].mxu0 }
  0xfb   : > { %v798_v38 = vpop.f32.mrb[0].mxu1  ;;  %v551_v41 = vadd.f32 %v794_v37, %v728_v32  ;;  %v542_v43 = vpop.f32.mrb[1].mxu0 }
  0xfc   : > { %v567_v42 = vadd.f32 %v798_v38, %v728_v32  ;;  %v558_v44 = vpop.f32.mrb[1].mxu1  ;;  %v543_v47 = vadd.f32 %v728_v32, %v542_v43  ;;  %v795_v49 = vpop.f32.mrb[2].mxu0 }
  0xfd   : > { %v559_v48 = vadd.f32 %v728_v32, %v558_v44  ;;  %v799_v50 = vpop.f32.mrb[2].mxu1  ;;  %v575_v53 = vadd.f32 %v551_v41, %v399_v35  ;;  %v554_v55 = vadd.f32 %v795_v49, %v728_v32  ;;  %v545_v57 = vpop.f32.mrb[3].mxu0 }
  0xfe   : > { %v579_v54 = vadd.f32 %v567_v42, %v403_v36  ;;  %v570_v56 = vadd.f32 %v799_v50, %v728_v32  ;;  %v561_v58 = vpop.f32.mrb[3].mxu1  ;;  %v573_v59 = vadd.f32 %v543_v47, %v397_v39  ;;  %v546_v61 = vadd.f32 %v728_v32, %v545_v57 }
  0xff   : > { %v577_v60 = vadd.f32 %v559_v48, %v401_v40  ;;  %v562_v62 = vadd.f32 %v728_v32, %v561_v58  ;;  %v583_v63 = vmax.f32 %v575_v53, 0.0  ;;  %v576_v1 = vadd.f32 %v554_v55, %v400_v45 }
 0x100   : > { %v587_v0 = vmax.f32 %v579_v54, 0.0  ;;  %v580_v2 = vadd.f32 %v570_v56, %v404_v46  ;;  %v581_v3 = vmax.f32 %v573_v59, 0.0  ;;  %v574_v5 = vadd.f32 %v546_v61, %v398_v51 }
 0x101   : > { %v585_v4 = vmax.f32 %v577_v60, 0.0  ;;  %v578_v6 = vadd.f32 %v562_v62, %v402_v52  ;;  %591 = vst [vmem:[%s356_s13 + $0x10] sm:$0xff] %v583_v63  ;;  %v584_v7 = vmax.f32 %v576_v1, 0.0 }
 0x102   : > { %595 = vst [vmem:[%s356_s13 + $0x30] sm:$0xff] %v587_v0  ;;  %v588_v8 = vmax.f32 %v580_v2, 0.0  ;;  %589 = vst [vmem:[%s356_s13] sm:$0xff] %v581_v3  ;;  %v582_v9 = vmax.f32 %v574_v5, 0.0 }
 0x103   : > { %593 = vst [vmem:[%s356_s13 + $0x20] sm:$0xff] %v585_v4  ;;  %v586_v10 = vmax.f32 %v578_v6, 0.0  ;;  %592 = vst [vmem:[%s356_s13 + $0x18] sm:$0xff] %v584_v7 }
 0x104   : > { %596 = vst [vmem:[%s356_s13 + $0x38] sm:$0xff] %v588_v8  ;;  %590 = vst [vmem:[%s356_s13 + $0x8] sm:$0xff] %v582_v9 }
 0x105   : > { %594 = vst [vmem:[%s356_s13 + $0x28] sm:$0xff] %v586_v10 }
 0x106 PF: > { %s16_s23 = sadd.s32 1, %s874_s23   ;;  %s998_s21 = smov %s870_s22 }
 0x107   : > { %p13_p5 = scmp.ge.s32.totalorder %s16_s23, 4   ;;  %s999_s22 = smov %s1001_s24 }
 0x109   :  { %15 = sbr.rel (!%p13_p5) target bundleno = 2 (0x2), region = 77 }

// kernel: resnet_block_forward.4
= control target key start
LH: loop header
LB: loop body
LE: loop exit
PB: predicated region body
PF: predicated region fallthrough
CT: control target
= control target key end

     0   :  { %s3815_s26 = smov 0   ;;  %s3817_s2 = smov 0   ;;  %s4332_s0 = inlined_call_operand.vmem [shape: bf16[2,8,8,128], index: 0, kind: input, shape index: {}, may-alias: {0,1,2}]   ;;  %s4333_s1 = inlined_call_operand.vmem [shape: bf16[2,8,8,128], index: 1, kind: input, shape index: {}, may-alias: {0,1,2}]   ;;  %s4334_s2 = inlined_call_operand.vmem [shape: bf16[2,8,8,128], index: 2, kind: input, shape index: {}, may-alias: {0,1,2}]   ;;  %s4335_s3 = inlined_call_operand.vmem [shape: f32[1,128], index: 3, kind: input, shape index: {}]   ;;  %s4336_s4 = inlined_call_operand.vmem [shape: f32[1,128], index: 4, kind: input, shape index: {}]   ;;  %s4337_s5 = inlined_call_operand.vmem [shape: bf16[1152,128], index: 5, kind: input, shape index: {}]   ;;  %s4338_s6 = inlined_call_operand.vmem [shape: bf16[2,8,8,128], index: 6, kind: output, shape index: {0}]   ;;  %s4339_s7 = inlined_call_operand.vmem [shape: f32[2,1,128], index: 7, kind: output, shape index: {1}]   ;;  %s4340_s8 = inlined_call_operand.vmem [shape: f32[2,1,128], index: 8, kind: output, shape index: {2}]  }
   0x1   :  { %s3819_s27 = smov 0  }
   0x2 LB: > { %s31_s28 = sadd.s32 1, %s3763_s2  ;;  %p3040_p0 = scmp.ge.s32.totalorder %s3767_s27, 1  ;;  %s3767_s27 = sphi %s3819_s27, %s19_s27   ;;  %s3763_s2 = sphi %s3817_s2, %s4350_s2   ;;  %s3759_s26 = sphi %s3815_s26, %s4349_s26  }
   0x3   : > { %p33_p1 = scmp.ge.s32.totalorder %s31_s28, 2  ;;  %p354_p2 = scmp.lt.s32.totalorder %s3767_s27, 3 }
   0x5   : > { %s4352_s28 = smov (%p33_p1, %s31_s28), 0  ;;  %p355_p3 = pnand %p3040_p0, %p354_p2 }
   0x6   : > { %v3565_v0 = vld [vmem:[%s4337_s5 + $0x40] sm:$0xff] (!%p355_p3)   ;;  %v3769_v3 = vmov (!%p355_p3), 0.0|0.0   ;;  %v3568_v4 = vld [vmem:[%s4337_s5 + $0x48] sm:$0xff] (!%p355_p3)   ;;  %v3572_v8 = vld [vmem:[%s4337_s5 + $0x50] sm:$0xff] (!%p355_p3)   ;;  %p429_p4 = scmp.lt.s32.totalorder (!%p355_p3), %s3759_s26, 1  ;;  %vm561_vm0 = vcmask (!%p355_p3), 1047559  }
   0x7   : > { %358 = sbr.rel (%p355_p3) target bundleno = 413 (0x19d), region = 44  ;;  %v3566_v1 = vld [vmem:[%s4337_s5] sm:$0xff] (!%p355_p3)   ;;  %3328 = vmatprep.subr.bf16.mxu0 (!%p355_p3), %v3565_v0  ;;  %628 = vst [vmem:[#allocation2 + $0x8] sm:$0xf] (!%p355_p3), %v3769_v3  ;;  %648 = vst [vmem:[#allocation2 + $0x98] sm:$0xf] (!%p355_p3), %v3769_v3 }
   0x8   : > { %v3567_v2 = vld [vmem:[%s4337_s5 + $0xc0] sm:$0xff] (!%p355_p3)   ;;  %3329 = vmatpush3.bf16.msra.mxu0 (!%p355_p3), %v3566_v1  ;;  %v3570_v6 = vld [vmem:[%s4337_s5 + $0x8] sm:$0xff] (!%p355_p3)   ;;  %v3574_v10 = vld [vmem:[%s4337_s5 + $0x10] sm:$0xff] (!%p355_p3)   ;;  %vm562_vm1 = vsmask.f32 (!%p355_p3), 7966  ;;  %vm594_vm3 = vcmask (!%p355_p3), 1044484  }
   0x9   : > { %3368 = vmatprep.subr.bf16.mxu1 (!%p355_p3), %v3567_v2  ;;  %v3569_v5 = vld [vmem:[%s4337_s5 + $0x80] sm:$0xff] (!%p355_p3)   ;;  %3330 = vmatprep.subr.bf16.mxu0 (!%p355_p3), %v3568_v4  ;;  %v3571_v7 = vld [vmem:[%s4337_s5 + $0xc8] sm:$0xff] (!%p355_p3)   ;;  %v3575_v11 = vld [vmem:[%s4337_s5 + $0xd0] sm:$0xff] (!%p355_p3)   ;;  %vm595_vm4 = vsmask.f32 (!%p355_p3), 4352 }
   0xa   : > { %3369 = vmatpush3.bf16.msra.mxu1 (!%p355_p3), %v3569_v5  ;;  %v3573_v9 = vld [vmem:[%s4337_s5 + $0x88] sm:$0xff] (!%p355_p3)   ;;  %v3576_v12 = vld [vmem:[%s4337_s5 + $0x58] sm:$0xff] (!%p355_p3)   ;;  %v3577_v13 = vld [vmem:[%s4337_s5 + $0x90] sm:$0xff] (!%p355_p3)   ;;  %vm713_vm6 = vsmask.f32 (!%p355_p3), 256 }
   0xb   : > { %3370 = vmatprep.subr.bf16.mxu1 (!%p355_p3), %v3571_v7  ;;  %v3578_v14 = vld [vmem:[%s4337_s5 + $0x18] sm:$0xff] (!%p355_p3)   ;;  %v3580_v16 = vld [vmem:[%s4337_s5 + $0x60] sm:$0xff] (!%p355_p3)   ;;  %v3584_v20 = vld [vmem:[%s4337_s5 + $0x68] sm:$0xff] (!%p355_p3)   ;;  %vm714_vm7 = vsmask.f32 (!%p355_p3), 4368 }
   0xc   : > { %3331 = vmatpush3.bf16.msra.mxu0 (!%p355_p3), %v3570_v6  ;;  %v3579_v15 = vld [vmem:[%s4337_s5 + $0xd8] sm:$0xff] (!%p355_p3)   ;;  %v3582_v18 = vld [vmem:[%s4337_s5 + $0x20] sm:$0xff] (!%p355_p3)   ;;  %v3586_v22 = vld [vmem:[%s4337_s5 + $0x28] sm:$0xff] (!%p355_p3)   ;;  %vm924_vm9 = vsmask.f32 (!%p355_p3), 3328 }
   0xd   : > { %3332 = vmatprep.subr.bf16.mxu0 (!%p355_p3), %v3572_v8  ;;  %v3581_v17 = vld [vmem:[%s4337_s5 + $0x98] sm:$0xff] (!%p355_p3)   ;;  %v3583_v19 = vld [vmem:[%s4337_s5 + $0xe0] sm:$0xff] (!%p355_p3)   ;;  %v3587_v23 = vld [vmem:[%s4337_s5 + $0xe8] sm:$0xff] (!%p355_p3)   ;;  %vm925_vm10 = vsmask.f32 (!%p355_p3), 7440 }
   0xe   : > { %3371 = vmatpush3.bf16.msra.mxu1 %v3573_v9  ;;  %v3585_v21 = vld [vmem:[%s4337_s5 + $0xa0] sm:$0xff]   ;;  %s4354_s26 = smov (!%p429_p4, %s3759_s26), 1  ;;  %v3588_v24 = vld [vmem:[%s4337_s5 + $0x70] sm:$0xff]   ;;  %v3589_v25 = vld [vmem:[%s4337_s5 + $0xa8] sm:$0xff]  }
   0xf   : > { %3372 = vmatprep.subr.bf16.mxu1 %v3575_v11  ;;  %v3590_v26 = vld [vmem:[%s4337_s5 + $0x30] sm:$0xff]   ;;  %s3281_s19 = sshll.u32 %s4354_s26, 5  ;;  %v3592_v28 = vld [vmem:[%s4337_s5 + $0x78] sm:$0xff]   ;;  %v3943_v32 = vld [vmem:[%s4335_s3] ss:$0 sm:$0xff]  ;;  %s483_s11 = scalar_lea.vmem %s4339_s7, %s4354_s26 }
  0x10   : > { %3333 = vmatpush3.bf16.msra.mxu0 %v3574_v10  ;;  %v3591_v27 = vld [vmem:[%s4337_s5 + $0xf0] sm:$0xff]   ;;  %s3932_s30 = scalar_lea.vmem %s4332_s0, %s3281_s19  ;;  %v3594_v30 = vld [vmem:[%s4337_s5 + $0x38] sm:$0xff]   ;;  %v3948_v33 = vld [vmem:[%s4336_s4] ss:$0 sm:$0xff]  ;;  %s4309_s9 = scalar_lea.vmem %s4338_s6, %s3281_s19 }
  0x11   : > { %3334 = vmatprep.subr.bf16.mxu0 %v3576_v12  ;;  %v3593_v29 = vld [vmem:[%s4337_s5 + $0xb0] sm:$0xff]   ;;  %v3595_v31 = vld [vmem:[%s4337_s5 + $0xf8] sm:$0xff]   ;;  %v3287_v34 = vld [vmem:[%s3932_s30] sm:$0xff]   ;;  %s488_s14 = scalar_lea.vmem %s4340_s8, %s4354_s26 }
  0x12   : > { %3373 = vmatpush3.bf16.msra.mxu1 %v3577_v13  ;;  %v3288_v35 = vunpack.c.l.bf16 %v3287_v34  ;;  %v3289_v36 = vunpack.c.h.bf16 %v3287_v34  ;;  %v3597_v37 = vld [vmem:[%s4337_s5 + $0xb8] sm:$0xff]   ;;  %v3598_v40 = vld [vmem:[%s4337_s5 + $0x140] sm:$0xff]   ;;  %vm3959_vm2 = vmand %vm561_vm0, %vm562_vm1 }
  0x13   : > { %3374 = vmatprep.subr.bf16.mxu1 %v3579_v15  ;;  %v564_v41 = vld [vmem:[#allocation2] sm:$0x80]  ;;  %v567_v43 = vld [vmem:[#allocation2 + $0x10] sm:$0x80]  ;;  %v3600_v47 = vld [vmem:[#allocation2 + $0x8] ss:$0 sps:$4 sm:$0xff]  }
  0x14   : > { %3335 = vmatpush3.bf16.msra.mxu0 %v3578_v14  ;;  %v515_v38 = vmul.f32 %v3288_v35, %v3943_v32  ;;  %v516_v39 = vmul.f32 %v3289_v36, %v3943_v32  ;;  %v565_v45 = vsel %vm3959_vm2, 0, %v564_v41  ;;  %v568_v46 = vsel %vm3959_vm2, 0, %v567_v43  ;;  %v570_v51 = vld [vmem:[#allocation2 + $0x20] sm:$0x80]  ;;  %vm3969_vm5 = vmand %vm594_vm3, %vm595_vm4  ;;  %v597_v56 = vld [vmem:[#allocation2 + $0x8] sm:$0x10] }
  0x15   : > { %3336 = vmatprep.subr.bf16.mxu0 %v3580_v16  ;;  %566 = vst [vmem:[#allocation2] sm:$0x80] %v565_v45  ;;  %569 = vst [vmem:[#allocation2 + $0x10] sm:$0x80] %v568_v46  ;;  %v722_v50 = vshrl.u32 %v3600_v47, 16  ;;  %v3612_v53 = vld [vmem:[%s4337_s5 + $0x1c0] sm:$0xff]  }
  0x16   : > { %3375 = vmatpush3.bf16.msra.mxu1 %v3581_v17  ;;  %v529_v44 = vadd.f32 %v3948_v33, %v515_v38  ;;  %v530_v48 = vadd.f32 %v3948_v33, %v516_v39  ;;  %v571_v55 = vsel %vm3959_vm2, 0, %v570_v51  ;;  %v600_v57 = vld [vmem:[#allocation2 + $0x18] sm:$0x10]  ;;  %v598_v59 = vsel %vm3969_vm5, 0, %v597_v56  ;;  %vm3982_vm8 = vmor %vm713_vm6, %vm714_vm7  ;;  %v3322_v41 = vld [vmem:[%s3932_s30 + $0x8] sm:$0xff]  }
  0x17   : > { %3376 = vmatprep.subr.bf16.mxu1 %v3583_v19  ;;  %572 = vst [vmem:[#allocation2 + $0x20] sm:$0x80] %v571_v55  ;;  %v601_v60 = vsel %vm3969_vm5, 0, %v600_v57  ;;  %599 = vst [vmem:[#allocation2 + $0x8] sm:$0x10] %v598_v59  ;;  %v724_v62 = vrot.slane %v722_v50, 7 }
  0x18   : > { %3337 = vmatpush3.bf16.msra.mxu0 %v3582_v18  ;;  %v537_v49 = vmax.f32 %v529_v44, 0.0  ;;  %v538_v54 = vmax.f32 %v530_v48, 0.0  ;;  %602 = vst [vmem:[#allocation2 + $0x18] sm:$0x10] %v601_v60  ;;  %v725_v63 = vshll.u32 %v3600_v47, 16  ;;  %v3603_v48 = vld [vmem:[%s4337_s5 + $0x100] sm:$0xff]   ;;  %vm4005_vm11 = vmor %vm924_vm9, %vm925_vm10 }
  0x19   : > { %3338 = vmatprep.subr.bf16.mxu0 %v3584_v20  ;;  %v3599_v0 = vld [vmem:[#allocation2 + $0x4] ss:$0 sps:$4 sm:$0x88]   ;;  %v3601_v1 = vld [vmem:[#allocation2 + $0x14] ss:$0 sps:$4 sm:$0x88]  }
  0x1a   : > { %3377 = vmatpush3.bf16.msra.mxu1 %v3585_v21  ;;  %v629_v58 = vpack.c.bf16 %v537_v49, %v537_v49  ;;  %v630_v61 = vpack.c.bf16 %v538_v54, %v538_v54  ;;  %v3604_v2 = vld [vmem:[#allocation2 + $0x14] ss:$0 sps:$4 sm:$0x88]   ;;  %v717_v3 = vshrl.u32 %v3599_v0, 16  ;;  %v730_v4 = vshrl.u32 %v3601_v1, 16  ;;  %v3613_v57 = vld [vmem:[%s4337_s5 + $0x148] sm:$0xff]  }
  0x1b   : > { %3378 = vmatprep.subr.bf16.mxu1 %v3587_v23  ;;  %v727_v6 = vor.u32 %v725_v63, %v724_v62  ;;  %v3606_v7 = vld [vmem:[#allocation2 + $0x24] ss:$0 sps:$4 sm:$0x88]   ;;  %v1124_v8 = vshrl.u32 %v3604_v2, 16  ;;  %v3292_v62 = vunpack.c.l.bf16 %v3322_v41  ;;  %v3293_v2 = vunpack.c.h.bf16 %v3322_v41  ;;  %v3323_v41 = vld [vmem:[%s3932_s30 + $0x10] sm:$0xff]  }
  0x1c   : > { %3339 = vmatpush3.bf16.msra.mxu0 %v3586_v22  ;;  %638 = vst [vmem:[#allocation2 + $0x18] sm:$0xf] %v629_v58  ;;  %639 = vst [vmem:[#allocation2 + $0x28] sm:$0xf] %v630_v61  ;;  %v3067_v12 = vrot.slane %v717_v3, 11  ;;  %v3068_v13 = vrot.slane %v730_v4, 11 }
  0x1d   : > { %3340 = vmatprep.subr.bf16.mxu0 %v3588_v24  ;;  %v3119_v21 = vrot.slane %v1124_v8, 11  ;;  %v573_v58 = vld [vmem:[#allocation2 + $0x30] sm:$0x80]  ;;  %v4001_v63 = vld [vmem:[#allocation2 + $0x24] ss:$0 sps:$4 sm:$0x88]  }
  0x1e   : > { %3379 = vmatpush3.bf16.msra.mxu1 %v3589_v25  ;;  %v876_v9 = vld [vmem:[#allocation2 + $0x8] sm:$0x1f]  ;;  %v728_v18 = vsel %vm3982_vm8, %v3067_v12, %v727_v6  ;;  %v1137_v25 = vshrl.u32 %v3606_v7, 16  ;;  %v574_v3 = vsel %vm3959_vm2, 0, %v573_v58  ;;  %v518_v12 = vmul.f32 %v3293_v2, %v3943_v32  ;;  %v3640_v2 = vld [vmem:[%s4337_s5 + $0x198] sm:$0xff]  }
  0x1f   : > { %3380 = vmatprep.subr.bf16.mxu1 %v3591_v27  ;;  %v3083_v16 = vcombine.low %v876_v9, %v876_v9  ;;  %v3084_v17 = vcombine.high %v876_v9, %v876_v9  ;;  %v3615_v8 = vld [vmem:[%s4337_s5 + $0x108] sm:$0xff]   ;;  %v517_v9 = vmul.f32 %v3292_v62, %v3943_v32  ;;  %575 = vst [vmem:[#allocation2 + $0x30] sm:$0x80] %v574_v3 }
  0x20   : > { %3341 = vmatpush3.bf16.msra.mxu0 %v3590_v26  ;;  %v3120_v34 = vrot.slane %v1137_v25, 11  ;;  %v532_v25 = vadd.f32 %v3948_v33, %v518_v12 }
  0x21   : > { %3342 = vmatprep.subr.bf16.mxu0 %v3592_v28  ;;  %v928_v36 = vshrl.u32 %v3083_v16, 16  ;;  %v931_v38 = vshll.u32 %v3083_v16, 16  ;;  %v937_v39 = vshll.u32 %v3084_v17, 16  ;;  %v3616_v16 = vld [vmem:[%s4337_s5 + $0x1c8] sm:$0xff]   ;;  %v531_v17 = vadd.f32 %v3948_v33, %v517_v9 }
  0x22   : > { %3381 = vmatpush3.bf16.msra.mxu1 %v3593_v29 }
  0x23   : > { %3382 = vmatprep.subr.bf16.mxu1 %v3595_v31  ;;  %v3596_v10 = vld [vmem:[#allocation2 + $0x8] ss:$16 sps:$4 sm:$0xff]   ;;  %v930_v45 = vrot.slane %v928_v36, 4  ;;  %v933_v49 = vrot.slane %v931_v38, 5  ;;  %v939_v50 = vrot.slane %v937_v39, 5 }
  0x24   : > { %3343 = vmatpush3.bf16.msra.mxu0 %v3594_v30  ;;  %v3602_v11 = vld [vmem:[#allocation2 + $0x18] ss:$0 sps:$4 sm:$0xff]   ;;  %2512 = vmatprep.mubr.bf16.mxu0 %v3596_v10  ;;  %v3607_v15 = vld [vmem:[#allocation2 + $0x28] ss:$0 sps:$4 sm:$0xff]  }
  0x25   : > { %3408 = vmatprep.subr.bf16.mxu0 %v3598_v40  ;;  %v3605_v14 = vld [vmem:[#allocation2 + $0x18] ss:$0 sps:$4 sm:$0xff]   ;;  %v735_v19 = vshrl.u32 %v3602_v11, 16  ;;  %v738_v20 = vshll.u32 %v3602_v11, 16  ;;  %v1142_v26 = vshrl.u32 %v3607_v15, 16  ;;  %v1145_v28 = vshll.u32 %v3607_v15, 16 }
  0x26   : > { %3383 = vmatpush3.bf16.msra.mxu1 %v3597_v37  ;;  %v877_v22 = vld [vmem:[#allocation2 + $0x18] sm:$0x1f]  ;;  %v1129_v23 = vshrl.u32 %v3605_v14, 16  ;;  %v1132_v24 = vshll.u32 %v3605_v14, 16  ;;  %v934_v60 = vor.u32 %v933_v49, %v930_v45  ;;  %v4011_v4 = vld [vmem:[#allocation2 + $0x28] ss:$0 sps:$4 sm:$0xff]  }
  0x27   : > { %3448 = vmatprep.subr.bf16.mxu1 %v3612_v53  ;;  %v737_v27 = vrot.slane %v735_v19, 7  ;;  %v3085_v29 = vcombine.low %v877_v22, %v877_v22  ;;  %v3086_v30 = vcombine.high %v877_v22, %v877_v22  ;;  %v1144_v35 = vrot.slane %v1142_v26, 7  ;;  %v3614_v11 = vld [vmem:[%s4337_s5 + $0x180] sm:$0xff]   ;;  %v3624_v19 = vld [vmem:[%s4337_s5 + $0x110] sm:$0xff]   ;;  %v606_v22 = vld [vmem:[#allocation2 + $0x38] sm:$0x10] }
  0x28   : > { %v1131_v31 = vrot.slane %v1129_v23, 7  ;;  %v935_v6 = vrot.slane %v934_v60, 4  ;;  %v576_v14 = vld [vmem:[#allocation2 + $0x40] sm:$0x80]  ;;  %v3636_v38 = vld [vmem:[%s4337_s5 + $0x118] sm:$0xff]  }
  0x29   : > { %v740_v37 = vor.u32 %v738_v20, %v737_v27  ;;  %v942_v40 = vshrl.u32 %v3085_v29, 16  ;;  %v1147_v44 = vor.u32 %v1145_v28, %v1144_v35  ;;  %v945_v46 = vshll.u32 %v3085_v29, 16  ;;  %v3634_v27 = vld [vmem:[%s4337_s5 + $0x158] sm:$0xff]   ;;  %v3622_v39 = vld [vmem:[#allocation2 + $0x34] ss:$0 sps:$4 sm:$0x88]  }
  0x2a   : > { %v1134_v43 = vor.u32 %v1132_v24, %v1131_v31  ;;  %v951_v61 = vshll.u32 %v3086_v30, 16  ;;  %v940_v15 = vsel %vm4005_vm11, %v935_v6, %v939_v50  ;;  %v577_v20 = vsel %vm3959_vm2, 0, %v576_v14  ;;  %v3619_v31 = vld [vmem:[%s4337_s5 + $0x188] sm:$0xff]   ;;  %v3639_v49 = vld [vmem:[%s4337_s5 + $0x160] sm:$0xff]  }
  0x2b   : > { %v741_v47 = vsel %vm3982_vm8, %v3068_v13, %v740_v37  ;;  %v944_v51 = vrot.slane %v942_v40, 4  ;;  %v1148_v55 = vsel %vm3982_vm8, %v3120_v34, %v1147_v44  ;;  %v947_v56 = vrot.slane %v945_v46, 5  ;;  %v3618_v13 = vld [vmem:[%s4337_s5 + $0x150] sm:$0xff]   ;;  %578 = vst [vmem:[#allocation2 + $0x40] sm:$0x80] %v577_v20  ;;  %v3645_v60 = vld [vmem:[%s4337_s5 + $0x120] sm:$0xff]  }
  0x2c   : > { %v3075_v53 = vcombine.low %v728_v18, %v741_v47  ;;  %v1135_v54 = vsel %vm3982_vm8, %v3119_v21, %v1134_v43  ;;  %v953_v7 = vrot.slane %v951_v61, 5  ;;  %v743_v18 = vshrl.u32 %v4001_v63, 16  ;;  %v603_v21 = vld [vmem:[#allocation2 + $0x28] sm:$0x10]  ;;  %v3633_v37 = vld [vmem:[%s4337_s5 + $0x1d0] sm:$0xff]  }
  0x2d   : > { %v3127_v59 = vcombine.low %v1135_v54, %v1148_v55  ;;  %v948_v1 = vor.u32 %v947_v56, %v944_v51  ;;  %v748_v24 = vshrl.u32 %v4011_v4, 16  ;;  %v604_v26 = vsel %vm3969_vm5, 0, %v603_v21  ;;  %v3625_v44 = vld [vmem:[#allocation2 + $0x34] ss:$0 sps:$4 sm:$0x88]   ;;  %v3637_v55 = vld [vmem:[%s4337_s5 + $0x1d8] sm:$0xff]  }
  0x2e   : > { %2513 = vmatmul.mubr.bf16.vlgmr.msra.gmra.mrb[0].mxu0 %v3075_v53  ;;  %v539_v29 = vmax.f32 %v531_v17, 0.0  ;;  %605 = vst [vmem:[#allocation2 + $0x28] sm:$0x10] %v604_v26  ;;  %v607_v30 = vsel %vm3969_vm5, 0, %v606_v22  ;;  %v751_v34 = vshll.u32 %v4011_v4, 16  ;;  %v540_v35 = vmax.f32 %v532_v25, 0.0 }
  0x2f   : > { %3409 = vmatpush3.bf16.msra.mxu0 %v3603_v48  ;;  %2577 = vmatprep.mubr.bf16.mxu1 %v3127_v59  ;;  %v949_v10 = vrot.slane %v948_v1, 4  ;;  %608 = vst [vmem:[#allocation2 + $0x38] sm:$0x10] %v607_v30  ;;  %v750_v43 = vrot.slane %v748_v24, 7  ;;  %v756_v45 = vshrl.u32 %v3622_v39, 16  ;;  %v3635_v46 = vld [vmem:[%s4337_s5 + $0x190] sm:$0xff]   ;;  %v3296_v47 = vunpack.c.l.bf16 %v3323_v41 }
  0x30   : > { %3410 = vmatprep.subr.bf16.mxu0 %v3613_v57  ;;  %v631_v36 = vpack.c.bf16 %v539_v29, %v539_v29  ;;  %v632_v40 = vpack.c.bf16 %v540_v35, %v540_v35  ;;  %v3297_v48 = vunpack.c.h.bf16 %v3323_v41  ;;  %v3627_v50 = vld [vmem:[#allocation2 + $0x44] ss:$0 sps:$4 sm:$0x88]   ;;  %v1150_v51 = vshrl.u32 %v3625_v44, 16 }
  0x31   : > { %v954_v23 = vsel %vm4005_vm11, %v949_v10, %v953_v7  ;;  %v4064_v53 = vrot.slane %v743_v18, 11  ;;  %v4069_v56 = vor.u32 %v751_v34, %v750_v43  ;;  %v1163_v57 = vshrl.u32 %v3627_v50, 16  ;;  %v579_v34 = vld [vmem:[#allocation2 + $0x50] sm:$0x80]  ;;  %v3654_v41 = vld [vmem:[%s4337_s5 + $0x1e0] sm:$0xff]  }
  0x32   : > { %v3099_v28 = vcombine.low %v940_v15, %v954_v23  ;;  %640 = vst [vmem:[#allocation2 + $0x38] sm:$0xf] %v631_v36  ;;  %641 = vst [vmem:[#allocation2 + $0x48] sm:$0xf] %v632_v40  ;;  %v3070_v61 = vrot.slane %v756_v45, 11  ;;  %v4074_v62 = vrot.slane %v1150_v51, 11  ;;  %v519_v63 = vmul.f32 %v3296_v47, %v3943_v32 }
  0x33   : > { %3411 = vmatpush3.bf16.msra.mxu0 %v3615_v8  ;;  %v520_v1 = vmul.f32 %v3297_v48, %v3943_v32  ;;  %v3122_v3 = vrot.slane %v1163_v57, 11  ;;  %v754_v10 = vsel %vm3982_vm8, %v4064_v53, %v4069_v56  ;;  %v3641_v40 = vld [vmem:[#allocation2 + $0x44] ss:$0 sps:$4 sm:$0x88]   ;;  %v582_v47 = vld [vmem:[#allocation2 + $0x60] sm:$0x80] }
  0x34   : > { %3412 = vmatprep.subr.bf16.mxu0 %v3618_v13  ;;  %2578 = vmatmul.mubr.bf16.vlgmr.msra.gmra.mrb[0].mxu1 %v3099_v28  ;;  %v533_v14 = vadd.f32 %v3948_v33, %v519_v63  ;;  %v609_v48 = vld [vmem:[#allocation2 + $0x48] sm:$0x10]  ;;  %v3656_v63 = vld [vmem:[%s4337_s5 + $0x1a0] sm:$0xff]  }
  0x35   : > { %3449 = vmatpush3.bf16.msra.mxu1 %v3614_v11  ;;  %v878_v54 = vld [vmem:[#allocation2 + $0x28] sm:$0x1f]  ;;  %v4089_v15 = vadd.f32 %v3948_v33, %v520_v1 }
  0x36   : > { %3450 = vmatprep.subr.bf16.mxu1 %v3616_v16  ;;  %v3087_v58 = vcombine.low %v878_v54, %v878_v54  ;;  %v3088_v59 = vcombine.high %v878_v54, %v878_v54  ;;  %v541_v39 = vmax.f32 %v533_v14, 0.0  ;;  %v1688_v42 = vld [vmem:[#allocation2 + $0x28] sm:$0x1f] }
  0x37   : > { %3413 = vmatpush3.bf16.msra.mxu0 %v3624_v19 }
  0x38   : > { %3414 = vmatprep.subr.bf16.mxu0 %v3634_v27  ;;  %v956_v4 = vshrl.u32 %v3087_v58, 16  ;;  %v959_v6 = vshll.u32 %v3087_v58, 16  ;;  %v4081_v7 = vshll.u32 %v3088_v59, 16  ;;  %v633_v54 = vpack.c.bf16 %v541_v39, %v541_v39  ;;  %v3655_v59 = vld [vmem:[%s4337_s5 + $0x168] sm:$0xff]  }
  0x39   : > { %3451 = vmatpush3.bf16.msra.mxu1 %v3619_v31  ;;  %v3617_v8 = vld [vmem:[#allocation2 + $0x28] ss:$16 sps:$4 sm:$0xff]  }
  0x3a   : > { %3452 = vmatprep.subr.bf16.mxu1 %v3633_v37  ;;  %v3623_v9 = vld [vmem:[#allocation2 + $0x38] ss:$0 sps:$4 sm:$0xff]   ;;  %2520 = vmatprep.mubr.bf16.mxu0 %v3617_v8  ;;  %v3628_v12 = vld [vmem:[#allocation2 + $0x48] ss:$0 sps:$4 sm:$0xff]   ;;  %v958_v25 = vrot.slane %v956_v4, 4  ;;  %v961_v26 = vrot.slane %v959_v6, 5 }
  0x3b   : > { %3415 = vmatpush3.bf16.msra.mxu0 %v3636_v38  ;;  %v3626_v11 = vld [vmem:[#allocation2 + $0x38] ss:$0 sps:$4 sm:$0xff]   ;;  %v761_v16 = vshrl.u32 %v3623_v9, 16  ;;  %v764_v17 = vshll.u32 %v3623_v9, 16  ;;  %v1168_v22 = vshrl.u32 %v3628_v12, 16  ;;  %v1171_v23 = vshll.u32 %v3628_v12, 16 }
  0x3c   : > { %3416 = vmatprep.subr.bf16.mxu0 %v3639_v49  ;;  %v879_v13 = vld [vmem:[#allocation2 + $0x38] sm:$0x1f]  ;;  %v1155_v20 = vshrl.u32 %v3626_v11, 16  ;;  %v1158_v21 = vshll.u32 %v3626_v11, 16  ;;  %v967_v27 = vrot.slane %v4081_v7, 5  ;;  %v962_v37 = vor.u32 %v961_v26, %v958_v25 }
  0x3d   : > { %3453 = vmatpush3.bf16.msra.mxu1 %v3635_v46  ;;  %v3089_v18 = vcombine.low %v879_v13, %v879_v13  ;;  %v3090_v19 = vcombine.high %v879_v13, %v879_v13  ;;  %v763_v24 = vrot.slane %v761_v16, 7  ;;  %v1170_v29 = vrot.slane %v1168_v22, 7  ;;  %v4092_v35 = vld [vmem:[#allocation2 + $0x48] ss:$0 sps:$4 sm:$0xff]   ;;  %v612_v49 = vld [vmem:[#allocation2 + $0x58] sm:$0x10] }
  0x3e   : > { %3454 = vmatprep.subr.bf16.mxu1 %v3637_v55  ;;  %v1157_v28 = vrot.slane %v1155_v20, 7  ;;  %v963_v51 = vrot.slane %v962_v37, 4  ;;  %642 = vst [vmem:[#allocation2 + $0x58] sm:$0xf] %v633_v54  ;;  %v542_v4 = vmax.f32 %v4089_v15, 0.0  ;;  %v769_v6 = vshrl.u32 %v3641_v40, 16 }
  0x3f   : > { %3417 = vmatpush3.bf16.msra.mxu0 %v3645_v60  ;;  %v970_v30 = vshrl.u32 %v3089_v18, 16  ;;  %v973_v31 = vshll.u32 %v3089_v18, 16  ;;  %v766_v36 = vor.u32 %v764_v17, %v763_v24  ;;  %v979_v38 = vshll.u32 %v3090_v19, 16  ;;  %v3658_v13 = vld [vmem:[%s4337_s5 + $0x1e8] sm:$0xff]   ;;  %v3324_v16 = vld [vmem:[%s3932_s30 + $0x18] sm:$0xff]   ;;  %v3660_v19 = vld [vmem:[%s4337_s5 + $0x170] sm:$0xff]  }
  0x40   : > { %v1160_v43 = vor.u32 %v1158_v21, %v1157_v28  ;;  %v1173_v44 = vor.u32 %v1171_v23, %v1170_v29  ;;  %v968_v1 = vsel %vm4005_vm11, %v963_v51, %v967_v27  ;;  %3418 = vmatprep.subr.bf16.mxu0 %v3655_v59  ;;  %v583_v7 = vsel %vm3959_vm2, 0, %v582_v47  ;;  %v3661_v21 = vld [vmem:[%s4337_s5 + $0x1a8] sm:$0xff]   ;;  %v585_v22 = vld [vmem:[#allocation2 + $0x70] sm:$0x80] }
  0x41   : > { %3455 = vmatpush3.bf16.msra.mxu1 %v3640_v2  ;;  %v972_v45 = vrot.slane %v970_v30, 4  ;;  %v975_v46 = vrot.slane %v973_v31, 5  ;;  %v767_v50 = vsel %vm3982_vm8, %v3070_v61, %v766_v36  ;;  %v981_v53 = vrot.slane %v979_v38, 5  ;;  %584 = vst [vmem:[#allocation2 + $0x60] sm:$0x80] %v583_v7  ;;  %v3666_v59 = vld [vmem:[%s4337_s5 + $0x130] sm:$0xff]  }
  0x42   : > { %3456 = vmatprep.subr.bf16.mxu1 %v3654_v41  ;;  %v3076_v55 = vcombine.low %v754_v10, %v767_v50  ;;  %v1161_v56 = vsel %vm3982_vm8, %v4074_v62, %v1160_v43  ;;  %v1174_v57 = vsel %vm3982_vm8, %v3122_v3, %v1173_v44  ;;  %v580_v61 = vsel %vm3959_vm2, 0, %v579_v34  ;;  %v3657_v62 = vld [vmem:[%s4337_s5 + $0x128] sm:$0xff]   ;;  %v3643_v26 = vld [vmem:[#allocation2 + $0x54] ss:$0 sps:$4 sm:$0x88]  }
  0x43   : > { %v976_v58 = vor.u32 %v975_v46, %v972_v45  ;;  %v3128_v60 = vcombine.low %v1161_v56, %v1174_v57  ;;  %581 = vst [vmem:[#allocation2 + $0x50] sm:$0x80] %v580_v61  ;;  %v774_v3 = vshrl.u32 %v4092_v35, 16  ;;  %v610_v8 = vsel %vm3969_vm5, 0, %v609_v48  ;;  %3419 = vmatpush3.bf16.msra.mxu0 %v3657_v62 }
  0x44   : > { %2521 = vmatmul.mubr.bf16.gmra.mrb[4].mxu0 %v3076_v55  ;;  %v613_v9 = vsel %vm3969_vm5, 0, %v612_v49  ;;  %v777_v11 = vshll.u32 %v4092_v35, 16  ;;  %v634_v12 = vpack.c.bf16 %v542_v4, %v542_v4  ;;  %611 = vst [vmem:[#allocation2 + $0x48] sm:$0x10] %v610_v8  ;;  %v3300_v17 = vunpack.c.l.bf16 %v3324_v16  ;;  %3420 = vmatprep.subr.bf16.mxu0 %v3660_v19 }
  0x45   : > { %v977_v2 = vrot.slane %v976_v58, 4  ;;  %2585 = vmatprep.mubr.bf16.mxu1 %v3128_v60  ;;  %3457 = vmatpush3.bf16.msra.mxu1 %v3656_v63  ;;  %614 = vst [vmem:[#allocation2 + $0x58] sm:$0x10] %v613_v9  ;;  %v776_v15 = vrot.slane %v774_v3, 7  ;;  %v3301_v18 = vunpack.c.h.bf16 %v3324_v16  ;;  %v3071_v20 = vrot.slane %v769_v6, 11 }
  0x46   : > { %643 = vst [vmem:[#allocation2 + $0x68] sm:$0xf] %v634_v12  ;;  %3458 = vmatprep.subr.bf16.mxu1 %v3658_v13  ;;  %v3638_v23 = vld [vmem:[#allocation2 + $0x48] ss:$16 sps:$4 sm:$0xff]   ;;  %v521_v24 = vmul.f32 %v3300_v17, %v3943_v32  ;;  %v586_v28 = vsel %vm3959_vm2, 0, %v585_v22  ;;  %v782_v34 = vshrl.u32 %v3643_v26, 16 }
  0x47   : > { %v982_v10 = vsel %vm4005_vm11, %v977_v2, %v981_v53  ;;  %v522_v25 = vmul.f32 %v3301_v18, %v3943_v32  ;;  %v779_v27 = vor.u32 %v777_v11, %v776_v15  ;;  %2528 = vmatprep.mubr.bf16.mxu0 %v3638_v23  ;;  %v3644_v29 = vld [vmem:[#allocation2 + $0x58] ss:$0 sps:$4 sm:$0xff]   ;;  %587 = vst [vmem:[#allocation2 + $0x70] sm:$0x80] %v586_v28  ;;  %v3675_v17 = vld [vmem:[%s4337_s5 + $0x1f0] sm:$0xff]  }
  0x48   : > { %v3100_v14 = vcombine.low %v968_v1, %v982_v10  ;;  %v4143_v30 = vadd.f32 %v3948_v33, %v521_v24  ;;  %v3646_v35 = vld [vmem:[#allocation2 + $0x54] ss:$0 sps:$4 sm:$0x88]   ;;  %v787_v36 = vshrl.u32 %v3644_v29, 16  ;;  %v790_v32 = vshll.u32 %v3644_v29, 16  ;;  %3421 = vmatpush3.bf16.msra.mxu0 %v3666_v59  ;;  %v3676_v22 = vld [vmem:[%s4337_s5 + $0x178] sm:$0xff]  }
  0x49   : > { %3459 = vmatpush3.bf16.msra.mxu1 %v3661_v21  ;;  %v4146_v31 = vadd.f32 %v3948_v33, %v522_v25  ;;  %v3647_v37 = vld [vmem:[#allocation2 + $0x58] ss:$0 sps:$4 sm:$0xff]   ;;  %v780_v39 = vsel %vm3982_vm8, %v3071_v20, %v779_v27  ;;  %v3072_v40 = vrot.slane %v782_v34, 11  ;;  %v3648_v41 = vld [vmem:[#allocation2 + $0x64] ss:$0 sps:$4 sm:$0x88]   ;;  %3422 = vmatprep.subr.bf16.mxu0 %v3676_v22 }
  0x4a   : > { %2586 = vmatmul.mubr.bf16.gmra.mrb[4].mxu1 %v3100_v14  ;;  %v789_v45 = vrot.slane %v787_v36, 7  ;;  %v1176_v47 = vshrl.u32 %v3646_v35, 16  ;;  %v1181_v48 = vshrl.u32 %v3647_v37, 16  ;;  %v1184_v49 = vshll.u32 %v3647_v37, 16  ;;  %v588_v27 = vld [vmem:[#allocation2 + $0x80] sm:$0x80]  ;;  %3460 = vmatprep.subr.bf16.mxu1 %v3675_v17 }
  0x4b   : > { %v880_v38 = vld [vmem:[#allocation2 + $0x48] sm:$0x1f]  ;;  %v1189_v33 = vshrl.u32 %v3648_v41, 16  ;;  %v3662_v11 = vld [vmem:[#allocation2 + $0x64] ss:$0 sps:$4 sm:$0x88]  }
  0x4c   : > { %v3091_v43 = vcombine.low %v880_v38, %v880_v38  ;;  %v3092_v44 = vcombine.high %v880_v38, %v880_v38  ;;  %v881_v50 = vld [vmem:[#allocation2 + $0x58] sm:$0x1f]  ;;  %v792_v55 = vor.u32 %v790_v32, %v789_v45  ;;  %v3123_v56 = vrot.slane %v1176_v47, 11  ;;  %v3664_v16 = vld [vmem:[#allocation2 + $0x74] ss:$0 sps:$4 sm:$0x88]  }
  0x4d   : > { %v3649_v46 = vld [vmem:[#allocation2 + $0x68] ss:$0 sps:$4 sm:$0xff]   ;;  %v1183_v57 = vrot.slane %v1181_v48, 7  ;;  %v3124_v60 = vrot.slane %v1189_v33, 11  ;;  %v3093_v63 = vcombine.low %v881_v50, %v881_v50  ;;  %v3094_v62 = vcombine.high %v881_v50, %v881_v50  ;;  %v3677_v28 = vld [vmem:[%s4337_s5 + $0x1b0] sm:$0xff]  }
  0x4e   : > { %v984_v51 = vshrl.u32 %v3091_v43, 16  ;;  %v987_v53 = vshll.u32 %v3091_v43, 16  ;;  %v993_v54 = vshll.u32 %v3092_v44, 16  ;;  %v1194_v58 = vshrl.u32 %v3649_v46, 16  ;;  %v4155_v6 = vld [vmem:[#allocation2 + $0x68] ss:$0 sps:$4 sm:$0xff]   ;;  %3461 = vmatpush3.bf16.msra.mxu1 %v3677_v28 }
  0x4f   : > { %v1197_v61 = vshll.u32 %v3649_v46, 16  ;;  %v793_v1 = vsel %vm3982_vm8, %v3072_v40, %v792_v55  ;;  %v1186_v2 = vor.u32 %v1184_v49, %v1183_v57  ;;  %v998_v10 = vshrl.u32 %v3093_v63, 16  ;;  %v615_v36 = vld [vmem:[#allocation2 + $0x68] sm:$0x10]  ;;  %v618_v45 = vld [vmem:[#allocation2 + $0x78] sm:$0x10] }
  0x50   : > { %v1196_v3 = vrot.slane %v1194_v58, 7  ;;  %v986_v4 = vrot.slane %v984_v51, 4  ;;  %v3077_v7 = vcombine.low %v780_v39, %v793_v1  ;;  %v989_v8 = vrot.slane %v987_v53, 5  ;;  %v3667_v40 = vld [vmem:[#allocation2 + $0x74] ss:$0 sps:$4 sm:$0x88]  }
  0x51   : > { %v995_v9 = vrot.slane %v993_v54, 5  ;;  %v1187_v12 = vsel %vm3982_vm8, %v3123_v56, %v1186_v2  ;;  %v1001_v14 = vshll.u32 %v3093_v63, 16  ;;  %v1007_v15 = vshll.u32 %v3094_v62, 16  ;;  %v3678_v46 = vld [vmem:[%s4337_s5 + $0x138] sm:$0xff]   ;;  %v4202_v56 = vld [vmem:[%s4337_s5 + $0x200] sm:$0xff]  }
  0x52   : > { %v1199_v13 = vor.u32 %v1197_v61, %v1196_v3  ;;  %2529 = vmatmul.mubr.bf16.gmra.mrb[8].mxu0 %v3077_v7  ;;  %v990_v18 = vor.u32 %v989_v8, %v986_v4  ;;  %v1000_v19 = vrot.slane %v998_v10, 4  ;;  %v543_v20 = vmax.f32 %v4143_v30, 0.0  ;;  %v3684_v53 = vld [vmem:[%s4337_s5 + $0x1b8] sm:$0xff]   ;;  %v3669_v3 = vld [vmem:[#allocation2 + $0x84] ss:$0 sps:$4 sm:$0x88]  }
  0x53   : > { %v795_v21 = vshrl.u32 %v3662_v11, 16  ;;  %v1003_v24 = vrot.slane %v1001_v14, 5  ;;  %v1009_v25 = vrot.slane %v1007_v15, 5  ;;  %v800_v26 = vshrl.u32 %v4155_v6, 16  ;;  %3423 = vmatpush3.bf16.msra.mxu0 %v3678_v46  ;;  %v1283_v59 = vld [vmem:[#allocation2 + $0x18] sm:$0x1f] }
  0x54   : > { %v1200_v23 = vsel %vm3982_vm8, %v3124_v60, %v1199_v13  ;;  %v991_v30 = vrot.slane %v990_v18, 4  ;;  %v635_v34 = vpack.c.bf16 %v543_v20, %v543_v20  ;;  %v803_v38 = vshll.u32 %v4155_v6, 16  ;;  %3500 = vmatprep.subr.bf16.mxu0 %v4202_v56  ;;  %v4206_v60 = vld [vmem:[#allocation2 + $0x28] sm:$0x1f] }
  0x55   : > { %v3129_v29 = vcombine.low %v1187_v12, %v1200_v23  ;;  %v4172_v35 = vrot.slane %v795_v21, 11  ;;  %v1004_v32 = vor.u32 %v1003_v24, %v1000_v19  ;;  %v802_v37 = vrot.slane %v800_v26, 7 }
  0x56   : > { %v808_v39 = vshrl.u32 %v3664_v16, 16  ;;  %644 = vst [vmem:[#allocation2 + $0x78] sm:$0xf] %v635_v34  ;;  %v544_v41 = vmax.f32 %v4146_v31, 0.0  ;;  %v589_v43 = vsel %vm3959_vm2, 0, %v588_v27  ;;  %v616_v44 = vsel %vm3969_vm5, 0, %v615_v36 }
  0x57   : > { %2593 = vmatprep.mubr.bf16.mxu1 %v3129_v29  ;;  %v996_v47 = vsel %vm4005_vm11, %v991_v30, %v995_v9  ;;  %v1005_v48 = vrot.slane %v1004_v32, 4  ;;  %590 = vst [vmem:[#allocation2 + $0x80] sm:$0x80] %v589_v43  ;;  %v1202_v33 = vshrl.u32 %v3667_v40, 16  ;;  %617 = vst [vmem:[#allocation2 + $0x68] sm:$0x10] %v616_v44  ;;  %v805_v58 = vor.u32 %v803_v38, %v802_v37 }
  0x58   : > { %v4185_v49 = vrot.slane %v808_v39, 11  ;;  %v3679_v31 = vld [vmem:[%s4337_s5 + $0x1f8] sm:$0xff]   ;;  %v636_v50 = vpack.c.bf16 %v544_v41, %v544_v41  ;;  %v619_v51 = vsel %vm3969_vm5, 0, %v618_v45  ;;  %v3135_v61 = vcombine.low %v1283_v59, %v1283_v59 }
  0x59   : > { %v1010_v54 = vsel %vm4005_vm11, %v1005_v48, %v1009_v25  ;;  %v4197_v55 = vrot.slane %v1202_v33, 11  ;;  %620 = vst [vmem:[#allocation2 + $0x78] sm:$0x10] %v619_v51  ;;  %3462 = vmatprep.subr.bf16.mxu1 %v3679_v31  ;;  %v806_v1 = vsel %vm3982_vm8, %v4172_v35, %v805_v58  ;;  %v3136_v4 = vcombine.high %v1283_v59, %v1283_v59 }
  0x5a   : > { %v3101_v57 = vcombine.low %v996_v47, %v1010_v54  ;;  %645 = vst [vmem:[#allocation2 + $0x88] sm:$0xf] %v636_v50  ;;  %3463 = vmatpush3.bf16.msra.mxu1 %v3684_v53  ;;  %v1332_v6 = vshrl.u32 %v3135_v61, 16  ;;  %v3137_v11 = vcombine.low %v4206_v60, %v4206_v60  ;;  %v3138_v12 = vcombine.high %v4206_v60, %v4206_v60  ;;  %v3689_v60 = vld [vmem:[#allocation2 + $0x28] ss:$0 sps:$4 sm:$0xff]  }
  0x5b   : > { %3524 = vmatprep.subr.bf16.mxu1 %v4202_v56  ;;  %v1215_v19 = vshrl.u32 %v3669_v3, 16  ;;  %v1335_v31 = vshll.u32 %v3135_v61, 16  ;;  %v3687_v3 = vld [vmem:[#allocation2 + $0x28] ss:$16 sps:$4 sm:$0xff]  }
  0x5c   : > { %2594 = vmatmul.mubr.bf16.gmra.mrb[8].mxu1 %v3101_v57  ;;  %v1334_v48 = vrot.slane %v1332_v6, 4  ;;  %v1346_v50 = vshrl.u32 %v3137_v11, 16  ;;  %v3688_v6 = vld [vmem:[#allocation2 + $0x24] ss:$0 sps:$4 sm:$0x88]  }
  0x5d   : > { %v3659_v63 = vld [vmem:[#allocation2 + $0x68] ss:$16 sps:$4 sm:$0xff]   ;;  %v3126_v27 = vrot.slane %v1215_v19, 11  ;;  %v1337_v58 = vrot.slane %v1335_v31, 5 }
  0x5e   : > { %v3665_v62 = vld [vmem:[#allocation2 + $0x78] ss:$0 sps:$4 sm:$0xff]   ;;  %2536 = vmatprep.mubr.bf16.mxu0 %v3659_v63  ;;  %v882_v9 = vld [vmem:[#allocation2 + $0x68] sm:$0x1f]  ;;  %v1348_v59 = vrot.slane %v1346_v50, 4 }
  0x5f   : > { %v3668_v2 = vld [vmem:[#allocation2 + $0x78] ss:$0 sps:$4 sm:$0xff]   ;;  %v813_v7 = vshrl.u32 %v3665_v62, 16  ;;  %v816_v8 = vshll.u32 %v3665_v62, 16  ;;  %v3095_v16 = vcombine.low %v882_v9, %v882_v9  ;;  %v3096_v17 = vcombine.high %v882_v9, %v882_v9 }
  0x60   : > { %v883_v10 = vld [vmem:[#allocation2 + $0x78] sm:$0x1f]  ;;  %v1207_v14 = vshrl.u32 %v3668_v2, 16  ;;  %v1210_v15 = vshll.u32 %v3668_v2, 16  ;;  %v1355_v2 = vshll.u32 %v3138_v12, 16  ;;  %v1338_v61 = vor.u32 %v1337_v58, %v1334_v48 }
  0x61   : > { %v3670_v13 = vld [vmem:[#allocation2 + $0x88] ss:$0 sps:$4 sm:$0xff]   ;;  %v815_v18 = vrot.slane %v813_v7, 7  ;;  %v3097_v20 = vcombine.low %v883_v10, %v883_v10  ;;  %v3098_v21 = vcombine.high %v883_v10, %v883_v10  ;;  %v1012_v25 = vshrl.u32 %v3095_v16, 16 }
  0x62   : > { %v1209_v22 = vrot.slane %v1207_v14, 7  ;;  %v1220_v23 = vshrl.u32 %v3670_v13, 16  ;;  %v1223_v24 = vshll.u32 %v3670_v13, 16  ;;  %v1015_v28 = vshll.u32 %v3095_v16, 16 }
  0x63   : > { %v818_v26 = vor.u32 %v816_v8, %v815_v18  ;;  %v1021_v29 = vshll.u32 %v3096_v17, 16  ;;  %v1014_v35 = vrot.slane %v1012_v25, 4  ;;  %v1026_v36 = vshrl.u32 %v3097_v20, 16  ;;  %v3690_v7 = vld [vmem:[#allocation2 + $0x34] ss:$0 sps:$4 sm:$0x88]  }
  0x64   : > { %v1212_v30 = vor.u32 %v1210_v15, %v1209_v22  ;;  %v1222_v34 = vrot.slane %v1220_v23, 7  ;;  %v1017_v37 = vrot.slane %v1015_v28, 5  ;;  %v1029_v39 = vshll.u32 %v3097_v20, 16  ;;  %v3691_v8 = vld [vmem:[#allocation2 + $0x38] ss:$0 sps:$4 sm:$0xff]  }
  0x65   : > { %v819_v32 = vsel %vm3982_vm8, %v4185_v49, %v818_v26  ;;  %v1023_v38 = vrot.slane %v1021_v29, 5  ;;  %v1028_v44 = vrot.slane %v1026_v36, 4  ;;  %v1035_v47 = vshll.u32 %v3098_v21, 16  ;;  %v1285_v18 = vld [vmem:[#allocation2 + $0x38] sm:$0x1f] }
  0x66   : > { %v3078_v40 = vcombine.low %v806_v1, %v819_v32  ;;  %v1213_v41 = vsel %vm3982_vm8, %v4197_v55, %v1212_v30  ;;  %v1225_v43 = vor.u32 %v1223_v24, %v1222_v34  ;;  %v1018_v45 = vor.u32 %v1017_v37, %v1014_v35  ;;  %v1286_v22 = vld [vmem:[#allocation2 + $0x48] sm:$0x1f] }
  0x67   : > { %v1031_v46 = vrot.slane %v1029_v39, 5  ;;  %v1341_v49 = vshll.u32 %v3136_v4, 16  ;;  %v1037_v57 = vrot.slane %v1035_v47, 5  ;;  %v1349_v55 = vshll.u32 %v3137_v11, 16  ;;  %v3686_v35 = vld [vmem:[#allocation2 + $0x18] ss:$16 sps:$4 sm:$0xff]  }
  0x68   : > { %2537 = vmatmul.mubr.bf16.gmra.mrb[12].mxu0 %v3078_v40  ;;  %v1226_v33 = vsel %vm3982_vm8, %v3126_v27, %v1225_v43  ;;  %v1019_v53 = vrot.slane %v1018_v45, 4  ;;  %v1357_v10 = vrot.slane %v1355_v2, 5  ;;  %v1529_v13 = vshrl.u32 %v3688_v6, 16 }
  0x69   : > { %v3130_v51 = vcombine.low %v1213_v41, %v1226_v33  ;;  %v1032_v54 = vor.u32 %v1031_v46, %v1028_v44  ;;  %v1343_v1 = vrot.slane %v1341_v49, 5  ;;  %v1351_v4 = vrot.slane %v1349_v55, 5  ;;  %v3692_v41 = vld [vmem:[%s4337_s5 + $0x208] sm:$0xff]  }
  0x6a   : > { %v1024_v63 = vsel %vm4005_vm11, %v1019_v53, %v1023_v38  ;;  %v1534_v11 = vshrl.u32 %v3689_v60, 16  ;;  %v1339_v15 = vrot.slane %v1338_v61, 4  ;;  %v1537_v17 = vshll.u32 %v3689_v60, 16  ;;  %v3699_v44 = vld [vmem:[#allocation2 + $0x48] ss:$16 sps:$4 sm:$0xff]  }
  0x6b   : > { %2601 = vmatprep.mubr.bf16.mxu1 %v3130_v51  ;;  %v1033_v62 = vrot.slane %v1032_v54, 4  ;;  %v1352_v16 = vor.u32 %v1351_v4, %v1348_v59  ;;  %v3171_v19 = vrot.slane %v1529_v13, 11  ;;  %v1542_v12 = vshrl.u32 %v3690_v7, 16  ;;  %v3697_v54 = vld [vmem:[%s4337_s5 + $0x210] sm:$0xff]   ;;  %v3701_v55 = vld [vmem:[#allocation2 + $0x48] ss:$0 sps:$4 sm:$0xff]  }
  0x6c   : > { %v1536_v20 = vrot.slane %v1534_v11, 7  ;;  %v1547_v21 = vshrl.u32 %v3691_v8, 16  ;;  %v1344_v23 = vsel %vm4005_vm11, %v1339_v15, %v1343_v1  ;;  %v1550_v25 = vshll.u32 %v3691_v8, 16  ;;  %v3700_v59 = vld [vmem:[#allocation2 + $0x44] ss:$0 sps:$4 sm:$0x88]  }
  0x6d   : > { %v1038_v9 = vsel %vm4005_vm11, %v1033_v62, %v1037_v57  ;;  %v1353_v24 = vrot.slane %v1352_v16, 4  ;;  %v3139_v26 = vcombine.low %v1285_v18, %v1285_v18  ;;  %v3172_v28 = vrot.slane %v1542_v12, 11  ;;  %v3702_v62 = vld [vmem:[#allocation2 + $0x54] ss:$0 sps:$4 sm:$0x88]   ;;  %v3704_v13 = vld [vmem:[%s4337_s5 + $0x218] sm:$0xff]  }
  0x6e   : > { %v3102_v14 = vcombine.low %v1024_v63, %v1038_v9  ;;  %v1539_v27 = vor.u32 %v1537_v17, %v1536_v20  ;;  %v1549_v29 = vrot.slane %v1547_v21, 7  ;;  %v3140_v30 = vcombine.high %v1285_v18, %v1285_v18  ;;  %v3703_v1 = vld [vmem:[#allocation2 + $0x58] ss:$0 sps:$4 sm:$0xff]   ;;  %v1288_v16 = vld [vmem:[#allocation2 + $0x68] sm:$0x1f] }
  0x6f   : > { %v1358_v34 = vsel %vm4005_vm11, %v1353_v24, %v1357_v10  ;;  %v3141_v36 = vcombine.low %v1286_v22, %v1286_v22  ;;  %v3142_v32 = vcombine.high %v1286_v22, %v1286_v22  ;;  %v1360_v37 = vshrl.u32 %v3139_v26, 16  ;;  %v3698_v7 = vld [vmem:[#allocation2 + $0x38] ss:$16 sps:$4 sm:$0xff]  }
  0x70   : > { %2602 = vmatmul.mubr.bf16.gmra.mrb[12].mxu1 %v3102_v14  ;;  %v3151_v38 = vcombine.low %v1344_v23, %v1358_v34  ;;  %v1540_v39 = vsel %vm3982_vm8, %v3171_v19, %v1539_v27  ;;  %v1552_v40 = vor.u32 %v1550_v25, %v1549_v29  ;;  %v1363_v43 = vshll.u32 %v3139_v26, 16  ;;  %v1287_v15 = vld [vmem:[#allocation2 + $0x58] sm:$0x1f] }
  0x71   : > { %2707 = vmatprep.mubr.bf16.mxu1 %v3687_v3  ;;  %v1362_v45 = vrot.slane %v1360_v37, 4  ;;  %v1369_v46 = vshll.u32 %v3140_v30, 16  ;;  %v1374_v47 = vshrl.u32 %v3141_v36, 16  ;;  %v1377_v48 = vshll.u32 %v3141_v36, 16 }
  0x72   : > { %2642 = vmatprep.mubr.bf16.mxu0 %v3151_v38  ;;  %v1553_v33 = vsel %vm3982_vm8, %v3172_v28, %v1552_v40  ;;  %v1365_v31 = vrot.slane %v1363_v43, 5  ;;  %v1383_v49 = vshll.u32 %v3142_v32, 16  ;;  %v1555_v3 = vshrl.u32 %v3700_v59, 16 }
  0x73   : > { %2643 = vmatmul.mubr.bf16.vlgmr.msra.gmra.mrb[16].mxu0 %v3686_v35  ;;  %v3179_v50 = vcombine.low %v1540_v39, %v1553_v33  ;;  %v1376_v51 = vrot.slane %v1374_v47, 4  ;;  %v1379_v53 = vrot.slane %v1377_v48, 5  ;;  %v1371_v58 = vrot.slane %v1369_v46, 5  ;;  %v3711_v35 = vld [vmem:[#allocation2 + $0x68] ss:$16 sps:$4 sm:$0xff]   ;;  %v3709_v39 = vld [vmem:[%s4337_s5 + $0x220] sm:$0xff]  }
  0x74   : > { %3501 = vmatpush3.bf16.msra.mxu0 %v4202_v56  ;;  %v1366_v57 = vor.u32 %v1365_v31, %v1362_v45  ;;  %v1385_v63 = vrot.slane %v1383_v49, 5  ;;  %v1560_v6 = vshrl.u32 %v3701_v55, 16  ;;  %v1563_v61 = vshll.u32 %v3701_v55, 16  ;;  %v3716_v46 = vld [vmem:[%s4337_s5 + $0x228] sm:$0xff]  }
  0x75   : > { %3502 = vmatprep.subr.bf16.mxu0 %v3692_v41  ;;  %v1380_v60 = vor.u32 %v1379_v53, %v1376_v51  ;;  %v1568_v8 = vshrl.u32 %v3702_v62, 16  ;;  %v1573_v9 = vshrl.u32 %v3703_v1, 16  ;;  %v1576_v10 = vshll.u32 %v3703_v1, 16  ;;  %v3712_v33 = vld [vmem:[#allocation2 + $0x64] ss:$0 sps:$4 sm:$0x88]  }
  0x76   : > { %v1367_v2 = vrot.slane %v1366_v57, 4  ;;  %v1562_v14 = vrot.slane %v1560_v6, 7  ;;  %v3143_v20 = vcombine.low %v1287_v15, %v1287_v15  ;;  %v3144_v22 = vcombine.high %v1287_v15, %v1287_v15  ;;  %v3713_v31 = vld [vmem:[#allocation2 + $0x68] ss:$0 sps:$4 sm:$0xff]   ;;  %v3715_v51 = vld [vmem:[#allocation2 + $0x78] ss:$0 sps:$4 sm:$0xff]  }
  0x77   : > { %v1381_v4 = vrot.slane %v1380_v60, 4  ;;  %v3174_v18 = vrot.slane %v1568_v8, 11  ;;  %v1575_v19 = vrot.slane %v1573_v9, 7  ;;  %v3145_v23 = vcombine.low %v1288_v16, %v1288_v16  ;;  %v621_v6 = vld [vmem:[#allocation2 + $0x88] sm:$0x10] }
  0x78   : > { %2708 = vmatmul.mubr.bf16.vlgmr.msra.gmra.mrb[16].mxu1 %v3179_v50  ;;  %3503 = vmatpush3.bf16.msra.mxu0 %v3692_v41  ;;  %v1372_v11 = vsel %vm4005_vm11, %v1367_v2, %v1371_v58  ;;  %v1565_v21 = vor.u32 %v1563_v61, %v1562_v14  ;;  %v3146_v25 = vcombine.high %v1288_v16, %v1288_v16  ;;  %v1388_v26 = vshrl.u32 %v3143_v20, 16  ;;  %v3714_v50 = vld [vmem:[#allocation2 + $0x74] ss:$0 sps:$4 sm:$0x88]   ;;  %v1289_v61 = vld [vmem:[#allocation2 + $0x78] sm:$0x1f] }
  0x79   : > { %3532 = vmatpush3.bf16.msra.mxu1 %v4202_v56  ;;  %2715 = vmatprep.mubr.bf16.mxu1 %v3699_v44  ;;  %v3173_v56 = vrot.slane %v1555_v3, 11  ;;  %v1386_v17 = vsel %vm4005_vm11, %v1381_v4, %v1385_v63  ;;  %v1578_v24 = vor.u32 %v1576_v10, %v1575_v19  ;;  %v1391_v27 = vshll.u32 %v3143_v20, 16  ;;  %v3721_v10 = vld [vmem:[%s4337_s5 + $0x230] sm:$0xff]   ;;  %v3723_v19 = vld [vmem:[#allocation2 + $0x88] ss:$16 sps:$4 sm:$0xff]  }
  0x7a   : > { %3525 = vmatprep.subr.bf16.mxu1 %v3692_v41  ;;  %3504 = vmatprep.subr.bf16.mxu0 %v3697_v54  ;;  %v3152_v12 = vcombine.low %v1372_v11, %v1386_v17  ;;  %v1397_v29 = vshll.u32 %v3144_v22, 16  ;;  %v1402_v30 = vshrl.u32 %v3145_v23, 16  ;;  %v1405_v34 = vshll.u32 %v3145_v23, 16 }
  0x7b   : > { %v1566_v28 = vsel %vm3982_vm8, %v3173_v56, %v1565_v21  ;;  %v1579_v36 = vsel %vm3982_vm8, %v3174_v18, %v1578_v24  ;;  %v1390_v32 = vrot.slane %v1388_v26, 4  ;;  %v1393_v37 = vrot.slane %v1391_v27, 5  ;;  %v3724_v27 = vld [vmem:[#allocation2 + $0x84] ss:$0 sps:$4 sm:$0x88]  }
  0x7c   : > { %2650 = vmatprep.mubr.bf16.mxu0 %v3152_v12  ;;  %3505 = vmatpush3.bf16.msra.mxu0 %v3697_v54  ;;  %v1411_v38 = vshll.u32 %v3146_v25, 16  ;;  %v3180_v40 = vcombine.low %v1566_v28, %v1579_v36  ;;  %v1407_v43 = vrot.slane %v1405_v34, 5  ;;  %v1399_v45 = vrot.slane %v1397_v29, 5  ;;  %v591_v12 = vld [vmem:[#allocation2 + $0x90] sm:$0x80]  ;;  %v3728_v25 = vld [vmem:[%s4337_s5 + $0x238] sm:$0xff]  }
  0x7d   : > { %3533 = vmatpush3.bf16.msra.mxu1 %v3692_v41  ;;  %2651 = vmatmul.mubr.bf16.gmra.mrb[20].mxu0 %v3698_v7  ;;  %v1404_v41 = vrot.slane %v1402_v30, 4  ;;  %v1394_v44 = vor.u32 %v1393_v37, %v1390_v32  ;;  %v1581_v57 = vshrl.u32 %v3712_v33, 16  ;;  %v1586_v58 = vshrl.u32 %v3713_v31, 16  ;;  %v3725_v28 = vld [vmem:[#allocation2 + $0x88] ss:$0 sps:$4 sm:$0xff]  }
  0x7e   : > { %3526 = vmatprep.subr.bf16.mxu1 %v3697_v54  ;;  %3506 = vmatprep.subr.bf16.mxu0 %v3704_v13  ;;  %v1413_v48 = vrot.slane %v1411_v38, 5  ;;  %v1589_v59 = vshll.u32 %v3713_v31, 16  ;;  %v1594_v60 = vshrl.u32 %v3714_v50, 16  ;;  %v1599_v63 = vshrl.u32 %v3715_v51, 16  ;;  %v3727_v30 = vld [vmem:[#allocation2 + $0x98] ss:$0 sps:$4 sm:$0xff]  }
  0x7f   : > { %v1408_v47 = vor.u32 %v1407_v43, %v1404_v41  ;;  %v1395_v49 = vrot.slane %v1394_v44, 4  ;;  %v1602_v62 = vshll.u32 %v3715_v51, 16  ;;  %v3175_v2 = vrot.slane %v1581_v57, 11  ;;  %v1689_v41 = vld [vmem:[#allocation2 + $0x38] sm:$0x1f] }
  0x80   : > { %2716 = vmatmul.mubr.bf16.gmra.mrb[20].mxu1 %v3180_v40  ;;  %3507 = vmatpush3.bf16.msra.mxu0 %v3704_v13  ;;  %v1588_v3 = vrot.slane %v1586_v58, 7  ;;  %v3176_v7 = vrot.slane %v1594_v60, 11  ;;  %v1601_v8 = vrot.slane %v1599_v63, 7  ;;  %v622_v9 = vsel %vm3969_vm5, 0, %v621_v6 }
  0x81   : > { %3534 = vmatpush3.bf16.msra.mxu1 %v3697_v54  ;;  %3508 = vmatprep.subr.bf16.mxu0 %v3709_v39  ;;  %v1409_v53 = vrot.slane %v1408_v47, 4  ;;  %v3710_v54 = vld [vmem:[#allocation2 + $0x58] ss:$16 sps:$4 sm:$0xff]   ;;  %v1400_v55 = vsel %vm4005_vm11, %v1395_v49, %v1399_v45  ;;  %623 = vst [vmem:[#allocation2 + $0x88] sm:$0x10] %v622_v9  ;;  %v3147_v11 = vcombine.low %v1289_v61, %v1289_v61  ;;  %v592_v26 = vsel %vm3959_vm2, 0, %v591_v12 }
  0x82   : > { %3527 = vmatprep.subr.bf16.mxu1 %v3704_v13  ;;  %2723 = vmatprep.mubr.bf16.mxu1 %v3711_v35  ;;  %v3148_v56 = vcombine.high %v1289_v61, %v1289_v61  ;;  %v1604_v14 = vor.u32 %v1602_v62, %v1601_v8  ;;  %593 = vst [vmem:[#allocation2 + $0x90] sm:$0x80] %v592_v26  ;;  %v1607_v35 = vshrl.u32 %v3724_v27, 16  ;;  %v1612_v36 = vshrl.u32 %v3725_v28, 16  ;;  %v1690_v49 = vld [vmem:[#allocation2 + $0x48] sm:$0x1f] }
  0x83   : > { %v1414_v1 = vsel %vm4005_vm11, %v1409_v53, %v1413_v48  ;;  %v1416_v16 = vshrl.u32 %v3147_v11, 16  ;;  %v1419_v17 = vshll.u32 %v3147_v11, 16  ;;  %v1615_v32 = vshll.u32 %v3725_v28, 16  ;;  %v3726_v60 = vld [vmem:[#allocation2 + $0x94] ss:$0 sps:$4 sm:$0x88]  }
  0x84   : > { %3509 = vmatpush3.bf16.msra.mxu0 %v3709_v39  ;;  %v3153_v4 = vcombine.low %v1400_v55, %v1414_v1  ;;  %v1425_v18 = vshll.u32 %v3148_v56, 16  ;;  %v1605_v20 = vsel %vm3982_vm8, %v3176_v7, %v1604_v14  ;;  %v1625_v40 = vshrl.u32 %v3727_v30, 16  ;;  %v3722_v12 = vld [vmem:[#allocation2 + $0x78] ss:$16 sps:$4 sm:$0xff]  }
  0x85   : > { %3535 = vmatpush3.bf16.msra.mxu1 %v3704_v13  ;;  %3510 = vmatprep.subr.bf16.mxu0 %v3716_v46  ;;  %v1591_v13 = vor.u32 %v1589_v59, %v1588_v3  ;;  %v1418_v22 = vrot.slane %v1416_v16, 4  ;;  %v1421_v23 = vrot.slane %v1419_v17, 5  ;;  %v3177_v43 = vrot.slane %v1607_v35, 11  ;;  %v1692_v35 = vld [vmem:[#allocation2 + $0x68] sm:$0x1f] }
  0x86   : > { %3528 = vmatprep.subr.bf16.mxu1 %v3709_v39  ;;  %2658 = vmatprep.mubr.bf16.mxu0 %v3153_v4  ;;  %v1427_v24 = vrot.slane %v1425_v18, 5  ;;  %v1614_v44 = vrot.slane %v1612_v36, 7  ;;  %v1628_v45 = vshll.u32 %v3727_v30, 16  ;;  %v1627_v51 = vrot.slane %v1625_v40, 7 }
  0x87   : > { %2659 = vmatmul.mubr.bf16.gmra.mrb[24].mxu0 %v3710_v54  ;;  %v1592_v15 = vsel %vm3982_vm8, %v3175_v2, %v1591_v13  ;;  %v1422_v29 = vor.u32 %v1421_v23, %v1418_v22  ;;  %v3188_v53 = vcombine.high %v1688_v42, %v1688_v42  ;;  %v3189_v54 = vcombine.low %v1689_v41, %v1689_v41  ;;  %v1691_v13 = vld [vmem:[#allocation2 + $0x58] sm:$0x1f] }
  0x88   : > { %3511 = vmatpush3.bf16.msra.mxu0 %v3716_v46  ;;  %v3181_v21 = vcombine.low %v1592_v15, %v1605_v20  ;;  %v1290_v34 = vld [vmem:[#allocation2 + $0x88] sm:$0x1f]  ;;  %v1617_v50 = vor.u32 %v1615_v32, %v1614_v44  ;;  %v3190_v55 = vcombine.high %v1689_v41, %v1689_v41  ;;  %v1630_v62 = vor.u32 %v1628_v45, %v1627_v51  ;;  %v1693_v41 = vld [vmem:[#allocation2 + $0x78] sm:$0x1f] }
  0x89   : > { %3536 = vmatpush3.bf16.msra.mxu1 %v3709_v39  ;;  %3512 = vmatprep.subr.bf16.mxu0 %v3721_v10  ;;  %v3149_v37 = vcombine.low %v1290_v34, %v1290_v34  ;;  %v3150_v38 = vcombine.high %v1290_v34, %v1290_v34  ;;  %v1423_v39 = vrot.slane %v1422_v29, 4  ;;  %v3191_v2 = vcombine.low %v1690_v49, %v1690_v49 }
  0x8a   : > { %3529 = vmatprep.subr.bf16.mxu1 %v3716_v46  ;;  %2724 = vmatmul.mubr.bf16.gmra.mrb[24].mxu1 %v3181_v21  ;;  %v1618_v63 = vsel %vm3982_vm8, %v3177_v43, %v1617_v50  ;;  %v1746_v61 = vshll.u32 %v3188_v53, 16  ;;  %v1751_v4 = vshrl.u32 %v3189_v54, 16  ;;  %v1620_v7 = vshrl.u32 %v3726_v60, 16  ;;  %v1694_v60 = vld [vmem:[#allocation2 + $0x88] sm:$0x1f] }
  0x8b   : > { %2731 = vmatprep.mubr.bf16.mxu1 %v3723_v19  ;;  %v1428_v47 = vsel %vm4005_vm11, %v1423_v39, %v1427_v24  ;;  %v1430_v48 = vshrl.u32 %v3149_v37, 16  ;;  %v1433_v33 = vshll.u32 %v3149_v37, 16  ;;  %v1439_v31 = vshll.u32 %v3150_v38, 16 }
  0x8c   : > { %3513 = vmatpush3.bf16.msra.mxu0 %v3721_v10  ;;  %v1754_v9 = vshll.u32 %v3189_v54, 16  ;;  %v1748_v14 = vrot.slane %v1746_v61, 5  ;;  %v1753_v15 = vrot.slane %v1751_v4, 4  ;;  %v3178_v16 = vrot.slane %v1620_v7, 11 }
  0x8d   : > { %3537 = vmatpush3.bf16.msra.mxu1 %v3716_v46  ;;  %3514 = vmatprep.subr.bf16.mxu0 %v3728_v25  ;;  %v3187_v46 = vcombine.low %v1688_v42, %v1688_v42  ;;  %v1432_v57 = vrot.slane %v1430_v48, 4  ;;  %v1435_v58 = vrot.slane %v1433_v33, 5  ;;  %v1441_v59 = vrot.slane %v1439_v31, 5 }
  0x8e   : > { %3530 = vmatprep.subr.bf16.mxu1 %v3721_v10  ;;  %v1756_v17 = vrot.slane %v1754_v9, 5  ;;  %v3192_v19 = vcombine.high %v1690_v49, %v1690_v49  ;;  %v3193_v22 = vcombine.low %v1691_v13, %v1691_v13  ;;  %v3194_v23 = vcombine.high %v1691_v13, %v1691_v13 }
  0x8f   : > { %v1737_v1 = vshrl.u32 %v3187_v46, 16  ;;  %v1436_v3 = vor.u32 %v1435_v58, %v1432_v57  ;;  %v1740_v6 = vshll.u32 %v3187_v46, 16  ;;  %v1765_v27 = vshrl.u32 %v3191_v2, 16 }
  0x90   : > { %3515 = vmatpush3.bf16.msra.mxu0 %v3728_v25  ;;  %v1757_v26 = vor.u32 %v1756_v17, %v1753_v15  ;;  %v1768_v30 = vshll.u32 %v3191_v2, 16  ;;  %v1774_v34 = vshll.u32 %v3192_v19, 16  ;;  %v1779_v37 = vshrl.u32 %v3193_v22, 16 }
  0x91   : > { %3538 = vmatpush3.bf16.msra.mxu1 %v3721_v10  ;;  %v1739_v8 = vrot.slane %v1737_v1, 4  ;;  %v1760_v10 = vshll.u32 %v3190_v55, 16  ;;  %v1437_v11 = vrot.slane %v1436_v3, 4  ;;  %v1742_v56 = vrot.slane %v1740_v6, 5 }
  0x92   : > { %3531 = vmatprep.subr.bf16.mxu1 %v3728_v25  ;;  %v1758_v36 = vrot.slane %v1757_v26, 4  ;;  %v1767_v32 = vrot.slane %v1765_v27, 4  ;;  %v1782_v38 = vshll.u32 %v3193_v22, 16  ;;  %v1770_v40 = vrot.slane %v1768_v30, 5 }
  0x93   : > { %v1762_v18 = vrot.slane %v1760_v10, 5  ;;  %v1442_v20 = vsel %vm4005_vm11, %v1437_v11, %v1441_v59  ;;  %v1743_v21 = vor.u32 %v1742_v56, %v1739_v8  ;;  %v1776_v5 = vrot.slane %v1774_v34, 5 }
  0x94   : > { %v3154_v24 = vcombine.low %v1428_v47, %v1442_v20  ;;  %v1788_v42 = vshll.u32 %v3194_v23, 16  ;;  %v1781_v44 = vrot.slane %v1779_v37, 4  ;;  %v1784_v45 = vrot.slane %v1782_v38, 5  ;;  %v624_v47 = vld [vmem:[#allocation2 + $0x98] sm:$0x10] }
  0x95   : > { %3539 = vmatpush3.bf16.msra.mxu1 %v3728_v25  ;;  %v1631_v25 = vsel %vm3982_vm8, %v3178_v16, %v1630_v62  ;;  %v1744_v29 = vrot.slane %v1743_v21, 4  ;;  %v1763_v43 = vsel %vm4005_vm11, %v1758_v36, %v1762_v18  ;;  %v3195_v46 = vcombine.low %v1692_v35, %v1692_v35 }
  0x96   : > { %v3182_v28 = vcombine.low %v1618_v63, %v1631_v25  ;;  %2666 = vmatprep.mubr.bf16.mxu0 %v3154_v24  ;;  %v1771_v33 = vor.u32 %v1770_v40, %v1767_v32  ;;  %v1790_v31 = vrot.slane %v1788_v42, 5  ;;  %v3196_v49 = vcombine.high %v1692_v35, %v1692_v35 }
  0x97   : > { %2667 = vmatmul.mubr.bf16.gmra.mrb[28].mxu0 %v3722_v12  ;;  %v1749_v39 = vsel %vm4005_vm11, %v1744_v29, %v1748_v14  ;;  %v1785_v50 = vor.u32 %v1784_v45, %v1781_v44  ;;  %v3197_v51 = vcombine.low %v1693_v41, %v1693_v41  ;;  %v3198_v53 = vcombine.high %v1693_v41, %v1693_v41 }
  0x98   : > { %2732 = vmatmul.mubr.bf16.gmra.mrb[28].mxu1 %v3182_v28  ;;  %v3203_v48 = vcombine.low %v1749_v39, %v1763_v43  ;;  %v1793_v54 = vshrl.u32 %v3195_v46, 16  ;;  %v1772_v57 = vrot.slane %v1771_v33, 4  ;;  %v1796_v58 = vshll.u32 %v3195_v46, 16 }
  0x99   : > { %v1802_v59 = vshll.u32 %v3196_v49, 16  ;;  %v625_v55 = vsel %vm3969_vm5, 0, %v624_v47  ;;  %v1786_v63 = vrot.slane %v1785_v50, 4  ;;  %v1807_v1 = vshrl.u32 %v3197_v51, 16 }
  0x9a   : > { %3516 = vmatprep.mubr.bf16.mxu0 %v3203_v48  ;;  %v1795_v62 = vrot.slane %v1793_v54, 4  ;;  %v1810_v2 = vshll.u32 %v3197_v51, 16  ;;  %626 = vst [vmem:[#allocation2 + $0x98] sm:$0x10] %v625_v55  ;;  %v1777_v3 = vsel %vm4005_vm11, %v1772_v57, %v1776_v5  ;;  %v1798_v6 = vrot.slane %v1796_v58, 5 }
  0x9b   : > { %v1816_v61 = vshll.u32 %v3198_v53, 16  ;;  %v1791_v4 = vsel %vm4005_vm11, %v1786_v63, %v1790_v31  ;;  %v1809_v7 = vrot.slane %v1807_v1, 4  ;;  %v3199_v9 = vcombine.low %v1694_v60, %v1694_v60 }
  0x9c   : > { %v1812_v8 = vrot.slane %v1810_v2, 5  ;;  %v3204_v10 = vcombine.low %v1777_v3, %v1791_v4  ;;  %v1799_v52 = vor.u32 %v1798_v6, %v1795_v62  ;;  %v1804_v13 = vrot.slane %v1802_v59, 5 }
  0x9d   : > { %v3200_v11 = vcombine.high %v1694_v60, %v1694_v60  ;;  %v1818_v14 = vrot.slane %v1816_v61, 5  ;;  %v1821_v15 = vshrl.u32 %v3199_v9, 16  ;;  %v1824_v16 = vshll.u32 %v3199_v9, 16 }
  0x9e   : > { %v1813_v56 = vor.u32 %v1812_v8, %v1809_v7  ;;  %v1800_v17 = vrot.slane %v1799_v52, 4 }
  0x9f   : > { %3517 = vmatmul.mubr.bf16.vlgmr.msra.gmra.mrb[32].mxu0 %v3204_v10  ;;  %v1823_v19 = vrot.slane %v1821_v15, 4  ;;  %v1826_v20 = vrot.slane %v1824_v16, 5  ;;  %v1830_v22 = vshll.u32 %v3200_v11, 16 }
  0xa0   : > { %v1814_v18 = vrot.slane %v1813_v56, 4  ;;  %v1805_v12 = vsel %vm4005_vm11, %v1800_v17, %v1804_v13 }
  0xa1   : > { %v1695_v21 = vld [vmem:[#allocation2 + $0x98] sm:$0x1f]  ;;  %v1827_v26 = vor.u32 %v1826_v20, %v1823_v19  ;;  %v1832_v35 = vrot.slane %v1830_v22, 5 }
  0xa2   : > { %v1819_v23 = vsel %vm4005_vm11, %v1814_v18, %v1818_v14  ;;  %v3201_v24 = vcombine.low %v1695_v21, %v1695_v21  ;;  %v3202_v25 = vcombine.high %v1695_v21, %v1695_v21 }
  0xa3   : > { %v3205_v27 = vcombine.low %v1805_v12, %v1819_v23  ;;  %v1828_v34 = vrot.slane %v1827_v26, 4 }
  0xa4   : > { %v1835_v28 = vshrl.u32 %v3201_v24, 16  ;;  %v1838_v29 = vshll.u32 %v3201_v24, 16  ;;  %v1844_v30 = vshll.u32 %v3202_v25, 16 }
  0xa5   : > { %3520 = vmatprep.mubr.bf16.mxu1 %v3205_v27  ;;  %v1833_v39 = vsel %vm4005_vm11, %v1828_v34, %v1832_v35 }
  0xa6   : > { %v1837_v36 = vrot.slane %v1835_v28, 4  ;;  %v1840_v32 = vrot.slane %v1838_v29, 5  ;;  %v1846_v38 = vrot.slane %v1844_v30, 5 }
  0xa8   : > { %v1841_v37 = vor.u32 %v1840_v32, %v1837_v36 }
  0xaa   : > { %v1842_v40 = vrot.slane %v1841_v37, 4 }
  0xac   : > { %v1847_v5 = vsel %vm4005_vm11, %v1842_v40, %v1846_v38 }
  0xad   : > { %v3206_v42 = vcombine.low %v1833_v39, %v1847_v5 }
  0xaf   : > { %3521 = vmatmul.mubr.bf16.vlgmr.msra.gmra.mrb[32].mxu1 %v3206_v42 }
 0x101   : > { %v3344_v41 = vpop.f32.mrb[0].mxu0 }
 0x102   : > { %v3345_v43 = vpop.f32.mrb[1].mxu0 }
 0x103   : > { %v3346_v44 = vadd.f32 %v3345_v43, %v3344_v41  ;;  %v3347_v45 = vpop.f32.mrb[2].mxu0 }
 0x104   : > { %v3348_v46 = vpop.f32.mrb[3].mxu0 }
 0x105   : > { %v3349_v47 = vadd.f32 %v3348_v46, %v3347_v45 }
 0x107   : > { %v3384_v48 = vpop.f32.mrb[0].mxu1 }
 0x108   : > { %v3385_v33 = vpop.f32.mrb[1].mxu1 }
 0x109   : > { %v3386_v31 = vadd.f32 %v3385_v33, %v3384_v48  ;;  %v3387_v49 = vpop.f32.mrb[2].mxu1 }
 0x10a   : > { %v3388_v50 = vpop.f32.mrb[3].mxu1 }
 0x10b   : > { %v2580_v51 = vadd.f32 %v3386_v31, %v3346_v44  ;;  %v3389_v53 = vadd.f32 %v3388_v50, %v3387_v49 }
 0x10d   : > { %v2583_v54 = vadd.f32 %v3389_v53, %v3349_v47 }
 0x117   : > { %v3350_v57 = vpop.f32.mrb[4].mxu0 }
 0x118   : > { %v3351_v58 = vpop.f32.mrb[5].mxu0 }
 0x119   : > { %v3352_v0 = vadd.f32 %v3351_v58, %v3350_v57  ;;  %v3353_v59 = vpop.f32.mrb[6].mxu0 }
 0x11a   : > { %v3354_v55 = vpop.f32.mrb[7].mxu0 }
 0x11b   : > { %v3355_v60 = vadd.f32 %v3354_v55, %v3353_v59 }
 0x11d   : > { %v3390_v63 = vpop.f32.mrb[4].mxu1 }
 0x11e   : > { %v3391_v62 = vpop.f32.mrb[5].mxu1 }
 0x11f   : > { %v3392_v1 = vadd.f32 %v3391_v62, %v3390_v63  ;;  %v3393_v2 = vpop.f32.mrb[6].mxu1 }
 0x120   : > { %v3394_v3 = vpop.f32.mrb[7].mxu1 }
 0x121   : > { %v2588_v6 = vadd.f32 %v3392_v1, %v3352_v0  ;;  %v3395_v61 = vadd.f32 %v3394_v3, %v3393_v2 }
 0x123   : > { %v2591_v4 = vadd.f32 %v3395_v61, %v3355_v60 }
 0x125   : > { %v3356_v7 = vpop.f32.mrb[8].mxu0 }
 0x126   : > { %v3357_v8 = vpop.f32.mrb[9].mxu0 }
 0x127   : > { %v3358_v9 = vadd.f32 %v3357_v8, %v3356_v7  ;;  %v3359_v10 = vpop.f32.mrb[10].mxu0 }
 0x128   : > { %v3360_v52 = vpop.f32.mrb[11].mxu0 }
 0x129   : > { %v3361_v13 = vadd.f32 %v3360_v52, %v3359_v10 }
 0x12f   : > { %v3396_v11 = vpop.f32.mrb[8].mxu1 }
 0x130   : > { %v3397_v56 = vpop.f32.mrb[9].mxu1 }
 0x131   : > { %v3398_v14 = vadd.f32 %v3397_v56, %v3396_v11  ;;  %v3399_v15 = vpop.f32.mrb[10].mxu1 }
 0x132   : > { %v3400_v16 = vpop.f32.mrb[11].mxu1 }
 0x133   : > { %v2596_v17 = vadd.f32 %v3398_v14, %v3358_v9  ;;  %v3401_v18 = vadd.f32 %v3400_v16, %v3399_v15 }
 0x135   : > { %v2599_v19 = vadd.f32 %v3401_v18, %v3361_v13 }
 0x13b   : > { %v3362_v20 = vpop.f32.mrb[12].mxu0 }
 0x13c   : > { %v3363_v12 = vpop.f32.mrb[13].mxu0 }
 0x13d   : > { %v3364_v21 = vadd.f32 %v3363_v12, %v3362_v20  ;;  %v3365_v22 = vpop.f32.mrb[14].mxu0 }
 0x13e   : > { %v3366_v23 = vpop.f32.mrb[15].mxu0 }
 0x13f   : > { %v3367_v24 = vadd.f32 %v3366_v23, %v3365_v22 }
 0x143   : > { %v3402_v25 = vpop.f32.mrb[12].mxu1 }
 0x144   : > { %v3403_v26 = vpop.f32.mrb[13].mxu1 }
 0x145   : > { %v3404_v27 = vadd.f32 %v3403_v26, %v3402_v25  ;;  %v3405_v28 = vpop.f32.mrb[14].mxu1 }
 0x146   : > { %v3406_v29 = vpop.f32.mrb[15].mxu1  ;;  %v3424_v36 = vpop.f32.mrb[16].mxu0 }
 0x147   : > { %v2604_v30 = vadd.f32 %v3404_v27, %v3364_v21  ;;  %v3407_v34 = vadd.f32 %v3406_v29, %v3405_v28  ;;  %v3425_v32 = vpop.f32.mrb[17].mxu0 }
 0x148   : > { %v3426_v37 = vadd.f32 %v3425_v32, %v3424_v36  ;;  %v3427_v38 = vpop.f32.mrb[18].mxu0 }
 0x149   : > { %v2607_v35 = vadd.f32 %v3407_v34, %v3367_v24  ;;  %v3428_v40 = vpop.f32.mrb[19].mxu0 }
 0x14a   : > { %v2645_v42 = vadd.f32 %v3426_v37, %v2580_v51  ;;  %v3429_v41 = vadd.f32 %v3428_v40, %v3427_v38 }
 0x14b   : > { %v3464_v39 = vpop.f32.mrb[16].mxu1 }
 0x14c   : > { %v3465_v5 = vpop.f32.mrb[17].mxu1  ;;  %v2648_v46 = vadd.f32 %v3429_v41, %v2583_v54 }
 0x14d   : > { %v3466_v43 = vadd.f32 %v3465_v5, %v3464_v39  ;;  %v3467_v44 = vpop.f32.mrb[18].mxu1 }
 0x14e   : > { %v3468_v45 = vpop.f32.mrb[19].mxu1 }
 0x14f   : > { %v3469_v47 = vadd.f32 %v3468_v45, %v3467_v44  ;;  %v2710_v48 = vadd.f32 %v3466_v43, %v2645_v42 }
 0x150   : > { %v3430_v31 = vpop.f32.mrb[20].mxu0 }
 0x151   : > { %v2713_v33 = vadd.f32 %v3469_v47, %v2648_v46  ;;  %v3431_v49 = vpop.f32.mrb[21].mxu0 }
 0x152   : > { %v3432_v50 = vadd.f32 %v3431_v49, %v3430_v31  ;;  %v3433_v53 = vpop.f32.mrb[22].mxu0 }
 0x153   : > { %v3470_v57 = vpop.f32.mrb[20].mxu1  ;;  %v3434_v58 = vpop.f32.mrb[23].mxu0 }
 0x154   : > { %v2653_v0 = vadd.f32 %v3432_v50, %v2588_v6  ;;  %v3435_v59 = vadd.f32 %v3434_v58, %v3433_v53  ;;  %v3471_v55 = vpop.f32.mrb[21].mxu1 }
 0x155   : > { %v3472_v60 = vadd.f32 %v3471_v55, %v3470_v57  ;;  %v3473_v63 = vpop.f32.mrb[22].mxu1 }
 0x156   : > { %v2656_v51 = vadd.f32 %v3435_v59, %v2591_v4  ;;  %v3474_v62 = vpop.f32.mrb[23].mxu1 }
 0x157   : > { %v3475_v1 = vadd.f32 %v3474_v62, %v3473_v63  ;;  %v2718_v2 = vadd.f32 %v3472_v60, %v2653_v0 }
 0x159   : > { %v2721_v3 = vadd.f32 %v3475_v1, %v2656_v51 }
 0x15a   : > { %v3436_v54 = vpop.f32.mrb[24].mxu0 }
 0x15b   : > { %v3437_v61 = vpop.f32.mrb[25].mxu0 }
 0x15c   : > { %v3438_v7 = vadd.f32 %v3437_v61, %v3436_v54  ;;  %v3439_v8 = vpop.f32.mrb[26].mxu0 }
 0x15d   : > { %v3440_v9 = vpop.f32.mrb[27].mxu0  ;;  %v3476_v52 = vpop.f32.mrb[24].mxu1 }
 0x15e   : > { %v2661_v10 = vadd.f32 %v3438_v7, %v2596_v17  ;;  %v3441_v13 = vadd.f32 %v3440_v9, %v3439_v8  ;;  %v3477_v11 = vpop.f32.mrb[25].mxu1 }
 0x15f   : > { %v3478_v6 = vadd.f32 %v3477_v11, %v3476_v52  ;;  %v3479_v14 = vpop.f32.mrb[26].mxu1 }
 0x160   : > { %v2664_v56 = vadd.f32 %v3441_v13, %v2599_v19  ;;  %v3480_v15 = vpop.f32.mrb[27].mxu1 }
 0x161   : > { %v3481_v16 = vadd.f32 %v3480_v15, %v3479_v14  ;;  %v2726_v18 = vadd.f32 %v3478_v6, %v2661_v10 }
 0x163   : > { %v2729_v4 = vadd.f32 %v3481_v16, %v2664_v56 }
 0x16a   : > { %v3442_v20 = vpop.f32.mrb[28].mxu0 }
 0x16b   : > { %v3482_v12 = vpop.f32.mrb[28].mxu1  ;;  %v3443_v21 = vpop.f32.mrb[29].mxu0 }
 0x16c   : > { %v3483_v22 = vpop.f32.mrb[29].mxu1  ;;  %v3444_v23 = vadd.f32 %v3443_v21, %v3442_v20  ;;  %v3445_v24 = vpop.f32.mrb[30].mxu0 }
 0x16d   : > { %v3484_v25 = vadd.f32 %v3483_v22, %v3482_v12  ;;  %v3485_v26 = vpop.f32.mrb[30].mxu1  ;;  %v3446_v17 = vpop.f32.mrb[31].mxu0 }
 0x16e   : > { %v3486_v27 = vpop.f32.mrb[31].mxu1  ;;  %v2669_v28 = vadd.f32 %v3444_v23, %v2604_v30  ;;  %v3447_v29 = vadd.f32 %v3446_v17, %v3445_v24 }
 0x16f   : > { %v3487_v19 = vadd.f32 %v3486_v27, %v3485_v26 }
 0x170   : > { %v2672_v34 = vadd.f32 %v3447_v29, %v2607_v35  ;;  %v2734_v36 = vadd.f32 %v3484_v25, %v2669_v28 }
 0x172   : > { %v2737_v32 = vadd.f32 %v3487_v19, %v2672_v34  ;;  %v3518_v37 = vpop.f32.mrb[32].mxu0 }
 0x173   : > { %v2783_v38 = vadd.f32 %v3518_v37, %v2718_v2  ;;  %v2774_v39 = vpop.f32.mrb[33].mxu0 }
 0x174   : > { %v2775_v40 = vadd.f32 %v2774_v39, %v2710_v48  ;;  %v3519_v5 = vpop.f32.mrb[34].mxu0 }
 0x175   : > { %v2786_v42 = vadd.f32 %v3519_v5, %v2721_v3  ;;  %v2777_v41 = vpop.f32.mrb[35].mxu0  ;;  %v2837_v47 = vmul.f32 %v2783_v38, %v2783_v38 }
 0x176   : > { %v2778_v30 = vadd.f32 %v2777_v41, %v2713_v33  ;;  %v2835_v35 = vmul.f32 %v2775_v40, %v2775_v40 }
 0x177   : > { %v3310_v43 = vpack.c.bf16 %v2786_v42, %v2783_v38  ;;  %v2838_v49 = vmul.f32 %v2786_v42, %v2786_v42 }
 0x178   : > { %v3305_v44 = vpack.c.bf16 %v2778_v30, %v2775_v40  ;;  %v2821_v45 = vadd.f32 %v2778_v30, %v2775_v40  ;;  %v2836_v46 = vmul.f32 %v2778_v30, %v2778_v30 }
 0x179   : > { %3325 = vst [vmem:[%s4309_s9 + $0x8] sm:$0xff] %v3310_v43  }
 0x17a   : > { %3306 = vst [vmem:[%s4309_s9] sm:$0xff] %v3305_v44   ;;  %v2822_v48 = vadd.f32 %v2821_v45, %v2783_v38  ;;  %v2843_v31 = vadd.f32 %v2836_v46, %v2835_v35 }
 0x17c   : > { %v2844_v50 = vadd.f32 %v2843_v31, %v2837_v47  ;;  %v2823_v53 = vadd.f32 %v2822_v48, %v2786_v42 }
 0x17e   : > { %v2845_v57 = vadd.f32 %v2844_v50, %v2838_v49 }
 0x182   : > { %v3522_v58 = vpop.f32.mrb[32].mxu1 }
 0x183   : > { %v2799_v0 = vadd.f32 %v3522_v58, %v2734_v36  ;;  %v2790_v59 = vpop.f32.mrb[33].mxu1 }
 0x184   : > { %v2791_v33 = vadd.f32 %v2790_v59, %v2726_v18  ;;  %v3523_v55 = vpop.f32.mrb[34].mxu1 }
 0x185   : > { %v2802_v60 = vadd.f32 %v3523_v55, %v2737_v32  ;;  %v2793_v63 = vpop.f32.mrb[35].mxu1  ;;  %v2841_v8 = vmul.f32 %v2799_v0, %v2799_v0 }
 0x186   : > { %v2824_v51 = vadd.f32 %v2823_v53, %v2791_v33  ;;  %v2839_v62 = vmul.f32 %v2791_v33, %v2791_v33  ;;  %v2794_v1 = vadd.f32 %v2793_v63, %v2729_v4 }
 0x187   : > { %v3320_v2 = vpack.c.bf16 %v2802_v60, %v2799_v0  ;;  %v2842_v52 = vmul.f32 %v2802_v60, %v2802_v60 }
 0x188   : > { %v2846_v3 = vadd.f32 %v2845_v57, %v2839_v62  ;;  %v3315_v54 = vpack.c.bf16 %v2794_v1, %v2791_v33  ;;  %v2825_v61 = vadd.f32 %v2824_v51, %v2794_v1  ;;  %v2840_v7 = vmul.f32 %v2794_v1, %v2794_v1 }
 0x189   : > { %3327 = vst [vmem:[%s4309_s9 + $0x18] sm:$0xff] %v3320_v2  }
 0x18a   : > { %3326 = vst [vmem:[%s4309_s9 + $0x10] sm:$0xff] %v3315_v54   ;;  %v2826_v9 = vadd.f32 %v2825_v61, %v2799_v0  ;;  %v2847_v10 = vadd.f32 %v2846_v3, %v2840_v7 }
 0x18c   : > { %v2827_v13 = vadd.f32 %v2826_v9, %v2802_v60  ;;  %v2848_v11 = vadd.f32 %v2847_v10, %v2841_v8 }
 0x18e   : > { %v2828_v56 = vrot.slane %v2827_v13, 4  ;;  %v2849_v6 = vadd.f32 %v2848_v11, %v2842_v52 }
 0x190   : > { %v2829_v14 = vadd.f32 %v2828_v56, %v2827_v13  ;;  %v2850_v15 = vrot.slane %v2849_v6, 4 }
 0x192   : > { %v2830_v16 = vrot.slane %v2829_v14, 2  ;;  %v2851_v18 = vadd.f32 %v2850_v15, %v2849_v6 }
 0x194   : > { %v2831_v4 = vadd.f32 %v2830_v16, %v2829_v14  ;;  %v2852_v20 = vrot.slane %v2851_v18, 2 }
 0x196   : > { %v2832_v12 = vrot.slane %v2831_v4, 1  ;;  %v2853_v21 = vadd.f32 %v2852_v20, %v2851_v18 }
 0x198   : > { %v2833_v22 = vadd.f32 %v2832_v12, %v2831_v4  ;;  %v2854_v23 = vrot.slane %v2853_v21, 1 }
 0x19a   : > { %2834 = vst [vmem:[%s483_s11] sm:$0x1] %v2833_v22  ;;  %v2855_v24 = vadd.f32 %v2854_v23, %v2853_v21 }
 0x19c   : > { %2856 = vst [vmem:[%s488_s14] sm:$0x1] %v2855_v24 }
 0x19d PF: > { %s19_s27 = sadd.s32 1, %s3767_s27   ;;  %s4349_s26 = smov %s3763_s2 }
 0x19e   : > { %p16_p5 = scmp.ge.s32.totalorder %s19_s27, 4   ;;  %s4350_s2 = smov %s4352_s28 }
 0x1a0   :  { %18 = sbr.rel (!%p16_p5) target bundleno = 2 (0x2), region = 107 }

// kernel: resnet_block_forward.3
= control target key start
LH: loop header
LB: loop body
LE: loop exit
PB: predicated region body
PF: predicated region fallthrough
CT: control target
= control target key end

     0   :  { %s3740_s21 = smov 0   ;;  %s3742_s22 = smov 0   ;;  %s4456_s0 = inlined_call_operand.vmem [shape: bf16[2,4,9,9,128], index: 0, kind: input, shape index: {}, may-alias: {0,1,2}]   ;;  %s4457_s1 = inlined_call_operand.vmem [shape: bf16[2,4,9,9,128], index: 1, kind: input, shape index: {}, may-alias: {0,1,2}]   ;;  %s4458_s2 = inlined_call_operand.vmem [shape: bf16[2,4,9,9,128], index: 2, kind: input, shape index: {}, may-alias: {0,1,2}]   ;;  %s4459_s3 = inlined_call_operand.vmem [shape: bf16[1152,128], index: 3, kind: input, shape index: {}]   ;;  %s4460_s4 = inlined_call_operand.vmem [shape: bf16[2,8,8,128], index: 4, kind: output, shape index: {0}]   ;;  %s4461_s5 = inlined_call_operand.vmem [shape: f32[2,1,128], index: 5, kind: output, shape index: {1}]   ;;  %s4462_s6 = inlined_call_operand.vmem [shape: f32[2,1,128], index: 6, kind: output, shape index: {2}]  }
   0x1   :  { %s3744_s23 = smov 0   ;;  %s3746_s24 = smov 0  }
   0x2   :  { %s3748_s25 = smov 0  }
   0x3 LB: > { %s29_s26 = sadd.s32 1, %s3695_s24  ;;  %p45_p1 = scmp.ne.s32.totalorder %s3687_s22, %s3683_s21  ;;  %s3699_s25 = sphi %s3748_s25, %s17_s25   ;;  %s3695_s24 = sphi %s3746_s24, %s4471_s24   ;;  %s3691_s23 = sphi %s3744_s23, %s4470_s23   ;;  %s3687_s22 = sphi %s3742_s22, %s4469_s22   ;;  %s3683_s21 = sphi %s3740_s21, %s4468_s21  }
   0x4   : > { %p31_p0 = scmp.ge.s32.totalorder %s29_s26, 2  ;;  %p46_p2 = scmp.eq.s32.totalorder %s3699_s25, 0 }
   0x5   : > { %s38_s29 = sadd.s32 1, %s3687_s22  ;;  %p3101_p5 = scmp.ge.s32.totalorder %s3699_s25, 2 }
   0x6   : > { %s4473_s26 = smov (%p31_p0, %s29_s26), 0  ;;  %p3771_p3 = por %p46_p2, %p45_p1 }
   0x7   : > { %s33_s28 = ssub.s32 %s3695_s24, %s4473_s26  ;;  %251 = sbr.rel (%p3101_p5) target bundleno = 88 (0x58), region = 20 }
   0x8   : > { %p36_p4 = scmp.eq.s32.totalorder %s33_s28, 0 }
   0xa   : > { %s3779_s30 = scalar_select %p36_p4, %s3687_s22, %s38_s29  }
   0xe   : > { %254 = sbr.rel (!%p3771_p3) target bundleno = 72 (0x48), region = 24  ;;  %s256_s7 = sand.u32 (%p3771_p3), 1, %s3687_s22  }
   0xf   : > { %s3472_s8 = smul.u32 (%p3771_p3), 288, %s3695_s24  ;;  %s3102_s9 = sshll.u32 (%p3771_p3), %s256_s7, 8 }
  0x10   : > { %s3791_s13 = scalar_lea.vmem (%p3771_p3), [#allocation4], %s3102_s9   ;;  %s3793_s14 = smov (%p3771_p3), 0  }
  0x11   : > { %s3789_s12 = scalar_lea.vmem (%p3771_p3), %s4456_s0, %s3472_s8  }
  0x15 LB: >> { %v290_v0 = vld [vmem:[%s3789_s12] sm:$0xf]  ;;  %v292_v1 = vld [vmem:[%s3789_s12 + $0x4] sm:$0xf]  ;;  %v294_v2 = vld [vmem:[%s3789_s12 + $0x8] sm:$0xf]  ;;  %s3703_s14 = sphi %s3793_s14, %s284_s14  }
  0x16   : >> { %291 = vst [vmem:[%s3791_s13] sm:$0xf] %v290_v0  ;;  %293 = vst [vmem:[%s3791_s13 + $0x4] sm:$0xf] %v292_v1  ;;  %v296_v3 = vld [vmem:[%s3789_s12 + $0xc] sm:$0xf]  ;;  %s284_s14 = sadd.s32 1, %s3703_s14  }
  0x17   : >> { %295 = vst [vmem:[%s3791_s13 + $0x8] sm:$0xf] %v294_v2  ;;  %v298_v4 = vld [vmem:[%s3789_s12 + $0x10] sm:$0xf]  ;;  %v300_v5 = vld [vmem:[%s3789_s12 + $0x14] sm:$0xf] }
  0x18   : >> { %297 = vst [vmem:[%s3791_s13 + $0xc] sm:$0xf] %v296_v3  ;;  %299 = vst [vmem:[%s3791_s13 + $0x10] sm:$0xf] %v298_v4  ;;  %v302_v6 = vld [vmem:[%s3789_s12 + $0x18] sm:$0xf] }
  0x19   : >> { %301 = vst [vmem:[%s3791_s13 + $0x14] sm:$0xf] %v300_v5  ;;  %v304_v7 = vld [vmem:[%s3789_s12 + $0x1c] sm:$0xf]  ;;  %v306_v8 = vld [vmem:[%s3789_s12 + $0x20] sm:$0xf] }
  0x1a   : >> { %303 = vst [vmem:[%s3791_s13 + $0x18] sm:$0xf] %v302_v6  ;;  %305 = vst [vmem:[%s3791_s13 + $0x1c] sm:$0xf] %v304_v7  ;;  %v308_v9 = vld [vmem:[%s3789_s12 + $0x24] sm:$0xf] }
  0x1b   : >> { %307 = vst [vmem:[%s3791_s13 + $0x20] sm:$0xf] %v306_v8  ;;  %v310_v10 = vld [vmem:[%s3789_s12 + $0x28] sm:$0xf]  ;;  %v312_v11 = vld [vmem:[%s3789_s12 + $0x2c] sm:$0xf] }
  0x1c   : >> { %309 = vst [vmem:[%s3791_s13 + $0x24] sm:$0xf] %v308_v9  ;;  %311 = vst [vmem:[%s3791_s13 + $0x28] sm:$0xf] %v310_v10  ;;  %v314_v12 = vld [vmem:[%s3789_s12 + $0x30] sm:$0xf] }
  0x1d   : >> { %313 = vst [vmem:[%s3791_s13 + $0x2c] sm:$0xf] %v312_v11  ;;  %v316_v13 = vld [vmem:[%s3789_s12 + $0x34] sm:$0xf]  ;;  %v318_v14 = vld [vmem:[%s3789_s12 + $0x38] sm:$0xf] }
  0x1e   : >> { %315 = vst [vmem:[%s3791_s13 + $0x30] sm:$0xf] %v314_v12  ;;  %317 = vst [vmem:[%s3791_s13 + $0x34] sm:$0xf] %v316_v13  ;;  %v320_v15 = vld [vmem:[%s3789_s12 + $0x3c] sm:$0xf] }
  0x1f   : >> { %319 = vst [vmem:[%s3791_s13 + $0x38] sm:$0xf] %v318_v14  ;;  %v322_v16 = vld [vmem:[%s3789_s12 + $0x48] sm:$0xf]  ;;  %v324_v17 = vld [vmem:[%s3789_s12 + $0x4c] sm:$0xf] }
  0x20   : >> { %321 = vst [vmem:[%s3791_s13 + $0x3c] sm:$0xf] %v320_v15  ;;  %323 = vst [vmem:[%s3791_s13 + $0x40] sm:$0xf] %v322_v16  ;;  %v326_v18 = vld [vmem:[%s3789_s12 + $0x50] sm:$0xf] }
  0x21   : >> { %325 = vst [vmem:[%s3791_s13 + $0x44] sm:$0xf] %v324_v17  ;;  %v328_v19 = vld [vmem:[%s3789_s12 + $0x54] sm:$0xf]  ;;  %v330_v20 = vld [vmem:[%s3789_s12 + $0x58] sm:$0xf] }
  0x22   : >> { %327 = vst [vmem:[%s3791_s13 + $0x48] sm:$0xf] %v326_v18  ;;  %329 = vst [vmem:[%s3791_s13 + $0x4c] sm:$0xf] %v328_v19  ;;  %v332_v21 = vld [vmem:[%s3789_s12 + $0x5c] sm:$0xf] }
  0x23   : >> { %331 = vst [vmem:[%s3791_s13 + $0x50] sm:$0xf] %v330_v20  ;;  %v334_v22 = vld [vmem:[%s3789_s12 + $0x60] sm:$0xf]  ;;  %v336_v23 = vld [vmem:[%s3789_s12 + $0x64] sm:$0xf] }
  0x24   : >> { %333 = vst [vmem:[%s3791_s13 + $0x54] sm:$0xf] %v332_v21  ;;  %335 = vst [vmem:[%s3791_s13 + $0x58] sm:$0xf] %v334_v22  ;;  %v338_v24 = vld [vmem:[%s3789_s12 + $0x68] sm:$0xf] }
  0x25   : >> { %337 = vst [vmem:[%s3791_s13 + $0x5c] sm:$0xf] %v336_v23  ;;  %v340_v25 = vld [vmem:[%s3789_s12 + $0x6c] sm:$0xf]  ;;  %v342_v26 = vld [vmem:[%s3789_s12 + $0x70] sm:$0xf] }
  0x26   : >> { %339 = vst [vmem:[%s3791_s13 + $0x60] sm:$0xf] %v338_v24  ;;  %341 = vst [vmem:[%s3791_s13 + $0x64] sm:$0xf] %v340_v25  ;;  %v344_v27 = vld [vmem:[%s3789_s12 + $0x74] sm:$0xf] }
  0x27   : >> { %343 = vst [vmem:[%s3791_s13 + $0x68] sm:$0xf] %v342_v26  ;;  %v346_v28 = vld [vmem:[%s3789_s12 + $0x78] sm:$0xf]  ;;  %v348_v29 = vld [vmem:[%s3789_s12 + $0x7c] sm:$0xf] }
  0x28   : >> { %345 = vst [vmem:[%s3791_s13 + $0x6c] sm:$0xf] %v344_v27  ;;  %347 = vst [vmem:[%s3791_s13 + $0x70] sm:$0xf] %v346_v28  ;;  %v350_v30 = vld [vmem:[%s3789_s12 + $0x80] sm:$0xf] }
  0x29   : >> { %349 = vst [vmem:[%s3791_s13 + $0x74] sm:$0xf] %v348_v29  ;;  %v352_v31 = vld [vmem:[%s3789_s12 + $0x84] sm:$0xf]  ;;  %v354_v32 = vld [vmem:[%s3789_s12 + $0x90] sm:$0xf] }
  0x2a   : >> { %351 = vst [vmem:[%s3791_s13 + $0x78] sm:$0xf] %v350_v30  ;;  %353 = vst [vmem:[%s3791_s13 + $0x7c] sm:$0xf] %v352_v31  ;;  %v356_v33 = vld [vmem:[%s3789_s12 + $0x94] sm:$0xf] }
  0x2b   : >> { %355 = vst [vmem:[%s3791_s13 + $0x80] sm:$0xf] %v354_v32  ;;  %v358_v34 = vld [vmem:[%s3789_s12 + $0x98] sm:$0xf]  ;;  %v360_v35 = vld [vmem:[%s3789_s12 + $0x9c] sm:$0xf] }
  0x2c   : >> { %357 = vst [vmem:[%s3791_s13 + $0x84] sm:$0xf] %v356_v33  ;;  %359 = vst [vmem:[%s3791_s13 + $0x88] sm:$0xf] %v358_v34  ;;  %v362_v36 = vld [vmem:[%s3789_s12 + $0xa0] sm:$0xf] }
  0x2d   : >> { %361 = vst [vmem:[%s3791_s13 + $0x8c] sm:$0xf] %v360_v35  ;;  %v364_v37 = vld [vmem:[%s3789_s12 + $0xa4] sm:$0xf]  ;;  %v366_v38 = vld [vmem:[%s3789_s12 + $0xa8] sm:$0xf] }
  0x2e   : >> { %363 = vst [vmem:[%s3791_s13 + $0x90] sm:$0xf] %v362_v36  ;;  %365 = vst [vmem:[%s3791_s13 + $0x94] sm:$0xf] %v364_v37  ;;  %v368_v39 = vld [vmem:[%s3789_s12 + $0xac] sm:$0xf] }
  0x2f   : >> { %367 = vst [vmem:[%s3791_s13 + $0x98] sm:$0xf] %v366_v38  ;;  %v370_v40 = vld [vmem:[%s3789_s12 + $0xb0] sm:$0xf]  ;;  %v372_v41 = vld [vmem:[%s3789_s12 + $0xb4] sm:$0xf] }
  0x30   : >> { %369 = vst [vmem:[%s3791_s13 + $0x9c] sm:$0xf] %v368_v39  ;;  %371 = vst [vmem:[%s3791_s13 + $0xa0] sm:$0xf] %v370_v40  ;;  %v374_v42 = vld [vmem:[%s3789_s12 + $0xb8] sm:$0xf] }
  0x31   : >> { %373 = vst [vmem:[%s3791_s13 + $0xa4] sm:$0xf] %v372_v41  ;;  %v376_v43 = vld [vmem:[%s3789_s12 + $0xbc] sm:$0xf]  ;;  %v378_v44 = vld [vmem:[%s3789_s12 + $0xc0] sm:$0xf] }
  0x32   : >> { %375 = vst [vmem:[%s3791_s13 + $0xa8] sm:$0xf] %v374_v42  ;;  %377 = vst [vmem:[%s3791_s13 + $0xac] sm:$0xf] %v376_v43  ;;  %v380_v45 = vld [vmem:[%s3789_s12 + $0xc4] sm:$0xf] }
  0x33   : >> { %379 = vst [vmem:[%s3791_s13 + $0xb0] sm:$0xf] %v378_v44  ;;  %v382_v46 = vld [vmem:[%s3789_s12 + $0xc8] sm:$0xf]  ;;  %v384_v47 = vld [vmem:[%s3789_s12 + $0xcc] sm:$0xf] }
  0x34   : >> { %381 = vst [vmem:[%s3791_s13 + $0xb4] sm:$0xf] %v380_v45  ;;  %383 = vst [vmem:[%s3791_s13 + $0xb8] sm:$0xf] %v382_v46  ;;  %v386_v48 = vld [vmem:[%s3789_s12 + $0xd8] sm:$0xf] }
  0x35   : >> { %385 = vst [vmem:[%s3791_s13 + $0xbc] sm:$0xf] %v384_v47  ;;  %v388_v49 = vld [vmem:[%s3789_s12 + $0xdc] sm:$0xf]  ;;  %v390_v50 = vld [vmem:[%s3789_s12 + $0xe0] sm:$0xf] }
  0x36   : >> { %387 = vst [vmem:[%s3791_s13 + $0xc0] sm:$0xf] %v386_v48  ;;  %389 = vst [vmem:[%s3791_s13 + $0xc4] sm:$0xf] %v388_v49  ;;  %v392_v51 = vld [vmem:[%s3789_s12 + $0xe4] sm:$0xf] }
  0x37   : >> { %391 = vst [vmem:[%s3791_s13 + $0xc8] sm:$0xf] %v390_v50  ;;  %v394_v52 = vld [vmem:[%s3789_s12 + $0xe8] sm:$0xf]  ;;  %v396_v53 = vld [vmem:[%s3789_s12 + $0xec] sm:$0xf] }
  0x38   : >> { %393 = vst [vmem:[%s3791_s13 + $0xcc] sm:$0xf] %v392_v51  ;;  %395 = vst [vmem:[%s3791_s13 + $0xd0] sm:$0xf] %v394_v52  ;;  %v398_v54 = vld [vmem:[%s3789_s12 + $0xf0] sm:$0xf] }
  0x39   : >> { %397 = vst [vmem:[%s3791_s13 + $0xd4] sm:$0xf] %v396_v53  ;;  %v400_v55 = vld [vmem:[%s3789_s12 + $0xf4] sm:$0xf]  ;;  %v402_v56 = vld [vmem:[%s3789_s12 + $0xf8] sm:$0xf] }
  0x3a   : >> { %399 = vst [vmem:[%s3791_s13 + $0xd8] sm:$0xf] %v398_v54  ;;  %401 = vst [vmem:[%s3791_s13 + $0xdc] sm:$0xf] %v400_v55  ;;  %v404_v57 = vld [vmem:[%s3789_s12 + $0xfc] sm:$0xf] }
  0x3b   : >> { %403 = vst [vmem:[%s3791_s13 + $0xe0] sm:$0xf] %v402_v56  ;;  %v406_v58 = vld [vmem:[%s3789_s12 + $0x100] sm:$0xf]  ;;  %v408_v59 = vld [vmem:[%s3789_s12 + $0x104] sm:$0xf] }
  0x3c   : >> { %405 = vst [vmem:[%s3791_s13 + $0xe4] sm:$0xf] %v404_v57  ;;  %407 = vst [vmem:[%s3791_s13 + $0xe8] sm:$0xf] %v406_v58  ;;  %v410_v60 = vld [vmem:[%s3789_s12 + $0x108] sm:$0xf] }
  0x3d   : >> { %409 = vst [vmem:[%s3791_s13 + $0xec] sm:$0xf] %v408_v59  ;;  %v412_v61 = vld [vmem:[%s3789_s12 + $0x10c] sm:$0xf]  ;;  %v414_v62 = vld [vmem:[%s3789_s12 + $0x110] sm:$0xf] }
  0x3e   : >> { %411 = vst [vmem:[%s3791_s13 + $0xf0] sm:$0xf] %v410_v60  ;;  %413 = vst [vmem:[%s3791_s13 + $0xf4] sm:$0xf] %v412_v61  ;;  %v416_v63 = vld [vmem:[%s3789_s12 + $0x114] sm:$0xf] }
  0x3f   : >> { %415 = vst [vmem:[%s3791_s13 + $0xf8] sm:$0xf] %v414_v62  ;;  %417 = vst [vmem:[%s3791_s13 + $0xfc] sm:$0xf] %v416_v63  ;;  %p283_p6 = scmp.ge.s32.totalorder %s284_s14, 1 }
  0x41   : > { %286 = sbr.rel (!%p283_p6) target bundleno = 21 (0x15), region = 276 }
  0x48 PF: > { %678 = sbr.rel (!%p3771_p3) target bundleno = 80 (0x50), region = 86  ;;  %s680_s15 = sand.u32 (%p3771_p3), 1, %s3687_s22  }
  0x49   : > { %s3112_s16 = sshll.u32 (%p3771_p3), %s680_s15, 5  ;;  %s3475_s17 = smul.u32 (%p3771_p3), 288, %s3695_s24 }
  0x4a   : > { %s682_s29 = scalar_lea.vmem (%p3771_p3), [#allocation5], %s3112_s16 }
  0x4b   : > { %s3233_s18 = sadd.s32 (%p3771_p3), 64, %s3475_s17 }
  0x4c   : > { %s691_s28 = scalar_lea.vmem (%p3771_p3), %s4457_s1, %s3233_s18 }
  0x4d   : > { %v707_v0 = vld [vmem:[%s691_s28] sm:$0xff] (%p3771_p3)   ;;  %v711_v1 = vld [vmem:[%s691_s28 + $0x48] sm:$0xff] (%p3771_p3)   ;;  %v715_v2 = vld [vmem:[%s691_s28 + $0x90] sm:$0xff] (%p3771_p3)  }
  0x4e   : > { %708 = vst [vmem:[%s682_s29] sm:$0xff] (%p3771_p3), %v707_v0   ;;  %712 = vst [vmem:[%s682_s29 + $0x8] sm:$0xff] (%p3771_p3), %v711_v1   ;;  %v719_v3 = vld [vmem:[%s691_s28 + $0xd8] sm:$0xff] (%p3771_p3)  }
  0x4f   : > { %716 = vst [vmem:[%s682_s29 + $0x10] sm:$0xff] %v715_v2   ;;  %720 = vst [vmem:[%s682_s29 + $0x18] sm:$0xff] %v719_v3  }
  0x50 PF: > { %761 = sbr.rel (!%p3771_p3) target bundleno = 88 (0x58), region = 127  ;;  %s763_s7 = sand.u32 (%p3771_p3), 1, %s3687_s22  }
  0x51   : > { %s3114_s8 = sshll.u32 (%p3771_p3), %s763_s7, 5  ;;  %s3476_s9 = smul.u32 (%p3771_p3), 288, %s3695_s24 }
  0x52   : > { %s765_s14 = scalar_lea.vmem (%p3771_p3), [#allocation6], %s3114_s8 }
  0x53   : > { %s3235_s10 = sadd.s32 (%p3771_p3), 64, %s3476_s9 }
  0x54   : > { %s774_s13 = scalar_lea.vmem (%p3771_p3), %s4458_s2, %s3235_s10 }
  0x55   : > { %v790_v4 = vld [vmem:[%s774_s13] sm:$0xff] (%p3771_p3)   ;;  %v794_v5 = vld [vmem:[%s774_s13 + $0x48] sm:$0xff] (%p3771_p3)   ;;  %v798_v6 = vld [vmem:[%s774_s13 + $0x90] sm:$0xff] (%p3771_p3)  }
  0x56   : > { %791 = vst [vmem:[%s765_s14] sm:$0xff] (%p3771_p3), %v790_v4   ;;  %795 = vst [vmem:[%s765_s14 + $0x8] sm:$0xff] (%p3771_p3), %v794_v5   ;;  %v802_v7 = vld [vmem:[%s774_s13 + $0xd8] sm:$0xff] (%p3771_p3)  }
  0x57   : > { %799 = vst [vmem:[%s765_s14 + $0x10] sm:$0xff] %v798_v6   ;;  %803 = vst [vmem:[%s765_s14 + $0x18] sm:$0xff] %v802_v7  }
  0x58 PF: > { %p3116_p7 = scmp.ge.s32.totalorder %s3699_s25, 1  ;;  %p843_p8 = scmp.lt.s32.totalorder %s3699_s25, 3 }
  0x5a   : > { %p844_p9 = pnand %p3116_p7, %p843_p8 }
  0x5b   : > { %v3549_v8 = vld [vmem:[%s4459_s3 + $0x40] sm:$0xff] (!%p844_p9)   ;;  %v3553_v12 = vld [vmem:[%s4459_s3 + $0x48] sm:$0xff] (!%p844_p9)   ;;  %v3557_v16 = vld [vmem:[%s4459_s3 + $0x50] sm:$0xff] (!%p844_p9)   ;;  %s850_s14 = sand.u32 (!%p844_p9), 1, %s3683_s21   ;;  %vm1013_vm0 = vcmask (!%p844_p9), 1040384   ;;  %p928_p10 = scmp.lt.s32.totalorder (!%p844_p9), %s3691_s23, 1 }
  0x5c   : > { %847 = sbr.rel (%p844_p9) target bundleno = 476 (0x1dc), region = 168  ;;  %v3550_v9 = vld [vmem:[%s4459_s3 + $0xc0] sm:$0xff] (!%p844_p9)   ;;  %3260 = vmatprep.subr.bf16.mxu0 (!%p844_p9), %v3549_v8  ;;  %v3554_v13 = vld [vmem:[%s4459_s3 + $0xc8] sm:$0xff] (!%p844_p9)   ;;  %v3558_v17 = vld [vmem:[%s4459_s3 + $0xd0] sm:$0xff] (!%p844_p9)   ;;  %s3117_s20 = sshll.u32 (!%p844_p9), %s850_s14, 8 }
  0x5d   : > { %v3551_v10 = vld [vmem:[%s4459_s3] sm:$0xff] (!%p844_p9)   ;;  %3300 = vmatprep.subr.bf16.mxu1 (!%p844_p9), %v3550_v9  ;;  %v3555_v14 = vld [vmem:[%s4459_s3 + $0x8] sm:$0xff] (!%p844_p9)   ;;  %v3559_v18 = vld [vmem:[%s4459_s3 + $0x10] sm:$0xff] (!%p844_p9)   ;;  %s4044_s13 = scalar_lea.vmem (!%p844_p9), [#allocation4], %s3117_s20  ;;  %vm1014_vm1 = vsmask.f32 (!%p844_p9), 256 }
  0x5e   : > { %v3552_v11 = vld [vmem:[%s4459_s3 + $0x80] sm:$0xff] (!%p844_p9)   ;;  %3261 = vmatpush3.bf16.msra.mxu0 (!%p844_p9), %v3551_v10  ;;  %v3556_v15 = vld [vmem:[%s4459_s3 + $0x88] sm:$0xff] (!%p844_p9)   ;;  %v3560_v19 = vld [vmem:[%s4459_s3 + $0x90] sm:$0xff] (!%p844_p9)   ;;  %vm1282_vm3 = vsmask.f32 (!%p844_p9), 3328  ;;  %s4336_s15 = sshll.u32 (!%p844_p9), %s850_s14, 5 }
  0x5f   : > { %3301 = vmatpush3.bf16.msra.mxu1 (!%p844_p9), %v3552_v11  ;;  %3262 = vmatprep.subr.bf16.mxu0 (!%p844_p9), %v3553_v12  ;;  %v3561_v20 = vld [vmem:[%s4459_s3 + $0x58] sm:$0xff] (!%p844_p9)   ;;  %v3565_v24 = vld [vmem:[%s4459_s3 + $0x60] sm:$0xff] (!%p844_p9)   ;;  %v3569_v28 = vld [vmem:[%s4459_s3 + $0x68] sm:$0xff] (!%p844_p9)   ;;  %vm1283_vm4 = vsmask.f32 (!%p844_p9), 7440  ;;  %s4357_s21 = scalar_lea.vmem (!%p844_p9), [#allocation5], %s4336_s15 }
  0x60   : > { %3302 = vmatprep.subr.bf16.mxu1 (!%p844_p9), %v3554_v13  ;;  %v3562_v21 = vld [vmem:[%s4459_s3 + $0xd8] sm:$0xff] (!%p844_p9)   ;;  %v3566_v25 = vld [vmem:[%s4459_s3 + $0xe0] sm:$0xff] (!%p844_p9)   ;;  %v3570_v29 = vld [vmem:[%s4459_s3 + $0xe8] sm:$0xff] (!%p844_p9)   ;;  %s866_s19 = scalar_lea.vmem (!%p844_p9), [#allocation6], %s4336_s15 }
  0x61   : > { %v3563_v22 = vld [vmem:[%s4459_s3 + $0x18] sm:$0xff] (!%p844_p9)   ;;  %v3567_v26 = vld [vmem:[%s4459_s3 + $0x20] sm:$0xff] (!%p844_p9)   ;;  %v3571_v30 = vld [vmem:[%s4459_s3 + $0x28] sm:$0xff] (!%p844_p9)  }
  0x62   : > { %3263 = vmatpush3.bf16.msra.mxu0 (!%p844_p9), %v3555_v14  ;;  %v3564_v23 = vld [vmem:[%s4459_s3 + $0x98] sm:$0xff] (!%p844_p9)   ;;  %v3568_v27 = vld [vmem:[%s4459_s3 + $0xa0] sm:$0xff] (!%p844_p9)   ;;  %v3572_v31 = vld [vmem:[%s4459_s3 + $0xa8] sm:$0xff] (!%p844_p9)  }
  0x63   : > { %3303 = vmatpush3.bf16.msra.mxu1 %v3556_v15  ;;  %3264 = vmatprep.subr.bf16.mxu0 %v3557_v16  ;;  %v3573_v32 = vld [vmem:[%s4459_s3 + $0x70] sm:$0xff]   ;;  %v3577_v36 = vld [vmem:[%s4459_s3 + $0x78] sm:$0xff]   ;;  %v964_v40 = vld [vmem:[%s4044_s13 + $0x40] sm:$0xf]  ;;  %s4475_s23 = smov (!%p928_p10, %s3691_s23), 1 }
  0x64   : > { %3304 = vmatprep.subr.bf16.mxu1 %v3558_v17  ;;  %v3574_v33 = vld [vmem:[%s4459_s3 + $0xf0] sm:$0xff]   ;;  %v3578_v37 = vld [vmem:[%s4459_s3 + $0xf8] sm:$0xff]   ;;  %v966_v41 = vld [vmem:[%s4044_s13 + $0x48] sm:$0xf]  ;;  %1047 = vst [vmem:[#allocation2 + $0x50] sm:$0xf] %v964_v40  ;;  %s940_s9 = scalar_lea.vmem %s4461_s5, %s4475_s23  ;;  %s945_s12 = scalar_lea.vmem %s4462_s6, %s4475_s23 }
  0x65   : > { %v3575_v34 = vld [vmem:[%s4459_s3 + $0x30] sm:$0xff]   ;;  %v3579_v38 = vld [vmem:[%s4459_s3 + $0x38] sm:$0xff]   ;;  %v980_v42 = vld [vmem:[%s4044_s13 + $0x80] sm:$0xf]  ;;  %1051 = vst [vmem:[#allocation2 + $0x58] sm:$0xf] %v966_v41 }
  0x66   : > { %3265 = vmatpush3.bf16.msra.mxu0 %v3559_v18  ;;  %v3576_v35 = vld [vmem:[%s4459_s3 + $0xb0] sm:$0xff]   ;;  %v3580_v39 = vld [vmem:[%s4459_s3 + $0xb8] sm:$0xff]   ;;  %v982_v43 = vld [vmem:[%s4044_s13 + $0x88] sm:$0xf]  ;;  %1079 = vst [vmem:[#allocation2 + $0xa0] sm:$0xf] %v980_v42 }
  0x67   : > { %3305 = vmatpush3.bf16.msra.mxu1 %v3560_v19  ;;  %3266 = vmatprep.subr.bf16.mxu0 %v3561_v20  ;;  %v948_v44 = vld [vmem:[%s4044_s13] sm:$0xf]  ;;  %v950_v45 = vld [vmem:[%s4044_s13 + $0x8] sm:$0xf]  ;;  %1083 = vst [vmem:[#allocation2 + $0xa8] sm:$0xf] %v982_v43  ;;  %vm4069_vm2 = vmand %vm1013_vm0, %vm1014_vm1 }
  0x68   : > { %3306 = vmatprep.subr.bf16.mxu1 %v3562_v21  ;;  %1012 = vst [vmem:[#allocation2] sm:$0xf] %v948_v44  ;;  %1019 = vst [vmem:[#allocation2 + $0x8] sm:$0xf] %v950_v45  ;;  %v949_v47 = vld [vmem:[%s4044_s13 + $0x4] sm:$0x1] }
  0x69   : > { %v951_v48 = vld [vmem:[%s4044_s13 + $0xc] sm:$0x1]  ;;  %v965_v49 = vld [vmem:[%s4044_s13 + $0x44] sm:$0x1]  ;;  %v969_v52 = vld [vmem:[%s4044_s13 + $0x54] sm:$0x1] }
  0x6a   : > { %3267 = vmatpush3.bf16.msra.mxu0 %v3563_v22  ;;  %v967_v50 = vld [vmem:[%s4044_s13 + $0x4c] sm:$0x1]  ;;  %v971_v53 = vld [vmem:[%s4044_s13 + $0x5c] sm:$0x1]  ;;  %v973_v54 = vld [vmem:[%s4044_s13 + $0x64] sm:$0x1] }
  0x6b   : > { %3307 = vmatpush3.bf16.msra.mxu1 %v3564_v23  ;;  %3268 = vmatprep.subr.bf16.mxu0 %v3565_v24  ;;  %v975_v56 = vld [vmem:[%s4044_s13 + $0x6c] sm:$0x1]  ;;  %v977_v57 = vld [vmem:[%s4044_s13 + $0x74] sm:$0x1]  ;;  %v979_v58 = vld [vmem:[%s4044_s13 + $0x7c] sm:$0x1] }
  0x6c   : > { %3308 = vmatprep.subr.bf16.mxu1 %v3566_v25  ;;  %v3581_v46 = vld [vmem:[#allocation2 + $0x50] ss:$8 sps:$4 sm:$0xff]   ;;  %v997_v59 = vld [vmem:[%s4044_s13 + $0xc4] sm:$0x1]  ;;  %v999_v60 = vld [vmem:[%s4044_s13 + $0xcc] sm:$0x1] }
  0x6d   : > { %2505 = vmatprep.mubr.bf16.mxu0 %v3581_v46  ;;  %v1001_v61 = vld [vmem:[%s4044_s13 + $0xd4] sm:$0x1]  ;;  %v1016_v62 = vld [vmem:[#allocation2 + $0x4] sm:$0x1]  ;;  %v1020_v63 = vld [vmem:[#allocation2 + $0xc] sm:$0x1] }
  0x6e   : > { %3269 = vmatpush3.bf16.msra.mxu0 %v3567_v26  ;;  %v3582_v51 = vld [vmem:[#allocation2 + $0xa0] ss:$8 sps:$4 sm:$0xff]   ;;  %v1003_v0 = vld [vmem:[%s4044_s13 + $0xdc] sm:$0x1]  ;;  %v1005_v1 = vld [vmem:[%s4044_s13 + $0xe4] sm:$0x1]  ;;  %v1017_v8 = vsel %vm4069_vm2, %v949_v47, %v1016_v62  ;;  %v1021_v9 = vsel %vm4069_vm2, %v951_v48, %v1020_v63 }
  0x6f   : > { %3309 = vmatpush3.bf16.msra.mxu1 %v3568_v27  ;;  %3270 = vmatprep.subr.bf16.mxu0 %v3569_v28  ;;  %v3583_v55 = vld [vmem:[#allocation2] ss:$8 sps:$4 sm:$0xff]   ;;  %v1007_v2 = vld [vmem:[%s4044_s13 + $0xec] sm:$0x1]  ;;  %v1048_v4 = vld [vmem:[#allocation2 + $0x54] sm:$0x1] }
  0x70   : > { %3310 = vmatprep.subr.bf16.mxu1 %v3570_v29  ;;  %2570 = vmatprep.mubr.bf16.mxu1 %v3582_v51  ;;  %v1052_v5 = vld [vmem:[#allocation2 + $0x5c] sm:$0x1]  ;;  %v1009_v6 = vld [vmem:[%s4044_s13 + $0xf4] sm:$0x1]  ;;  %v1049_v10 = vsel %vm4069_vm2, %v965_v49, %v1048_v4  ;;  %v1056_v12 = vld [vmem:[#allocation2 + $0x64] sm:$0x1] }
  0x71   : > { %v1011_v7 = vld [vmem:[%s4044_s13 + $0xfc] sm:$0x1]  ;;  %v1053_v11 = vsel %vm4069_vm2, %v967_v50, %v1052_v5  ;;  %v1060_v13 = vld [vmem:[#allocation2 + $0x6c] sm:$0x1]  ;;  %v1064_v14 = vld [vmem:[#allocation2 + $0x74] sm:$0x1]  ;;  %v1057_v15 = vsel %vm4069_vm2, %v969_v52, %v1056_v12 }
  0x72   : > { %3271 = vmatpush3.bf16.msra.mxu0 %v3571_v30  ;;  %1018 = vst [vmem:[#allocation2 + $0x4] sm:$0x1] %v1017_v8  ;;  %1022 = vst [vmem:[#allocation2 + $0xc] sm:$0x1] %v1021_v9  ;;  %v1061_v16 = vsel %vm4069_vm2, %v971_v53, %v1060_v13  ;;  %v1065_v17 = vsel %vm4069_vm2, %v973_v54, %v1064_v14  ;;  %v1068_v18 = vld [vmem:[#allocation2 + $0x7c] sm:$0x1] }
  0x73   : > { %3311 = vmatpush3.bf16.msra.mxu1 %v3572_v31  ;;  %3272 = vmatprep.subr.bf16.mxu0 %v3573_v32  ;;  %1050 = vst [vmem:[#allocation2 + $0x54] sm:$0x1] %v1049_v10  ;;  %1054 = vst [vmem:[#allocation2 + $0x5c] sm:$0x1] %v1053_v11  ;;  %v1072_v19 = vld [vmem:[#allocation2 + $0x84] sm:$0x1]  ;;  %v1069_v21 = vsel %vm4069_vm2, %v975_v56, %v1068_v18 }
  0x74   : > { %3312 = vmatprep.subr.bf16.mxu1 %v3574_v33  ;;  %v1076_v20 = vld [vmem:[#allocation2 + $0x8c] sm:$0x1]  ;;  %1058 = vst [vmem:[#allocation2 + $0x64] sm:$0x1] %v1057_v15  ;;  %1062 = vst [vmem:[#allocation2 + $0x6c] sm:$0x1] %v1061_v16  ;;  %v1073_v22 = vsel %vm4069_vm2, %v977_v57, %v1072_v19 }
  0x75   : > { %1066 = vst [vmem:[#allocation2 + $0x74] sm:$0x1] %v1065_v17  ;;  %v1077_v23 = vsel %vm4069_vm2, %v979_v58, %v1076_v20  ;;  %v1112_v24 = vld [vmem:[#allocation2 + $0xf4] sm:$0x1]  ;;  %v1116_v25 = vld [vmem:[#allocation2 + $0xfc] sm:$0x1]  ;;  %vm4122_vm5 = vmor %vm1282_vm3, %vm1283_vm4 }
  0x76   : > { %3273 = vmatpush3.bf16.msra.mxu0 %v3575_v34  ;;  %v1120_v26 = vld [vmem:[#allocation2 + $0x104] sm:$0x1]  ;;  %1070 = vst [vmem:[#allocation2 + $0x7c] sm:$0x1] %v1069_v21  ;;  %1074 = vst [vmem:[#allocation2 + $0x84] sm:$0x1] %v1073_v22  ;;  %v1113_v27 = vsel %vm4069_vm2, %v997_v59, %v1112_v24  ;;  %v1117_v28 = vsel %vm4069_vm2, %v999_v60, %v1116_v25 }
  0x77   : > { %3313 = vmatpush3.bf16.msra.mxu1 %v3576_v35  ;;  %3274 = vmatprep.subr.bf16.mxu0 %v3577_v36  ;;  %1078 = vst [vmem:[#allocation2 + $0x8c] sm:$0x1] %v1077_v23  ;;  %v1121_v29 = vsel %vm4069_vm2, %v1001_v61, %v1120_v26  ;;  %v1124_v30 = vld [vmem:[#allocation2 + $0x10c] sm:$0x1]  ;;  %v1128_v31 = vld [vmem:[#allocation2 + $0x114] sm:$0x1] }
  0x78   : > { %3314 = vmatprep.subr.bf16.mxu1 %v3578_v37  ;;  %v1132_v32 = vld [vmem:[#allocation2 + $0x11c] sm:$0x1]  ;;  %1114 = vst [vmem:[#allocation2 + $0xf4] sm:$0x1] %v1113_v27  ;;  %1118 = vst [vmem:[#allocation2 + $0xfc] sm:$0x1] %v1117_v28  ;;  %v1125_v33 = vsel %vm4069_vm2, %v1003_v0, %v1124_v30  ;;  %v1129_v34 = vsel %vm4069_vm2, %v1005_v1, %v1128_v31 }
  0x79   : > { %1122 = vst [vmem:[#allocation2 + $0x104] sm:$0x1] %v1121_v29  ;;  %v1133_v35 = vsel %vm4069_vm2, %v1007_v2, %v1132_v32  ;;  %v1136_v36 = vld [vmem:[#allocation2 + $0x124] sm:$0x1]  ;;  %v1140_v37 = vld [vmem:[#allocation2 + $0x12c] sm:$0x1] }
  0x7a   : > { %3275 = vmatpush3.bf16.msra.mxu0 %v3579_v38  ;;  %v1266_v38 = vld [vmem:[#allocation2] sm:$0xf]  ;;  %1126 = vst [vmem:[#allocation2 + $0x10c] sm:$0x1] %v1125_v33  ;;  %1130 = vst [vmem:[#allocation2 + $0x114] sm:$0x1] %v1129_v34  ;;  %v1141_v40 = vsel %vm4069_vm2, %v1011_v7, %v1140_v37 }
  0x7b   : > { %3315 = vmatpush3.bf16.msra.mxu1 %v3580_v39  ;;  %1134 = vst [vmem:[#allocation2 + $0x11c] sm:$0x1] %v1133_v35  ;;  %v1137_v39 = vsel %vm4069_vm2, %v1009_v6, %v1136_v36  ;;  %v1268_v41 = vld [vmem:[#allocation2 + $0x8] sm:$0xf]  ;;  %v1286_v42 = vshrl.u32 %v1266_v38, 16  ;;  %v3584_v43 = vld [vmem:[%s4459_s3 + $0x140] sm:$0xff]  }
  0x7c   : > { %1138 = vst [vmem:[#allocation2 + $0x124] sm:$0x1] %v1137_v39  ;;  %1142 = vst [vmem:[#allocation2 + $0x12c] sm:$0x1] %v1141_v40  ;;  %v1289_v44 = vshll.u32 %v1266_v38, 16  ;;  %v1300_v45 = vshrl.u32 %v1268_v41, 16  ;;  %3340 = vmatprep.subr.bf16.mxu0 %v3584_v43 }
  0x7d   : > { %2506 = vmatmul.mubr.bf16.vlgmr.msra.gmra.mrb[0].mxu0 %v3583_v55  ;;  %v1303_v46 = vshll.u32 %v1268_v41, 16  ;;  %v3585_v47 = vld [vmem:[%s4459_s3 + $0x1c0] sm:$0xff]   ;;  %v1288_v48 = vrot.slane %v1286_v42, 4  ;;  %v1269_v51 = vld [vmem:[#allocation2 + $0xc] sm:$0x1]  ;;  %v3595_v21 = vld [vmem:[%s4459_s3 + $0x150] sm:$0xff]  }
  0x7e   : > { %v3586_v49 = vld [vmem:[%s4459_s3 + $0x100] sm:$0xff]   ;;  %v1291_v52 = vrot.slane %v1289_v44, 5  ;;  %v1302_v53 = vrot.slane %v1300_v45, 4  ;;  %3380 = vmatprep.subr.bf16.mxu1 %v3585_v47  ;;  %v1309_v56 = vshll.u32 %v1269_v51, 16  ;;  %v3588_v63 = vld [vmem:[%s4459_s3 + $0x148] sm:$0xff]   ;;  %v3596_v22 = vld [vmem:[%s4459_s3 + $0x1d0] sm:$0xff]  }
  0x7f   : > { %v1267_v50 = vld [vmem:[#allocation2 + $0x4] sm:$0x1]  ;;  %v1305_v55 = vrot.slane %v1303_v46, 5  ;;  %3341 = vmatpush3.bf16.msra.mxu0 %v3586_v49  ;;  %v3590_v4 = vld [vmem:[%s4459_s3 + $0x108] sm:$0xff]   ;;  %v968_v7 = vld [vmem:[%s4044_s13 + $0x50] sm:$0xf] }
  0x80   : > { %v1295_v54 = vshll.u32 %v1267_v50, 16  ;;  %v1292_v57 = vor.u32 %v1291_v52, %v1288_v48  ;;  %v1311_v61 = vrot.slane %v1309_v56, 5  ;;  %v3587_v1 = vld [vmem:[%s4459_s3 + $0x180] sm:$0xff]   ;;  %3342 = vmatprep.subr.bf16.mxu0 %v3588_v63  ;;  %v3589_v6 = vld [vmem:[%s4459_s3 + $0x1c8] sm:$0xff]   ;;  %v970_v9 = vld [vmem:[%s4044_s13 + $0x58] sm:$0xf] }
  0x81   : > { %v1306_v60 = vor.u32 %v1305_v55, %v1302_v53  ;;  %1055 = vst [vmem:[#allocation2 + $0x60] sm:$0xf] %v968_v7  ;;  %v984_v10 = vld [vmem:[%s4044_s13 + $0x90] sm:$0xf]  ;;  %v986_v11 = vld [vmem:[%s4044_s13 + $0x98] sm:$0xf] }
  0x82   : > { %v1297_v59 = vrot.slane %v1295_v54, 5  ;;  %v1293_v62 = vrot.slane %v1292_v57, 4  ;;  %v3591_v12 = vld [vmem:[%s4459_s3 + $0x188] sm:$0xff]   ;;  %1059 = vst [vmem:[#allocation2 + $0x68] sm:$0xf] %v970_v9  ;;  %v3597_v23 = vld [vmem:[%s4459_s3 + $0x110] sm:$0xff]  }
  0x83   : > { %v1307_v0 = vrot.slane %v1306_v60, 4  ;;  %3343 = vmatpush3.bf16.msra.mxu0 %v3590_v4  ;;  %1087 = vst [vmem:[#allocation2 + $0xb0] sm:$0xf] %v984_v10  ;;  %1091 = vst [vmem:[#allocation2 + $0xb8] sm:$0xf] %v986_v11  ;;  %v3598_v24 = vld [vmem:[%s4459_s3 + $0x190] sm:$0xff]  }
  0x84   : > { %v1298_v2 = vsel %vm4122_vm5, %v1293_v62, %v1297_v59  ;;  %v952_v13 = vld [vmem:[%s4044_s13 + $0x10] sm:$0xf]  ;;  %v954_v14 = vld [vmem:[%s4044_s13 + $0x18] sm:$0xf]  ;;  %v953_v15 = vld [vmem:[%s4044_s13 + $0x14] sm:$0x1]  ;;  %3344 = vmatprep.subr.bf16.mxu0 %v3595_v21 }
  0x85   : > { %v1312_v5 = vsel %vm4122_vm5, %v1307_v0, %v1311_v61  ;;  %1023 = vst [vmem:[#allocation2 + $0x10] sm:$0xf] %v952_v13  ;;  %1027 = vst [vmem:[#allocation2 + $0x18] sm:$0xf] %v954_v14  ;;  %v955_v16 = vld [vmem:[%s4044_s13 + $0x1c] sm:$0x1] }
  0x86   : > { %v3130_v8 = vcombine.low %v1298_v2, %v1312_v5  ;;  %v1024_v17 = vld [vmem:[#allocation2 + $0x14] sm:$0x1]  ;;  %v1028_v18 = vld [vmem:[#allocation2 + $0x1c] sm:$0x1]  ;;  %v972_v49 = vld [vmem:[%s4044_s13 + $0x60] sm:$0xf] }
  0x87   : > { %v1025_v19 = vsel %vm4069_vm2, %v953_v15, %v1024_v17  ;;  %v1029_v20 = vsel %vm4069_vm2, %v955_v16, %v1028_v18  ;;  %3345 = vmatpush3.bf16.msra.mxu0 %v3597_v23  ;;  %v3599_v36 = vld [vmem:[%s4459_s3 + $0x158] sm:$0xff]   ;;  %v974_v51 = vld [vmem:[%s4044_s13 + $0x68] sm:$0xf]  ;;  %1063 = vst [vmem:[#allocation2 + $0x70] sm:$0xf] %v972_v49  ;;  %v3606_v57 = vld [vmem:[%s4459_s3 + $0x160] sm:$0xff]  }
  0x88   : > { %2571 = vmatmul.mubr.bf16.vlgmr.msra.gmra.mrb[0].mxu1 %v3130_v8  ;;  %1026 = vst [vmem:[#allocation2 + $0x14] sm:$0x1] %v1025_v19  ;;  %1030 = vst [vmem:[#allocation2 + $0x1c] sm:$0x1] %v1029_v20  ;;  %v3600_v37 = vld [vmem:[%s4459_s3 + $0x1d8] sm:$0xff]   ;;  %3346 = vmatprep.subr.bf16.mxu0 %v3599_v36  ;;  %v3607_v62 = vld [vmem:[%s4459_s3 + $0x1e0] sm:$0xff]  }
  0x89   : > { %3381 = vmatpush3.bf16.msra.mxu1 %v3587_v1  ;;  %v3592_v25 = vld [vmem:[#allocation2 + $0x60] ss:$8 sps:$4 sm:$0xff]   ;;  %v3601_v46 = vld [vmem:[%s4459_s3 + $0x118] sm:$0xff]   ;;  %1067 = vst [vmem:[#allocation2 + $0x78] sm:$0xf] %v974_v51 }
  0x8a   : > { %3382 = vmatprep.subr.bf16.mxu1 %v3589_v6  ;;  %v3593_v26 = vld [vmem:[#allocation2 + $0xb0] ss:$8 sps:$4 sm:$0xff]   ;;  %2513 = vmatprep.mubr.bf16.mxu0 %v3592_v25  ;;  %v988_v52 = vld [vmem:[%s4044_s13 + $0xa0] sm:$0xf]  ;;  %v990_v53 = vld [vmem:[%s4044_s13 + $0xa8] sm:$0xf] }
  0x8b   : > { %2578 = vmatprep.mubr.bf16.mxu1 %v3593_v26  ;;  %v3602_v47 = vld [vmem:[%s4459_s3 + $0x198] sm:$0xff]   ;;  %3347 = vmatpush3.bf16.msra.mxu0 %v3601_v46  ;;  %1095 = vst [vmem:[#allocation2 + $0xc0] sm:$0xf] %v988_v52  ;;  %1099 = vst [vmem:[#allocation2 + $0xc8] sm:$0xf] %v990_v53  ;;  %v3608_v7 = vld [vmem:[%s4459_s3 + $0x120] sm:$0xff]  }
  0x8c   : > { %v3594_v27 = vld [vmem:[#allocation2 + $0x10] ss:$8 sps:$4 sm:$0xff]   ;;  %v956_v55 = vld [vmem:[%s4044_s13 + $0x20] sm:$0xf]  ;;  %v958_v56 = vld [vmem:[%s4044_s13 + $0x28] sm:$0xf]  ;;  %3348 = vmatprep.subr.bf16.mxu0 %v3606_v57 }
  0x8d   : > { %3383 = vmatpush3.bf16.msra.mxu1 %v3591_v12  ;;  %v1270_v28 = vld [vmem:[#allocation2 + $0x10] sm:$0xf]  ;;  %v1272_v30 = vld [vmem:[#allocation2 + $0x18] sm:$0xf]  ;;  %2514 = vmatmul.mubr.bf16.gmra.mrb[4].mxu0 %v3594_v27  ;;  %1031 = vst [vmem:[#allocation2 + $0x20] sm:$0xf] %v956_v55 }
  0x8e   : > { %3384 = vmatprep.subr.bf16.mxu1 %v3596_v22  ;;  %v1314_v32 = vshrl.u32 %v1270_v28, 16  ;;  %v1317_v33 = vshll.u32 %v1270_v28, 16  ;;  %v1328_v35 = vshrl.u32 %v1272_v30, 16  ;;  %v1331_v38 = vshll.u32 %v1272_v30, 16  ;;  %1035 = vst [vmem:[#allocation2 + $0x28] sm:$0xf] %v958_v56 }
  0x8f   : > { %v1271_v29 = vld [vmem:[#allocation2 + $0x14] sm:$0x1]  ;;  %v1273_v31 = vld [vmem:[#allocation2 + $0x1c] sm:$0x1]  ;;  %v957_v60 = vld [vmem:[%s4044_s13 + $0x24] sm:$0x1]  ;;  %3349 = vmatpush3.bf16.msra.mxu0 %v3608_v7 }
  0x90   : > { %v1323_v34 = vshll.u32 %v1271_v29, 16  ;;  %v1337_v39 = vshll.u32 %v1273_v31, 16  ;;  %v1316_v40 = vrot.slane %v1314_v32, 4  ;;  %v1319_v41 = vrot.slane %v1317_v33, 5  ;;  %v959_v61 = vld [vmem:[%s4044_s13 + $0x2c] sm:$0x1] }
  0x91   : > { %3385 = vmatpush3.bf16.msra.mxu1 %v3598_v24  ;;  %v1330_v43 = vrot.slane %v1328_v35, 4  ;;  %v1333_v44 = vrot.slane %v1331_v38, 5  ;;  %v1032_v0 = vld [vmem:[#allocation2 + $0x24] sm:$0x1]  ;;  %v1036_v1 = vld [vmem:[#allocation2 + $0x2c] sm:$0x1] }
  0x92   : > { %v1325_v42 = vrot.slane %v1323_v34, 5  ;;  %3386 = vmatprep.subr.bf16.mxu1 %v3600_v37  ;;  %v1339_v45 = vrot.slane %v1337_v39, 5  ;;  %v1320_v48 = vor.u32 %v1319_v41, %v1316_v40  ;;  %v1033_v4 = vsel %vm4069_vm2, %v957_v60, %v1032_v0  ;;  %v3609_v8 = vld [vmem:[%s4459_s3 + $0x1a0] sm:$0xff]   ;;  %v3603_v9 = vld [vmem:[#allocation2 + $0x70] ss:$8 sps:$4 sm:$0xff]   ;;  %v3610_v16 = vld [vmem:[%s4459_s3 + $0x168] sm:$0xff]  }
  0x93   : > { %v1334_v50 = vor.u32 %v1333_v44, %v1330_v43  ;;  %v1037_v5 = vsel %vm4069_vm2, %v959_v61, %v1036_v1  ;;  %1034 = vst [vmem:[#allocation2 + $0x24] sm:$0x1] %v1033_v4  ;;  %v3604_v10 = vld [vmem:[#allocation2 + $0xc0] ss:$8 sps:$4 sm:$0xff]   ;;  %2521 = vmatprep.mubr.bf16.mxu0 %v3603_v9  ;;  %3350 = vmatprep.subr.bf16.mxu0 %v3610_v16  ;;  %v976_v34 = vld [vmem:[%s4044_s13 + $0x70] sm:$0xf] }
  0x94   : > { %v1321_v54 = vrot.slane %v1320_v48, 4  ;;  %1038 = vst [vmem:[#allocation2 + $0x2c] sm:$0x1] %v1037_v5  ;;  %v1274_v12 = vld [vmem:[#allocation2 + $0x20] sm:$0xf]  ;;  %v3611_v17 = vld [vmem:[%s4459_s3 + $0x1e8] sm:$0xff]  }
  0x95   : > { %3387 = vmatpush3.bf16.msra.mxu1 %v3602_v47  ;;  %v1335_v59 = vrot.slane %v1334_v50, 4  ;;  %v3605_v11 = vld [vmem:[#allocation2 + $0x20] ss:$8 sps:$4 sm:$0xff]   ;;  %v1342_v14 = vshrl.u32 %v1274_v12, 16  ;;  %v1345_v15 = vshll.u32 %v1274_v12, 16  ;;  %v3617_v38 = vld [vmem:[%s4459_s3 + $0x170] sm:$0xff]  }
  0x96   : > { %v1326_v63 = vsel %vm4122_vm5, %v1321_v54, %v1325_v42  ;;  %3388 = vmatprep.subr.bf16.mxu1 %v3607_v62  ;;  %v1276_v13 = vld [vmem:[#allocation2 + $0x28] sm:$0xf]  ;;  %2522 = vmatmul.mubr.bf16.gmra.mrb[8].mxu0 %v3605_v11  ;;  %v978_v36 = vld [vmem:[%s4044_s13 + $0x78] sm:$0xf]  ;;  %1071 = vst [vmem:[#allocation2 + $0x80] sm:$0xf] %v976_v34 }
  0x97   : > { %v1340_v2 = vsel %vm4122_vm5, %v1335_v59, %v1339_v45  ;;  %v1356_v20 = vshrl.u32 %v1276_v13, 16  ;;  %v1359_v21 = vshll.u32 %v1276_v13, 16  ;;  %v1344_v22 = vrot.slane %v1342_v14, 4  ;;  %v3612_v31 = vld [vmem:[%s4459_s3 + $0x128] sm:$0xff]   ;;  %v992_v37 = vld [vmem:[%s4044_s13 + $0xb0] sm:$0xf] }
  0x98   : > { %v3131_v6 = vcombine.low %v1326_v63, %v1340_v2  ;;  %v1347_v23 = vrot.slane %v1345_v15, 5  ;;  %v3613_v32 = vld [vmem:[%s4459_s3 + $0x1a8] sm:$0xff]   ;;  %3351 = vmatpush3.bf16.msra.mxu0 %v3612_v31  ;;  %1075 = vst [vmem:[#allocation2 + $0x88] sm:$0xf] %v978_v36  ;;  %v994_v40 = vld [vmem:[%s4044_s13 + $0xb8] sm:$0xf] }
  0x99   : > { %3389 = vmatpush3.bf16.msra.mxu1 %v3609_v8  ;;  %v1358_v26 = vrot.slane %v1356_v20, 4  ;;  %v1361_v27 = vrot.slane %v1359_v21, 5  ;;  %1103 = vst [vmem:[#allocation2 + $0xd0] sm:$0xf] %v992_v37  ;;  %v960_v41 = vld [vmem:[%s4044_s13 + $0x30] sm:$0xf]  ;;  %3352 = vmatprep.subr.bf16.mxu0 %v3617_v38 }
  0x9a   : > { %2579 = vmatmul.mubr.bf16.gmra.mrb[4].mxu1 %v3131_v6  ;;  %v1275_v18 = vld [vmem:[#allocation2 + $0x24] sm:$0x1]  ;;  %3390 = vmatprep.subr.bf16.mxu1 %v3611_v17  ;;  %v1348_v28 = vor.u32 %v1347_v23, %v1344_v22  ;;  %v3618_v42 = vld [vmem:[%s4459_s3 + $0x1f0] sm:$0xff]   ;;  %1107 = vst [vmem:[#allocation2 + $0xd8] sm:$0xf] %v994_v40  ;;  %v3621_v63 = vld [vmem:[%s4459_s3 + $0x178] sm:$0xff]  }
  0x9b   : > { %2586 = vmatprep.mubr.bf16.mxu1 %v3604_v10  ;;  %v1277_v19 = vld [vmem:[#allocation2 + $0x2c] sm:$0x1]  ;;  %v1351_v24 = vshll.u32 %v1275_v18, 16  ;;  %v1362_v33 = vor.u32 %v1361_v27, %v1358_v26  ;;  %v962_v44 = vld [vmem:[%s4044_s13 + $0x38] sm:$0xf]  ;;  %v3619_v53 = vld [vmem:[%s4459_s3 + $0x130] sm:$0xff]  }
  0x9c   : > { %v1365_v25 = vshll.u32 %v1277_v19, 16  ;;  %v1349_v35 = vrot.slane %v1348_v28, 4  ;;  %1039 = vst [vmem:[#allocation2 + $0x30] sm:$0xf] %v960_v41  ;;  %v961_v45 = vld [vmem:[%s4044_s13 + $0x34] sm:$0x1]  ;;  %3353 = vmatpush3.bf16.msra.mxu0 %v3619_v53 }
  0x9d   : > { %v1353_v29 = vrot.slane %v1351_v24, 5  ;;  %3391 = vmatpush3.bf16.msra.mxu1 %v3613_v32  ;;  %v1363_v39 = vrot.slane %v1362_v33, 4  ;;  %v963_v46 = vld [vmem:[%s4044_s13 + $0x3c] sm:$0x1]  ;;  %1043 = vst [vmem:[#allocation2 + $0x38] sm:$0xf] %v962_v44  ;;  %3354 = vmatprep.subr.bf16.mxu0 %v3621_v63 }
  0x9e   : > { %v1367_v30 = vrot.slane %v1365_v25, 5  ;;  %v1040_v48 = vld [vmem:[#allocation2 + $0x34] sm:$0x1]  ;;  %v1044_v49 = vld [vmem:[#allocation2 + $0x3c] sm:$0x1]  ;;  %3392 = vmatprep.subr.bf16.mxu1 %v3618_v42  ;;  %v4266_v22 = vld [vmem:[%s4459_s3 + $0x200] sm:$0xff]  }
  0x9f   : > { %v1354_v43 = vsel %vm4122_vm5, %v1349_v35, %v1353_v29  ;;  %v1041_v51 = vsel %vm4069_vm2, %v961_v45, %v1040_v48  ;;  %v1045_v52 = vsel %vm4069_vm2, %v963_v46, %v1044_v49  ;;  %v3620_v54 = vld [vmem:[%s4459_s3 + $0x1b0] sm:$0xff]   ;;  %v3614_v55 = vld [vmem:[#allocation2 + $0x80] ss:$8 sps:$4 sm:$0xff]   ;;  %v3622_v0 = vld [vmem:[%s4459_s3 + $0x1f8] sm:$0xff]  }
  0xa0   : > { %v1368_v47 = vsel %vm4122_vm5, %v1363_v39, %v1367_v30  ;;  %1042 = vst [vmem:[#allocation2 + $0x34] sm:$0x1] %v1041_v51  ;;  %1046 = vst [vmem:[#allocation2 + $0x3c] sm:$0x1] %v1045_v52  ;;  %2529 = vmatprep.mubr.bf16.mxu0 %v3614_v55  ;;  %v3623_v15 = vld [vmem:[%s4459_s3 + $0x138] sm:$0xff]   ;;  %v4287_v55 = vld [vmem:[%s4459_s3 + $0x208] sm:$0xff]  }
  0xa1   : > { %v3132_v50 = vcombine.low %v1354_v43, %v1368_v47  ;;  %3393 = vmatpush3.bf16.msra.mxu1 %v3620_v54  ;;  %v3615_v56 = vld [vmem:[#allocation2 + $0xd0] ss:$8 sps:$4 sm:$0xff]   ;;  %v981_v18 = vld [vmem:[%s4044_s13 + $0x84] sm:$0x1]  ;;  %3355 = vmatpush3.bf16.msra.mxu0 %v3623_v15  ;;  %v983_v20 = vld [vmem:[%s4044_s13 + $0x8c] sm:$0x1] }
  0xa2   : > { %3394 = vmatprep.subr.bf16.mxu1 %v3622_v0  ;;  %v3624_v16 = vld [vmem:[%s4459_s3 + $0x1b8] sm:$0xff]   ;;  %v1080_v21 = vld [vmem:[#allocation2 + $0xa4] sm:$0x1]  ;;  %v1084_v25 = vld [vmem:[#allocation2 + $0xac] sm:$0x1]  ;;  %3432 = vmatprep.subr.bf16.mxu0 %v4266_v22 }
  0xa3   : > { %2587 = vmatmul.mubr.bf16.gmra.mrb[8].mxu1 %v3132_v50  ;;  %v1278_v59 = vld [vmem:[#allocation2 + $0x30] sm:$0xf]  ;;  %v1081_v24 = vsel %vm4069_vm2, %v981_v18, %v1080_v21  ;;  %v1491_v26 = vld [vmem:[#allocation2 + $0xa0] sm:$0xf]  ;;  %v1085_v28 = vsel %vm4069_vm2, %v983_v20, %v1084_v25  ;;  %v1493_v29 = vld [vmem:[#allocation2 + $0xa8] sm:$0xf] }
  0xa4   : > { %v3616_v57 = vld [vmem:[#allocation2 + $0x30] ss:$8 sps:$4 sm:$0xff]   ;;  %2594 = vmatprep.mubr.bf16.mxu1 %v3615_v56  ;;  %v1370_v61 = vshrl.u32 %v1278_v59, 16  ;;  %v1373_v62 = vshll.u32 %v1278_v59, 16  ;;  %1082 = vst [vmem:[#allocation2 + $0xa4] sm:$0x1] %v1081_v24 }
  0xa5   : > { %v1280_v60 = vld [vmem:[#allocation2 + $0x38] sm:$0xf]  ;;  %2530 = vmatmul.mubr.bf16.gmra.mrb[12].mxu0 %v3616_v57  ;;  %3395 = vmatpush3.bf16.msra.mxu1 %v3624_v16  ;;  %v1508_v30 = vshrl.u32 %v1491_v26, 16  ;;  %v1511_v31 = vshll.u32 %v1491_v26, 16  ;;  %1086 = vst [vmem:[#allocation2 + $0xac] sm:$0x1] %v1085_v28 }
  0xa6   : > { %v1384_v4 = vshrl.u32 %v1280_v60, 16  ;;  %v1387_v5 = vshll.u32 %v1280_v60, 16  ;;  %v1372_v6 = vrot.slane %v1370_v61, 4  ;;  %v1375_v7 = vrot.slane %v1373_v62, 5  ;;  %3456 = vmatprep.subr.bf16.mxu1 %v4266_v22  ;;  %v3625_v35 = vld [vmem:[#allocation2 + $0x58] ss:$8 sps:$4 sm:$0xff]  }
  0xa7   : > { %v1279_v1 = vld [vmem:[#allocation2 + $0x34] sm:$0x1]  ;;  %v1281_v2 = vld [vmem:[#allocation2 + $0x3c] sm:$0x1]  ;;  %v1522_v33 = vshrl.u32 %v1493_v29, 16  ;;  %v1525_v34 = vshll.u32 %v1493_v29, 16 }
  0xa8   : > { %v1379_v8 = vshll.u32 %v1279_v1, 16  ;;  %v1393_v9 = vshll.u32 %v1281_v2, 16  ;;  %v1386_v10 = vrot.slane %v1384_v4, 4  ;;  %v1389_v11 = vrot.slane %v1387_v5, 5  ;;  %v996_v39 = vld [vmem:[%s4044_s13 + $0xc0] sm:$0xf] }
  0xa9   : > { %v1376_v12 = vor.u32 %v1375_v7, %v1372_v6  ;;  %v1510_v37 = vrot.slane %v1508_v30, 4  ;;  %v1513_v38 = vrot.slane %v1511_v31, 5  ;;  %v998_v40 = vld [vmem:[%s4044_s13 + $0xc8] sm:$0xf]  ;;  %v1524_v41 = vrot.slane %v1522_v33, 4  ;;  %v3633_v15 = vld [vmem:[%s4459_s3 + $0x210] sm:$0xff]  }
  0xaa   : > { %v1381_v13 = vrot.slane %v1379_v8, 5  ;;  %v1395_v14 = vrot.slane %v1393_v9, 5  ;;  %v1390_v17 = vor.u32 %v1389_v11, %v1386_v10  ;;  %v1527_v42 = vrot.slane %v1525_v34, 5  ;;  %1111 = vst [vmem:[#allocation2 + $0xf0] sm:$0xf] %v996_v39  ;;  %v3634_v28 = vld [vmem:[%s4459_s3 + $0x218] sm:$0xff]  }
  0xab   : > { %v1377_v19 = vrot.slane %v1376_v12, 4  ;;  %1115 = vst [vmem:[#allocation2 + $0xf8] sm:$0xf] %v998_v40  ;;  %v1514_v43 = vor.u32 %v1513_v38, %v1510_v37  ;;  %v985_v45 = vld [vmem:[%s4044_s13 + $0x94] sm:$0x1] }
  0xac   : > { %v1391_v23 = vrot.slane %v1390_v17, 4  ;;  %v1528_v44 = vor.u32 %v1527_v42, %v1524_v41  ;;  %v987_v46 = vld [vmem:[%s4044_s13 + $0x9c] sm:$0x1]  ;;  %v1088_v47 = vld [vmem:[#allocation2 + $0xb4] sm:$0x1]  ;;  %v4321_v41 = vld [vmem:[%s4459_s3 + $0x220] sm:$0xff]  }
  0xad   : > { %v1382_v27 = vsel %vm4122_vm5, %v1377_v19, %v1381_v13  ;;  %v1492_v48 = vld [vmem:[#allocation2 + $0xa4] sm:$0x1]  ;;  %v3627_v49 = vld [vmem:[#allocation2 + $0x8] ss:$8 sps:$4 sm:$0xff]   ;;  %v1089_v50 = vsel %vm4069_vm2, %v985_v45, %v1088_v47  ;;  %v1092_v51 = vld [vmem:[#allocation2 + $0xbc] sm:$0x1] }
  0xae   : > { %v1396_v32 = vsel %vm4122_vm5, %v1391_v23, %v1395_v14  ;;  %v1494_v52 = vld [vmem:[#allocation2 + $0xac] sm:$0x1]  ;;  %v1515_v53 = vrot.slane %v1514_v43, 4  ;;  %v1517_v54 = vshll.u32 %v1492_v48, 16  ;;  %1090 = vst [vmem:[#allocation2 + $0xb4] sm:$0x1] %v1089_v50  ;;  %v1093_v56 = vsel %vm4069_vm2, %v987_v46, %v1092_v51 }
  0xaf   : > { %v3133_v36 = vcombine.low %v1382_v27, %v1396_v32  ;;  %v1495_v57 = vld [vmem:[#allocation2 + $0xb0] sm:$0xf]  ;;  %v1529_v59 = vrot.slane %v1528_v44, 4  ;;  %v1531_v60 = vshll.u32 %v1494_v52, 16  ;;  %1094 = vst [vmem:[#allocation2 + $0xbc] sm:$0x1] %v1093_v56 }
  0xb0   : > { %v1497_v61 = vld [vmem:[#allocation2 + $0xb8] sm:$0xf]  ;;  %v1536_v62 = vshrl.u32 %v1495_v57, 16  ;;  %v1539_v63 = vshll.u32 %v1495_v57, 16  ;;  %v1519_v0 = vrot.slane %v1517_v54, 5 }
  0xb1   : > { %2595 = vmatmul.mubr.bf16.gmra.mrb[12].mxu1 %v3133_v36  ;;  %v1550_v1 = vshrl.u32 %v1497_v61, 16  ;;  %v1533_v2 = vrot.slane %v1531_v60, 5  ;;  %v1553_v7 = vshll.u32 %v1497_v61, 16  ;;  %v3630_v13 = vld [vmem:[#allocation2 + $0x68] ss:$8 sps:$4 sm:$0xff]  }
  0xb2   : > { %2700 = vmatprep.mubr.bf16.mxu1 %v3625_v35  ;;  %v3626_v4 = vld [vmem:[#allocation2 + $0xf0] ss:$8 sps:$4 sm:$0xff]   ;;  %v1538_v5 = vrot.slane %v1536_v62, 4  ;;  %v1541_v6 = vrot.slane %v1539_v63, 5  ;;  %v1520_v8 = vsel %vm4122_vm5, %v1515_v53, %v1519_v0  ;;  %v989_v29 = vld [vmem:[%s4044_s13 + $0xa4] sm:$0x1] }
  0xb3   : > { %v1552_v9 = vrot.slane %v1550_v1, 4  ;;  %v1534_v10 = vsel %vm4122_vm5, %v1529_v59, %v1533_v2  ;;  %v1555_v12 = vrot.slane %v1553_v7, 5  ;;  %v1000_v14 = vld [vmem:[%s4044_s13 + $0xd0] sm:$0xf]  ;;  %v1002_v17 = vld [vmem:[%s4044_s13 + $0xd8] sm:$0xf] }
  0xb4   : > { %v1542_v11 = vor.u32 %v1541_v6, %v1538_v5  ;;  %v3142_v16 = vcombine.low %v1520_v8, %v1534_v10  ;;  %1119 = vst [vmem:[#allocation2 + $0x100] sm:$0xf] %v1000_v14  ;;  %1123 = vst [vmem:[#allocation2 + $0x108] sm:$0xf] %v1002_v17  ;;  %v3632_v20 = vld [vmem:[#allocation2 + $0x18] ss:$8 sps:$4 sm:$0xff]  }
  0xb5   : > { %v1496_v18 = vld [vmem:[#allocation2 + $0xb4] sm:$0x1]  ;;  %v1556_v19 = vor.u32 %v1555_v12, %v1552_v9  ;;  %v991_v31 = vld [vmem:[%s4044_s13 + $0xac] sm:$0x1]  ;;  %v1096_v32 = vld [vmem:[#allocation2 + $0xc4] sm:$0x1] }
  0xb6   : > { %2635 = vmatprep.mubr.bf16.mxu0 %v3142_v16  ;;  %v1498_v21 = vld [vmem:[#allocation2 + $0xbc] sm:$0x1]  ;;  %v1543_v23 = vrot.slane %v1542_v11, 4  ;;  %v1545_v24 = vshll.u32 %v1496_v18, 16  ;;  %v1097_v34 = vsel %vm4069_vm2, %v989_v29, %v1096_v32  ;;  %v1499_v35 = vld [vmem:[#allocation2 + $0xc0] sm:$0xf] }
  0xb7   : > { %2636 = vmatmul.mubr.bf16.vlgmr.msra.gmra.mrb[16].mxu0 %v3626_v4  ;;  %v1557_v25 = vrot.slane %v1556_v19, 4  ;;  %v1559_v26 = vshll.u32 %v1498_v21, 16  ;;  %v1501_v36 = vld [vmem:[#allocation2 + $0xc8] sm:$0xf]  ;;  %1098 = vst [vmem:[#allocation2 + $0xc4] sm:$0x1] %v1097_v34 }
  0xb8   : > { %3433 = vmatpush3.bf16.msra.mxu0 %v4266_v22  ;;  %v1547_v27 = vrot.slane %v1545_v24, 5  ;;  %v1564_v39 = vshrl.u32 %v1499_v35, 16  ;;  %v1567_v40 = vshll.u32 %v1499_v35, 16  ;;  %v1578_v44 = vshrl.u32 %v1501_v36, 16  ;;  %v3635_v48 = vld [vmem:[#allocation2 + $0x78] ss:$8 sps:$4 sm:$0xff]  }
  0xb9   : > { %2701 = vmatmul.mubr.bf16.vlgmr.msra.gmra.mrb[16].mxu1 %v3627_v49  ;;  %3434 = vmatprep.subr.bf16.mxu0 %v4287_v55  ;;  %v1561_v30 = vrot.slane %v1559_v26, 5  ;;  %v1581_v45 = vshll.u32 %v1501_v36, 16  ;;  %v1004_v51 = vld [vmem:[%s4044_s13 + $0xe0] sm:$0xf]  ;;  %v1006_v52 = vld [vmem:[%s4044_s13 + $0xe8] sm:$0xf] }
  0xba   : > { %3464 = vmatpush3.bf16.msra.mxu1 %v4266_v22  ;;  %2708 = vmatprep.mubr.bf16.mxu1 %v3630_v13  ;;  %v1548_v33 = vsel %vm4122_vm5, %v1543_v23, %v1547_v27  ;;  %v1100_v22 = vld [vmem:[#allocation2 + $0xcc] sm:$0x1]  ;;  %v1566_v46 = vrot.slane %v1564_v39, 4  ;;  %v1569_v47 = vrot.slane %v1567_v40, 5  ;;  %v1580_v49 = vrot.slane %v1578_v44, 4  ;;  %v4341_v61 = vld [vmem:[%s4459_s3 + $0x230] sm:$0xff]  }
  0xbb   : > { %3457 = vmatprep.subr.bf16.mxu1 %v4287_v55  ;;  %v1562_v37 = vsel %vm4122_vm5, %v1557_v25, %v1561_v30  ;;  %v1101_v38 = vsel %vm4069_vm2, %v991_v31, %v1100_v22  ;;  %v3631_v43 = vld [vmem:[#allocation2 + $0x100] ss:$8 sps:$4 sm:$0xff]   ;;  %v1583_v50 = vrot.slane %v1581_v45, 5  ;;  %1127 = vst [vmem:[#allocation2 + $0x110] sm:$0xf] %v1004_v51  ;;  %v4365_v25 = vld [vmem:[%s4459_s3 + $0x238] sm:$0xff]  }
  0xbc   : > { %3435 = vmatpush3.bf16.msra.mxu0 %v4287_v55  ;;  %v3143_v42 = vcombine.low %v1548_v33, %v1562_v37  ;;  %1102 = vst [vmem:[#allocation2 + $0xcc] sm:$0x1] %v1101_v38  ;;  %v4329_v53 = vld [vmem:[%s4459_s3 + $0x228] sm:$0xff]   ;;  %v1570_v54 = vor.u32 %v1569_v47, %v1566_v46  ;;  %1131 = vst [vmem:[#allocation2 + $0x118] sm:$0xf] %v1006_v52 }
  0xbd   : > { %3436 = vmatprep.subr.bf16.mxu0 %v3633_v15  ;;  %v1584_v56 = vor.u32 %v1583_v50, %v1580_v49  ;;  %v993_v57 = vld [vmem:[%s4044_s13 + $0xb4] sm:$0x1]  ;;  %v995_v60 = vld [vmem:[%s4044_s13 + $0xbc] sm:$0x1]  ;;  %v1503_v7 = vld [vmem:[#allocation2 + $0xd0] sm:$0xf] }
  0xbe   : > { %3465 = vmatpush3.bf16.msra.mxu1 %v4287_v55  ;;  %2643 = vmatprep.mubr.bf16.mxu0 %v3143_v42  ;;  %v3637_v55 = vld [vmem:[#allocation2 + $0x28] ss:$8 sps:$4 sm:$0xff]   ;;  %v1500_v59 = vld [vmem:[#allocation2 + $0xc4] sm:$0x1]  ;;  %v1571_v63 = vrot.slane %v1570_v54, 4  ;;  %v1592_v11 = vshrl.u32 %v1503_v7, 16 }
  0xbf   : > { %3458 = vmatprep.subr.bf16.mxu1 %v3633_v15  ;;  %2644 = vmatmul.mubr.bf16.gmra.mrb[20].mxu0 %v3631_v43  ;;  %v1573_v0 = vshll.u32 %v1500_v59, 16  ;;  %v1104_v1 = vld [vmem:[#allocation2 + $0xd4] sm:$0x1]  ;;  %v1585_v2 = vrot.slane %v1584_v56, 4  ;;  %v1108_v6 = vld [vmem:[#allocation2 + $0xdc] sm:$0x1] }
  0xc0   : > { %3437 = vmatpush3.bf16.msra.mxu0 %v3633_v15  ;;  %v1105_v5 = vsel %vm4069_vm2, %v993_v57, %v1104_v1  ;;  %v1109_v9 = vsel %vm4069_vm2, %v995_v60, %v1108_v6  ;;  %v1505_v10 = vld [vmem:[#allocation2 + $0xd8] sm:$0xf]  ;;  %v1595_v12 = vshll.u32 %v1503_v7, 16  ;;  %v1594_v17 = vrot.slane %v1592_v11, 4  ;;  %v1145_v23 = vld [vmem:[%s4357_s21 + $0x8] sm:$0xf] }
  0xc1   : > { %2709 = vmatmul.mubr.bf16.gmra.mrb[20].mxu1 %v3632_v20  ;;  %3438 = vmatprep.subr.bf16.mxu0 %v3634_v28  ;;  %v1575_v8 = vrot.slane %v1573_v0, 5  ;;  %1106 = vst [vmem:[#allocation2 + $0xd4] sm:$0x1] %v1105_v5  ;;  %1110 = vst [vmem:[#allocation2 + $0xdc] sm:$0x1] %v1109_v9  ;;  %v1606_v14 = vshrl.u32 %v1505_v10, 16 }
  0xc2   : > { %3466 = vmatpush3.bf16.msra.mxu1 %v3633_v15  ;;  %2716 = vmatprep.mubr.bf16.mxu1 %v3635_v48  ;;  %v1597_v18 = vrot.slane %v1595_v12, 5  ;;  %v1609_v19 = vshll.u32 %v1505_v10, 16  ;;  %v1146_v24 = vld [vmem:[%s4357_s21 + $0xc] sm:$0x1]  ;;  %v1148_v29 = vld [vmem:[%s4357_s21 + $0x14] sm:$0x1] }
  0xc3   : > { %3459 = vmatprep.subr.bf16.mxu1 %v3634_v28  ;;  %v1502_v62 = vld [vmem:[#allocation2 + $0xcc] sm:$0x1]  ;;  %v1576_v15 = vsel %vm4122_vm5, %v1571_v63, %v1575_v8  ;;  %v3636_v16 = vld [vmem:[#allocation2 + $0x110] ss:$8 sps:$4 sm:$0xff]   ;;  %v1608_v21 = vrot.slane %v1606_v14, 4 }
  0xc4   : > { %3439 = vmatpush3.bf16.msra.mxu0 %v3634_v28  ;;  %v1587_v4 = vshll.u32 %v1502_v62, 16  ;;  %v1598_v27 = vor.u32 %v1597_v18, %v1594_v17  ;;  %1156 = vst [vmem:[#allocation2 + $0x90] sm:$0xf] %v1145_v23  ;;  %v1150_v30 = vld [vmem:[%s4357_s21 + $0x1c] sm:$0x1] }
  0xc5   : > { %3440 = vmatprep.subr.bf16.mxu0 %v4321_v41  ;;  %v1157_v31 = vld [vmem:[#allocation2 + $0x94] sm:$0x1]  ;;  %v1161_v34 = vld [vmem:[#allocation2 + $0xe4] sm:$0x1]  ;;  %v1171_v44 = vld [vmem:[%s866_s19 + $0xc] sm:$0x1] }
  0xc6   : > { %3467 = vmatpush3.bf16.msra.mxu1 %v3634_v28  ;;  %v1589_v13 = vrot.slane %v1587_v4, 5  ;;  %v1611_v28 = vrot.slane %v1609_v19, 5  ;;  %v1158_v33 = vsel %vm4069_vm2, %v1146_v24, %v1157_v31  ;;  %v1165_v22 = vld [vmem:[#allocation2 + $0x134] sm:$0x1]  ;;  %v1162_v36 = vsel %vm4069_vm2, %v1148_v29, %v1161_v34  ;;  %v1169_v38 = vld [vmem:[%s866_s19 + $0x4] sm:$0x1] }
  0xc7   : > { %3460 = vmatprep.subr.bf16.mxu1 %v4321_v41  ;;  %1159 = vst [vmem:[#allocation2 + $0x94] sm:$0x1] %v1158_v33  ;;  %v1166_v37 = vsel %vm4069_vm2, %v1150_v30, %v1165_v22  ;;  %v1599_v40 = vrot.slane %v1598_v27, 4  ;;  %1163 = vst [vmem:[#allocation2 + $0xe4] sm:$0x1] %v1162_v36 }
  0xc8   : > { %v1590_v20 = vsel %vm4122_vm5, %v1585_v2, %v1589_v13  ;;  %3441 = vmatpush3.bf16.msra.mxu0 %v4321_v41  ;;  %v1612_v32 = vor.u32 %v1611_v28, %v1608_v21  ;;  %v1504_v35 = vld [vmem:[#allocation2 + $0xd4] sm:$0x1]  ;;  %v1506_v39 = vld [vmem:[#allocation2 + $0xdc] sm:$0x1]  ;;  %1167 = vst [vmem:[#allocation2 + $0x134] sm:$0x1] %v1166_v37 }
  0xc9   : > { %2717 = vmatmul.mubr.bf16.gmra.mrb[24].mxu1 %v3637_v55  ;;  %v3144_v26 = vcombine.low %v1576_v15, %v1590_v20  ;;  %3442 = vmatprep.subr.bf16.mxu0 %v4329_v53  ;;  %v1615_v43 = vshll.u32 %v1506_v39, 16  ;;  %v1173_v46 = vld [vmem:[%s866_s19 + $0x14] sm:$0x1]  ;;  %v1175_v48 = vld [vmem:[%s866_s19 + $0x1c] sm:$0x1] }
  0xca   : > { %3468 = vmatpush3.bf16.msra.mxu1 %v4321_v41  ;;  %v1601_v41 = vshll.u32 %v1504_v35, 16  ;;  %v1613_v42 = vrot.slane %v1612_v32, 4  ;;  %v1178_v49 = vld [vmem:[#allocation2 + $0x4c] sm:$0x1]  ;;  %v1182_v52 = vld [vmem:[#allocation2 + $0x9c] sm:$0x1] }
  0xcb   : > { %3461 = vmatprep.subr.bf16.mxu1 %v4329_v53  ;;  %2651 = vmatprep.mubr.bf16.mxu0 %v3144_v26  ;;  %v1617_v47 = vrot.slane %v1615_v43, 5  ;;  %v1179_v51 = vsel %vm4069_vm2, %v1169_v38, %v1178_v49  ;;  %v1190_v54 = vld [vmem:[#allocation2 + $0x13c] sm:$0x1]  ;;  %v1183_v56 = vsel %vm4069_vm2, %v1171_v44, %v1182_v52  ;;  %v3640_v60 = vld [vmem:[#allocation2 + $0x88] ss:$8 sps:$4 sm:$0xff]  }
  0xcc   : > { %2652 = vmatmul.mubr.bf16.gmra.mrb[24].mxu0 %v3636_v16  ;;  %v1603_v45 = vrot.slane %v1601_v41, 5  ;;  %1180 = vst [vmem:[#allocation2 + $0x4c] sm:$0x1] %v1179_v51  ;;  %v1191_v59 = vsel %vm4069_vm2, %v1175_v48, %v1190_v54  ;;  %1184 = vst [vmem:[#allocation2 + $0x9c] sm:$0x1] %v1183_v56  ;;  %2724 = vmatprep.mubr.bf16.mxu1 %v3640_v60 }
  0xcd   : > { %3443 = vmatpush3.bf16.msra.mxu0 %v4329_v53  ;;  %v1618_v55 = vsel %vm4122_vm5, %v1613_v42, %v1617_v47  ;;  %1192 = vst [vmem:[#allocation2 + $0x13c] sm:$0x1] %v1191_v59  ;;  %v1010_v63 = vld [vmem:[%s4044_s13 + $0xf8] sm:$0xf]  ;;  %v1143_v0 = vld [vmem:[%s4357_s21] sm:$0xf] }
  0xce   : > { %3469 = vmatpush3.bf16.msra.mxu1 %v4329_v53  ;;  %3444 = vmatprep.subr.bf16.mxu0 %v4341_v61  ;;  %v1604_v50 = vsel %vm4122_vm5, %v1599_v40, %v1603_v45  ;;  %v1186_v53 = vld [vmem:[#allocation2 + $0xec] sm:$0x1]  ;;  %1139 = vst [vmem:[#allocation2 + $0x128] sm:$0xf] %v1010_v63  ;;  %1152 = vst [vmem:[#allocation2 + $0x40] sm:$0xf] %v1143_v0 }
  0xcf   : > { %3462 = vmatprep.subr.bf16.mxu1 %v4341_v61  ;;  %v1187_v57 = vsel %vm4069_vm2, %v1173_v46, %v1186_v53  ;;  %v3145_v62 = vcombine.low %v1604_v50, %v1618_v55  ;;  %v1713_v1 = vld [vmem:[#allocation2 + $0x8] sm:$0xf]  ;;  %v1714_v2 = vld [vmem:[#allocation2 + $0xc] sm:$0x1]  ;;  %v1715_v4 = vld [vmem:[#allocation2 + $0x10] sm:$0xf] }
  0xd0   : > { %1188 = vst [vmem:[#allocation2 + $0xec] sm:$0x1] %v1187_v57  ;;  %v1716_v5 = vld [vmem:[#allocation2 + $0x14] sm:$0x1]  ;;  %v1730_v6 = vshrl.u32 %v1713_v1, 16  ;;  %v1733_v7 = vshll.u32 %v1713_v1, 16 }
  0xd1   : > { %3445 = vmatpush3.bf16.msra.mxu0 %v4341_v61  ;;  %2659 = vmatprep.mubr.bf16.mxu0 %v3145_v62  ;;  %v1739_v8 = vshll.u32 %v1714_v2, 16  ;;  %v1744_v9 = vshrl.u32 %v1715_v4, 16  ;;  %v1721_v10 = vld [vmem:[#allocation2 + $0x28] sm:$0xf]  ;;  %v1747_v11 = vshll.u32 %v1715_v4, 16  ;;  %v1753_v12 = vshll.u32 %v1716_v5, 16 }
  0xd2   : > { %3470 = vmatpush3.bf16.msra.mxu1 %v4341_v61  ;;  %3446 = vmatprep.subr.bf16.mxu0 %v4365_v25  ;;  %v1008_v61 = vld [vmem:[%s4044_s13 + $0xf0] sm:$0xf]  ;;  %v1722_v13 = vld [vmem:[#allocation2 + $0x2c] sm:$0x1]  ;;  %v1732_v14 = vrot.slane %v1730_v6, 4  ;;  %v1735_v15 = vrot.slane %v1733_v7, 5 }
  0xd3   : > { %3463 = vmatprep.subr.bf16.mxu1 %v4365_v25  ;;  %1135 = vst [vmem:[#allocation2 + $0x120] sm:$0xf] %v1008_v61  ;;  %v1741_v16 = vrot.slane %v1739_v8, 5  ;;  %v1746_v17 = vrot.slane %v1744_v9, 4  ;;  %v1723_v18 = vld [vmem:[#allocation2 + $0x30] sm:$0xf] }
  0xd4   : > { %v1749_v19 = vrot.slane %v1747_v11, 5  ;;  %v1755_v20 = vrot.slane %v1753_v12, 5  ;;  %v1724_v21 = vld [vmem:[#allocation2 + $0x34] sm:$0x1]  ;;  %v1786_v23 = vshrl.u32 %v1721_v10, 16  ;;  %v1789_v24 = vshll.u32 %v1721_v10, 16 }
  0xd5   : > { %3447 = vmatpush3.bf16.msra.mxu0 %v4365_v25  ;;  %v1736_v26 = vor.u32 %v1735_v15, %v1732_v14  ;;  %v3642_v27 = vld [vmem:[#allocation2 + $0x38] ss:$8 sps:$4 sm:$0xff]   ;;  %v1795_v32 = vshll.u32 %v1722_v13, 16  ;;  %v1800_v33 = vshrl.u32 %v1723_v18, 16  ;;  %v1803_v34 = vshll.u32 %v1723_v18, 16  ;;  %s3236_s13 = sshll.u32 %s4475_s23, 5 }
  0xd6   : > { %3471 = vmatpush3.bf16.msra.mxu1 %v4365_v25  ;;  %v1750_v28 = vor.u32 %v1749_v19, %v1746_v17  ;;  %v1788_v29 = vrot.slane %v1786_v23, 4  ;;  %v1791_v30 = vrot.slane %v1789_v24, 5  ;;  %v1717_v22 = vld [vmem:[#allocation2 + $0x18] sm:$0xf]  ;;  %v1809_v37 = vshll.u32 %v1724_v21, 16  ;;  %s4427_s29 = scalar_lea.vmem %s4460_s4, %s3236_s13 }
  0xd7   : > { %v1737_v31 = vrot.slane %v1736_v26, 4  ;;  %2725 = vmatmul.mubr.bf16.gmra.mrb[28].mxu1 %v3642_v27  ;;  %v1718_v38 = vld [vmem:[#allocation2 + $0x1c] sm:$0x1]  ;;  %v1719_v39 = vld [vmem:[#allocation2 + $0x20] sm:$0xf]  ;;  %v1797_v41 = vrot.slane %v1795_v32, 5 }
  0xd8   : > { %v1751_v35 = vrot.slane %v1750_v28, 4  ;;  %v1792_v36 = vor.u32 %v1791_v30, %v1788_v29  ;;  %v1802_v42 = vrot.slane %v1800_v33, 4  ;;  %v1805_v43 = vrot.slane %v1803_v34, 5  ;;  %v1720_v44 = vld [vmem:[#allocation2 + $0x24] sm:$0x1] }
  0xd9   : > { %v1742_v40 = vsel %vm4122_vm5, %v1737_v31, %v1741_v16  ;;  %v1811_v47 = vrot.slane %v1809_v37, 5  ;;  %v1758_v48 = vshrl.u32 %v1717_v22, 16  ;;  %v1144_v49 = vld [vmem:[%s4357_s21 + $0x4] sm:$0x1]  ;;  %v1761_v52 = vshll.u32 %v1717_v22, 16 }
  0xda   : > { %v3641_v25 = vld [vmem:[#allocation2 + $0x120] ss:$8 sps:$4 sm:$0xff]   ;;  %v1756_v45 = vsel %vm4122_vm5, %v1751_v35, %v1755_v20  ;;  %v1793_v46 = vrot.slane %v1792_v36, 4  ;;  %v1806_v51 = vor.u32 %v1805_v43, %v1802_v42  ;;  %v1767_v53 = vshll.u32 %v1718_v38, 16  ;;  %v1153_v54 = vld [vmem:[#allocation2 + $0x44] sm:$0x1] }
  0xdb   : > { %2660 = vmatmul.mubr.bf16.gmra.mrb[28].mxu0 %v3641_v25  ;;  %v3154_v50 = vcombine.low %v1742_v40, %v1756_v45  ;;  %v1725_v55 = vld [vmem:[#allocation2 + $0x38] sm:$0xf]  ;;  %v1760_v57 = vrot.slane %v1758_v48, 4  ;;  %v1772_v59 = vshrl.u32 %v1719_v39, 16  ;;  %v1775_v60 = vshll.u32 %v1719_v39, 16 }
  0xdc   : > { %v1798_v56 = vsel %vm4122_vm5, %v1793_v46, %v1797_v41  ;;  %v1807_v62 = vrot.slane %v1806_v51, 4  ;;  %v1763_v61 = vrot.slane %v1761_v52, 5  ;;  %v1769_v63 = vrot.slane %v1767_v53, 5  ;;  %v1726_v1 = vld [vmem:[#allocation2 + $0x3c] sm:$0x1] }
  0xdd   : > { %3448 = vmatprep.mubr.bf16.mxu0 %v3154_v50  ;;  %v1781_v0 = vshll.u32 %v1720_v44, 16  ;;  %v1774_v2 = vrot.slane %v1772_v59, 4  ;;  %v1777_v4 = vrot.slane %v1775_v60, 5  ;;  %v1154_v5 = vsel %vm4069_vm2, %v1144_v49, %v1153_v54  ;;  %v1727_v6 = vld [vmem:[#allocation2 + $0x40] sm:$0xf] }
  0xde   : > { %v1814_v7 = vshrl.u32 %v1725_v55, 16  ;;  %v1812_v8 = vsel %vm4122_vm5, %v1807_v62, %v1811_v47  ;;  %v1764_v9 = vor.u32 %v1763_v61, %v1760_v57  ;;  %1155 = vst [vmem:[#allocation2 + $0x44] sm:$0x1] %v1154_v5  ;;  %v1817_v11 = vshll.u32 %v1725_v55, 16 }
  0xdf   : > { %v1783_v10 = vrot.slane %v1781_v0, 5  ;;  %v3156_v12 = vcombine.low %v1798_v56, %v1812_v8  ;;  %v1778_v13 = vor.u32 %v1777_v4, %v1774_v2  ;;  %v1823_v15 = vshll.u32 %v1726_v1, 16 }
  0xe0   : > { %v1816_v14 = vrot.slane %v1814_v7, 4  ;;  %v1765_v16 = vrot.slane %v1764_v9, 4  ;;  %v1819_v17 = vrot.slane %v1817_v11, 5  ;;  %v1828_v18 = vshrl.u32 %v1727_v6, 16 }
  0xe1   : > { %v1831_v19 = vshll.u32 %v1727_v6, 16  ;;  %3452 = vmatprep.mubr.bf16.mxu1 %v3156_v12  ;;  %v1779_v3 = vrot.slane %v1778_v13, 4  ;;  %v1825_v28 = vrot.slane %v1823_v15, 5 }
  0xe2   : > { %v1770_v20 = vsel %vm4122_vm5, %v1765_v16, %v1769_v63  ;;  %v1820_v21 = vor.u32 %v1819_v17, %v1816_v14  ;;  %v1830_v23 = vrot.slane %v1828_v18, 4 }
  0xe3   : > { %v1833_v24 = vrot.slane %v1831_v19, 5  ;;  %v1784_v25 = vsel %vm4122_vm5, %v1779_v3, %v1783_v10 }
  0xe4   : > { %v3155_v26 = vcombine.low %v1770_v20, %v1784_v25  ;;  %v1821_v27 = vrot.slane %v1820_v21, 4 }
  0xe5   : > { %v1834_v29 = vor.u32 %v1833_v24, %v1830_v23  ;;  %v1728_v30 = vld [vmem:[#allocation2 + $0x44] sm:$0x1] }
  0xe6   : > { %3449 = vmatmul.mubr.bf16.vlgmr.msra.gmra.mrb[32].mxu0 %v3155_v26  ;;  %v1837_v32 = vshll.u32 %v1728_v30, 16  ;;  %v1826_v33 = vsel %vm4122_vm5, %v1821_v27, %v1825_v28 }
  0xe7   : > { %v1835_v31 = vrot.slane %v1834_v29, 4 }
  0xe8   : > { %v1839_v34 = vrot.slane %v1837_v32, 5 }
  0xea   : > { %v1840_v22 = vsel %vm4122_vm5, %v1835_v31, %v1839_v34 }
  0xeb   : > { %v3157_v35 = vcombine.low %v1826_v33, %v1840_v22 }
  0xed   : > { %3453 = vmatmul.mubr.bf16.vlgmr.msra.gmra.mrb[32].mxu1 %v3157_v35 }
 0x150   : > { %v3276_v36 = vpop.f32.mrb[0].mxu0 }
 0x151   : > { %v3277_v37 = vpop.f32.mrb[1].mxu0 }
 0x152   : > { %v3278_v38 = vadd.f32 %v3277_v37, %v3276_v36  ;;  %v3279_v39 = vpop.f32.mrb[2].mxu0 }
 0x153   : > { %v3280_v40 = vpop.f32.mrb[3].mxu0 }
 0x154   : > { %v3281_v41 = vadd.f32 %v3280_v40, %v3279_v39 }
 0x15b   : > { %v3316_v42 = vpop.f32.mrb[0].mxu1 }
 0x15c   : > { %v3317_v43 = vpop.f32.mrb[1].mxu1 }
 0x15d   : > { %v3318_v44 = vadd.f32 %v3317_v43, %v3316_v42  ;;  %v3319_v45 = vpop.f32.mrb[2].mxu1 }
 0x15e   : > { %v3320_v46 = vpop.f32.mrb[3].mxu1 }
 0x15f   : > { %v2573_v47 = vadd.f32 %v3318_v44, %v3278_v38  ;;  %v3321_v48 = vadd.f32 %v3320_v46, %v3319_v45 }
 0x160   : > { %v3282_v50 = vpop.f32.mrb[4].mxu0 }
 0x161   : > { %v2576_v49 = vadd.f32 %v3321_v48, %v3281_v41  ;;  %v3283_v51 = vpop.f32.mrb[5].mxu0 }
 0x162   : > { %v3284_v58 = vadd.f32 %v3283_v51, %v3282_v50  ;;  %v3285_v52 = vpop.f32.mrb[6].mxu0 }
 0x163   : > { %v3286_v53 = vpop.f32.mrb[7].mxu0 }
 0x164   : > { %v3287_v54 = vadd.f32 %v3286_v53, %v3285_v52 }
 0x169   : > { %v3288_v63 = vpop.f32.mrb[8].mxu0 }
 0x16a   : > { %v3289_v1 = vpop.f32.mrb[9].mxu0 }
 0x16b   : > { %v3290_v2 = vadd.f32 %v3289_v1, %v3288_v63  ;;  %v3291_v4 = vpop.f32.mrb[10].mxu0 }
 0x16c   : > { %v3292_v5 = vpop.f32.mrb[11].mxu0 }
 0x16d   : > { %v3322_v55 = vpop.f32.mrb[4].mxu1  ;;  %v3293_v6 = vadd.f32 %v3292_v5, %v3291_v4 }
 0x16e   : > { %v3323_v56 = vpop.f32.mrb[5].mxu1 }
 0x16f   : > { %v3324_v57 = vadd.f32 %v3323_v56, %v3322_v55  ;;  %v3325_v59 = vpop.f32.mrb[6].mxu1 }
 0x170   : > { %v3326_v60 = vpop.f32.mrb[7].mxu1 }
 0x171   : > { %v2581_v62 = vadd.f32 %v3324_v57, %v3284_v58  ;;  %v3327_v61 = vadd.f32 %v3326_v60, %v3325_v59 }
 0x173   : > { %v2584_v0 = vadd.f32 %v3327_v61, %v3287_v54 }
 0x176   : > { %v3328_v7 = vpop.f32.mrb[8].mxu1 }
 0x177   : > { %v3329_v8 = vpop.f32.mrb[9].mxu1 }
 0x178   : > { %v3330_v9 = vadd.f32 %v3329_v8, %v3328_v7  ;;  %v3331_v10 = vpop.f32.mrb[10].mxu1  ;;  %v3294_v15 = vpop.f32.mrb[12].mxu0 }
 0x179   : > { %v3332_v11 = vpop.f32.mrb[11].mxu1  ;;  %v3295_v16 = vpop.f32.mrb[13].mxu0 }
 0x17a   : > { %v2589_v12 = vadd.f32 %v3330_v9, %v3290_v2  ;;  %v3333_v13 = vadd.f32 %v3332_v11, %v3331_v10  ;;  %v3296_v17 = vadd.f32 %v3295_v16, %v3294_v15  ;;  %v3297_v18 = vpop.f32.mrb[14].mxu0 }
 0x17b   : > { %v3298_v19 = vpop.f32.mrb[15].mxu0 }
 0x17c   : > { %v2592_v14 = vadd.f32 %v3333_v13, %v3293_v6  ;;  %v3299_v3 = vadd.f32 %v3298_v19, %v3297_v18 }
 0x184   : > { %v3334_v20 = vpop.f32.mrb[12].mxu1 }
 0x185   : > { %v3335_v21 = vpop.f32.mrb[13].mxu1 }
 0x186   : > { %v3336_v23 = vadd.f32 %v3335_v21, %v3334_v20  ;;  %v3337_v24 = vpop.f32.mrb[14].mxu1 }
 0x187   : > { %v3338_v25 = vpop.f32.mrb[15].mxu1 }
 0x188   : > { %v2597_v26 = vadd.f32 %v3336_v23, %v3296_v17  ;;  %v3339_v27 = vadd.f32 %v3338_v25, %v3337_v24 }
 0x18a   : > { %v2600_v28 = vadd.f32 %v3339_v27, %v3299_v3  ;;  %v3356_v22 = vpop.f32.mrb[16].mxu0 }
 0x18b   : > { %v3357_v35 = vpop.f32.mrb[17].mxu0 }
 0x18c   : > { %v3396_v29 = vpop.f32.mrb[16].mxu1  ;;  %v3358_v36 = vadd.f32 %v3357_v35, %v3356_v22  ;;  %v3359_v37 = vpop.f32.mrb[18].mxu0 }
 0x18d   : > { %v3397_v30 = vpop.f32.mrb[17].mxu1  ;;  %v3360_v38 = vpop.f32.mrb[19].mxu0 }
 0x18e   : > { %v3398_v31 = vadd.f32 %v3397_v30, %v3396_v29  ;;  %v3399_v32 = vpop.f32.mrb[18].mxu1  ;;  %v2638_v40 = vadd.f32 %v3358_v36, %v2573_v47  ;;  %v3361_v41 = vadd.f32 %v3360_v38, %v3359_v37 }
 0x18f   : > { %v3400_v33 = vpop.f32.mrb[19].mxu1 }
 0x190   : > { %v3401_v34 = vadd.f32 %v3400_v33, %v3399_v32  ;;  %v2641_v45 = vadd.f32 %v3361_v41, %v2576_v49  ;;  %v2703_v48 = vadd.f32 %v3398_v31, %v2638_v40 }
 0x192   : > { %v3362_v51 = vpop.f32.mrb[20].mxu0  ;;  %v2706_v58 = vadd.f32 %v3401_v34, %v2641_v45 }
 0x193   : > { %v3363_v52 = vpop.f32.mrb[21].mxu0 }
 0x194   : > { %v3402_v39 = vpop.f32.mrb[20].mxu1  ;;  %v3364_v53 = vadd.f32 %v3363_v52, %v3362_v51  ;;  %v3365_v54 = vpop.f32.mrb[22].mxu0 }
 0x195   : > { %v3403_v42 = vpop.f32.mrb[21].mxu1  ;;  %v3366_v55 = vpop.f32.mrb[23].mxu0 }
 0x196   : > { %v3404_v43 = vadd.f32 %v3403_v42, %v3402_v39  ;;  %v3405_v44 = vpop.f32.mrb[22].mxu1  ;;  %v2646_v57 = vadd.f32 %v3364_v53, %v2581_v62  ;;  %v3367_v59 = vadd.f32 %v3366_v55, %v3365_v54 }
 0x197   : > { %v3406_v46 = vpop.f32.mrb[23].mxu1 }
 0x198   : > { %v3407_v50 = vadd.f32 %v3406_v46, %v3405_v44  ;;  %v2649_v63 = vadd.f32 %v3367_v59, %v2584_v0  ;;  %v2711_v2 = vadd.f32 %v3404_v43, %v2646_v57 }
 0x19a   : > { %v2714_v49 = vadd.f32 %v3407_v50, %v2649_v63 }
 0x19c   : > { %v3408_v56 = vpop.f32.mrb[24].mxu1 }
 0x19d   : > { %v3409_v60 = vpop.f32.mrb[25].mxu1 }
 0x19e   : > { %v3410_v61 = vadd.f32 %v3409_v60, %v3408_v56  ;;  %v3411_v47 = vpop.f32.mrb[26].mxu1 }
 0x19f   : > { %v3412_v1 = vpop.f32.mrb[27].mxu1  ;;  %v3368_v5 = vpop.f32.mrb[24].mxu0 }
 0x1a0   : > { %v3413_v4 = vadd.f32 %v3412_v1, %v3411_v47  ;;  %v3369_v6 = vpop.f32.mrb[25].mxu0 }
 0x1a1   : > { %v3370_v7 = vadd.f32 %v3369_v6, %v3368_v5  ;;  %v3371_v8 = vpop.f32.mrb[26].mxu0 }
 0x1a2   : > { %v3372_v9 = vpop.f32.mrb[27].mxu0 }
 0x1a3   : > { %v2654_v10 = vadd.f32 %v3370_v7, %v2589_v12  ;;  %v3373_v11 = vadd.f32 %v3372_v9, %v3371_v8 }
 0x1a5   : > { %v2657_v13 = vadd.f32 %v3373_v11, %v2592_v14  ;;  %v2719_v15 = vadd.f32 %v3410_v61, %v2654_v10 }
 0x1a7   : > { %v2722_v16 = vadd.f32 %v3413_v4, %v2657_v13 }
 0x1aa   : > { %v3414_v18 = vpop.f32.mrb[28].mxu1 }
 0x1ab   : > { %v3415_v3 = vpop.f32.mrb[29].mxu1 }
 0x1ac   : > { %v3416_v21 = vadd.f32 %v3415_v3, %v3414_v18  ;;  %v3417_v23 = vpop.f32.mrb[30].mxu1 }
 0x1ad   : > { %v3418_v27 = vpop.f32.mrb[31].mxu1 }
 0x1ae   : > { %v3374_v62 = vpop.f32.mrb[28].mxu0  ;;  %v3419_v29 = vadd.f32 %v3418_v27, %v3417_v23 }
 0x1af   : > { %v3375_v17 = vpop.f32.mrb[29].mxu0 }
 0x1b0   : > { %v3376_v0 = vadd.f32 %v3375_v17, %v3374_v62  ;;  %v3377_v19 = vpop.f32.mrb[30].mxu0 }
 0x1b1   : > { %v3378_v20 = vpop.f32.mrb[31].mxu0 }
 0x1b2   : > { %v2662_v24 = vadd.f32 %v3376_v0, %v2597_v26  ;;  %v3379_v25 = vadd.f32 %v3378_v20, %v3377_v19 }
 0x1b4   : > { %v2665_v12 = vadd.f32 %v3379_v25, %v2600_v28  ;;  %v2727_v30 = vadd.f32 %v3416_v21, %v2662_v24 }
 0x1b6   : > { %v2730_v14 = vadd.f32 %v3419_v29, %v2665_v12 }
 0x1b9   : > { %v3450_v31 = vpop.f32.mrb[32].mxu0 }
 0x1ba   : > { %v2776_v32 = vadd.f32 %v3450_v31, %v2711_v2  ;;  %v2767_v33 = vpop.f32.mrb[33].mxu0 }
 0x1bb   : > { %v2768_v34 = vadd.f32 %v2767_v33, %v2703_v48  ;;  %v3451_v22 = vpop.f32.mrb[34].mxu0 }
 0x1bc   : > { %v2779_v35 = vadd.f32 %v3451_v22, %v2714_v49  ;;  %v2770_v36 = vpop.f32.mrb[35].mxu0  ;;  %v2830_v42 = vmul.f32 %v2776_v32, %v2776_v32 }
 0x1bd   : > { %v2771_v26 = vadd.f32 %v2770_v36, %v2706_v58  ;;  %v2828_v37 = vmul.f32 %v2768_v34, %v2768_v34 }
 0x1be   : > { %v3245_v28 = vpack.c.bf16 %v2779_v35, %v2776_v32  ;;  %v2831_v51 = vmul.f32 %v2779_v35, %v2779_v35 }
 0x1bf   : > { %v3240_v38 = vpack.c.bf16 %v2771_v26, %v2768_v34  ;;  %v2814_v39 = vadd.f32 %v2771_v26, %v2768_v34  ;;  %v2829_v40 = vmul.f32 %v2771_v26, %v2771_v26 }
 0x1c0   : > { %v3454_v41 = vpop.f32.mrb[32].mxu1  ;;  %3257 = vst [vmem:[%s4427_s29 + $0x8] sm:$0xff] %v3245_v28  }
 0x1c1   : > { %v2792_v43 = vadd.f32 %v3454_v41, %v2727_v30  ;;  %v2783_v44 = vpop.f32.mrb[33].mxu1  ;;  %3241 = vst [vmem:[%s4427_s29] sm:$0xff] %v3240_v38   ;;  %v2815_v45 = vadd.f32 %v2814_v39, %v2776_v32  ;;  %v2836_v46 = vadd.f32 %v2829_v40, %v2828_v37 }
 0x1c2   : > { %v2784_v48 = vadd.f32 %v2783_v44, %v2719_v15  ;;  %v3455_v50 = vpop.f32.mrb[34].mxu1 }
 0x1c3   : > { %v2795_v52 = vadd.f32 %v3455_v50, %v2730_v14  ;;  %v2837_v58 = vadd.f32 %v2836_v46, %v2830_v42  ;;  %v2786_v53 = vpop.f32.mrb[35].mxu1  ;;  %v2816_v54 = vadd.f32 %v2815_v45, %v2779_v35  ;;  %v2834_v2 = vmul.f32 %v2792_v43, %v2792_v43 }
 0x1c4   : > { %v2787_v55 = vadd.f32 %v2786_v53, %v2722_v16  ;;  %v2832_v56 = vmul.f32 %v2784_v48, %v2784_v48 }
 0x1c5   : > { %v3255_v57 = vpack.c.bf16 %v2795_v52, %v2792_v43  ;;  %v2817_v59 = vadd.f32 %v2816_v54, %v2784_v48  ;;  %v2838_v60 = vadd.f32 %v2837_v58, %v2831_v51  ;;  %v2835_v5 = vmul.f32 %v2795_v52, %v2795_v52 }
 0x1c6   : > { %v3250_v61 = vpack.c.bf16 %v2787_v55, %v2784_v48  ;;  %v2833_v63 = vmul.f32 %v2787_v55, %v2787_v55 }
 0x1c7   : > { %3259 = vst [vmem:[%s4427_s29 + $0x18] sm:$0xff] %v3255_v57   ;;  %v2818_v47 = vadd.f32 %v2817_v59, %v2787_v55  ;;  %v2839_v1 = vadd.f32 %v2838_v60, %v2832_v56 }
 0x1c8   : > { %3258 = vst [vmem:[%s4427_s29 + $0x10] sm:$0xff] %v3250_v61  }
 0x1c9   : > { %v2819_v4 = vadd.f32 %v2818_v47, %v2792_v43  ;;  %v2840_v49 = vadd.f32 %v2839_v1, %v2833_v63 }
 0x1cb   : > { %v2820_v6 = vadd.f32 %v2819_v4, %v2795_v52  ;;  %v2841_v7 = vadd.f32 %v2840_v49, %v2834_v2 }
 0x1cd   : > { %v2821_v8 = vrot.slane %v2820_v6, 4  ;;  %v2842_v9 = vadd.f32 %v2841_v7, %v2835_v5 }
 0x1cf   : > { %v2822_v10 = vadd.f32 %v2821_v8, %v2820_v6  ;;  %v2843_v11 = vrot.slane %v2842_v9, 4 }
 0x1d1   : > { %v2823_v13 = vrot.slane %v2822_v10, 2  ;;  %v2844_v15 = vadd.f32 %v2843_v11, %v2842_v9 }
 0x1d3   : > { %v2824_v16 = vadd.f32 %v2823_v13, %v2822_v10  ;;  %v2845_v62 = vrot.slane %v2844_v15, 2 }
 0x1d5   : > { %v2825_v17 = vrot.slane %v2824_v16, 1  ;;  %v2846_v18 = vadd.f32 %v2845_v62, %v2844_v15 }
 0x1d7   : > { %v2826_v0 = vadd.f32 %v2825_v17, %v2824_v16  ;;  %v2847_v19 = vrot.slane %v2846_v18, 1 }
 0x1d9   : > { %2827 = vst [vmem:[%s940_s9] sm:$0x1] %v2826_v0  ;;  %v2848_v3 = vadd.f32 %v2847_v19, %v2846_v18 }
 0x1db   : > { %2849 = vst [vmem:[%s945_s12] sm:$0x1] %v2848_v3 }
 0x1dc PF: > { %s17_s25 = sadd.s32 1, %s3699_s25   ;;  %s4468_s21 = smov %s3687_s22 }
 0x1dd   : > { %p14_p11 = scmp.ge.s32.totalorder %s17_s25, 4   ;;  %s4469_s22 = smov %s3779_s30 }
 0x1de   : > { %s4470_s23 = smov %s3695_s24  ;;  %s4471_s24 = smov %s4473_s26 }
 0x1df   :  { %16 = sbr.rel (!%p14_p11) target bundleno = 3 (0x3), region = 298 }

</bundles_post_ra>
